<compile_context>
chip_gen: v5e
topology: v5e:2x2
jax: 0.10.0
libtpu: 0.0.40
codegen_flags: <defaults>
</compile_context>

<pallas_src>
import math
import functools

import jax
import jax.numpy as jnp
from jax.experimental import pallas as pl
from jax.experimental.pallas import tpu as pltpu


MATMUL_DTYPE = jnp.bfloat16     # MXU operand dtype; accumulation stays float32
OUT_PAD = 128                   # lane-dense padded width of the observation head


# ------------------------------ fused kernel --------------------------------


def _fdm_kernel(
    # per-batch activations (leading batch dim squeezed -> [Tc, ...])
    ctxla_ref, dpos_ref, epos_ref,
    # fused (block-diagonal) input / latent-action embedding
    w_emb_ref, b_emb_ref,
    # self-attention: per-layer stacked fused QKV + layer-concatenated pos weights
    sa_wqkv_ref, sa_bqkv_ref, sa_wqk_all_ref, sa_wo_ref, sa_bo_ref,
    # cross-attention: per-layer Q, layer-concatenated Q-pos / K / V, output proj
    ca_wq_ref, ca_bq_ref, ca_wq_all_ref,
    ca_wk_all_ref, ca_bk_all_ref, ca_wv_all_ref, ca_bv_all_ref,
    ca_wo_ref, ca_bo_ref,
    # feed-forward
    ffn_w1_ref, ffn_b1_ref, ffn_w2_ref, ffn_b2_ref,
    # per-layer layer norms
    n1g_ref, n1b_ref, n2g_ref, n2b_ref, n3g_ref, n3b_ref,
    # final norm + lane-padded observation head
    fng_ref, fnb_ref, w_out_ref, b_out_ref,
    # output [Tc, OUT_PAD]
    out_ref,
    *, num_layers, num_heads, embed_dim, eps=1e-5):
    """One grid step == one batch element. All weights stay resident in VMEM."""

    E = embed_dim
    dh = E // num_heads
    scale = 1.0 / math.sqrt(dh)

    def mm(a, w):
        # bf16 operands on the MXU, f32 accumulation.
        return jnp.dot(a.astype(w.dtype), w, preferred_element_type=jnp.float32)

    def layernorm(x, g, b):
        mu = jnp.mean(x, axis=-1, keepdims=True)
        var = jnp.mean(jnp.square(x - mu), axis=-1, keepdims=True)
        return (x - mu) * jax.lax.rsqrt(var + eps) * g + b

    def attention(q, k, v, wo, bo):
        # q, k, v: [Tc, E] f32, heads packed along the lane axis.
        q16 = q.astype(MATMUL_DTYPE)
        k16 = k.astype(MATMUL_DTYPE)
        v16 = v.astype(MATMUL_DTYPE)
        heads = []
        for h in range(num_heads):
            c = h * dh
            qh = q16[:, c:c + dh]                    # [Tc, dh]
            kh = k16[:, c:c + dh]                    # [Tc, dh]
            vh = v16[:, c:c + dh]                    # [Tc, dh]
            # scores = qh @ kh.T without materializing a transpose
            s = jax.lax.dot_general(
                qh, kh, (((1,), (1,)), ((), ())),
                preferred_element_type=jnp.float32) * scale
            s = s - jnp.max(s, axis=-1, keepdims=True)
            p = jnp.exp(s)
            p = p * pl.reciprocal(jnp.sum(p, axis=-1, keepdims=True), approx=True)
            heads.append(jnp.dot(p.astype(MATMUL_DTYPE), vh,
                                 preferred_element_type=jnp.float32))
        attn = jnp.concatenate(heads, axis=-1)       # [Tc, E] (vreg value, no scratch)
        return mm(attn, wo) + bo

    qpos = dpos_ref[...]                             # decoder (query) pos embed [Tc, E]
    kpos = epos_ref[...]                             # encoder (memory) pos embed [Tc, E]

    # ---- fused input / latent-action embedding (block-diagonal weight) ------
    emb = mm(ctxla_ref[...], w_emb_ref[...]) + b_emb_ref[...]   # [Tc, 2E]
    x = emb[:, :E]
    x = jnp.where(x >= 0.0, x, 0.2 * x)              # nn.LeakyReLU(0.2)
    mem = emb[:, E:]

    # ---- layer-invariant projections hoisted out of the layer loop ----------
    sa_pos_qk = mm(qpos, sa_wqk_all_ref[...])                              # [Tc, 2*L*E]
    ca_pos_q = mm(qpos, ca_wq_all_ref[...])                                # [Tc, L*E]
    ca_k_all = mm(mem + kpos, ca_wk_all_ref[...]) + ca_bk_all_ref[...]     # [Tc, L*E]
    ca_v_all = mm(mem, ca_wv_all_ref[...]) + ca_bv_all_ref[...]            # [Tc, L*E]

    # ---- ACT decoder layers (post-norm) --------------------------------------
    for li in range(num_layers):
        # self-attention: q = k = x + query_pos, v = x  (fused QKV projection)
        xqkv = mm(x, sa_wqkv_ref[li]) + sa_bqkv_ref[li]                    # [Tc, 3E]
        qk = xqkv[:, :2 * E] + sa_pos_qk[:, li * 2 * E:(li + 1) * 2 * E]
        v = xqkv[:, 2 * E:]
        sa = attention(qk[:, :E], qk[:, E:], v, sa_wo_ref[li], sa_bo_ref[li])
        x = layernorm(x + sa, n1g_ref[li], n1b_ref[li])

        # cross-attention: q = x + query_pos, k = mem + pos, v = mem (k/v hoisted)
        q = mm(x, ca_wq_ref[li]) + ca_bq_ref[li] + ca_pos_q[:, li * E:(li + 1) * E]
        k = ca_k_all[:, li * E:(li + 1) * E]
        v = ca_v_all[:, li * E:(li + 1) * E]
        ca = attention(q, k, v, ca_wo_ref[li], ca_bo_ref[li])
        x = layernorm(x + ca, n2g_ref[li], n2b_ref[li])

        # feed-forward (ReLU)
        h = jnp.maximum(mm(x, ffn_w1_ref[li]) + ffn_b1_ref[li], 0.0)
        h = mm(h, ffn_w2_ref[li]) + ffn_b2_ref[li]
        x = layernorm(x + h, n3g_ref[li], n3b_ref[li])

    # ---- final norm + observation head (lane-dense 128-wide store) -----------
    x = layernorm(x, fng_ref[...], fnb_ref[...])
    out_ref[...] = mm(x, w_out_ref[...]) + b_out_ref[...]


# ------------------------------ parameters ----------------------------------


def _dense(key, fan_in, fan_out):
    k1, k2 = jax.random.split(key)
    w = jax.random.normal(k1, (fan_in, fan_out), jnp.float32) * 0.02
    b = jax.random.normal(k2, (fan_out,), jnp.float32) * 0.02
    return w, b


def init_params(key, input_dim, target_dim, la_dim, embed_dim, ffn_dim,
                num_layers, num_heads):
    del num_heads  # heads only affect the kernel, not parameter shapes
    keys = jax.random.split(key, 4 + num_layers)
    p = {}
    p["input_embed_w"], p["input_embed_b"] = _dense(keys[0], input_dim, embed_dim)
    p["la_embed_w"], p["la_embed_b"] = _dense(keys[1], la_dim, embed_dim)
    p["to_obs_w"], p["to_obs_b"] = _dense(keys[2], embed_dim, target_dim)

    layers = []
    for li in range(num_layers):
        lk = jax.random.split(keys[4 + li], 10)

        def attn(ks):
            wq, bq = _dense(ks[0], embed_dim, embed_dim)
            wk, bk = _dense(ks[1], embed_dim, embed_dim)
            wv, bv = _dense(ks[2], embed_dim, embed_dim)
            wo, bo = _dense(ks[3], embed_dim, embed_dim)
            return dict(wq=wq, bq=bq, wk=wk, bk=bk, wv=wv, bv=bv, wo=wo, bo=bo)

        w1, b1 = _dense(lk[8], embed_dim, ffn_dim)
        w2, b2 = _dense(lk[9], ffn_dim, embed_dim)
        layers.append(dict(
            self_attn=attn(lk[0:4]),
            cross_attn=attn(lk[4:8]),
            ffn_w1=w1, ffn_b1=b1, ffn_w2=w2, ffn_b2=b2,
            norm1_g=jnp.ones(embed_dim), norm1_b=jnp.zeros(embed_dim),
            norm2_g=jnp.ones(embed_dim), norm2_b=jnp.zeros(embed_dim),
            norm3_g=jnp.ones(embed_dim), norm3_b=jnp.zeros(embed_dim),
        ))
    p["decoder"] = dict(layers=layers,
                        final_norm_g=jnp.ones(embed_dim),
                        final_norm_b=jnp.zeros(embed_dim))
    return p


def pack_params(params, target_dim, matmul_dtype=MATMUL_DTYPE):
    """Fuse / stack / lane-pad weights for the kernel.

    * Input + latent-action embeddings -> one block-diagonal [D+A, 2E] matmul.
    * Self-attn Q/K/V fused per layer [L, E, 3E]; Q|K also layer-concatenated
      [E, 2LE] for the hoisted query_pos contribution.
    * Cross-attn K/V/Q-pos layer-concatenated [E, LE] (hoisted out of the loop).
    * Matmul weights cast to bf16; biases / LN params stay f32 [.., 1, N].
    * Observation head lane-padded to OUT_PAD columns.
    """
    layers = params["decoder"]["layers"]
    E = params["input_embed_w"].shape[1]
    D = params["input_embed_w"].shape[0]
    A = params["la_embed_w"].shape[0]

    w_emb = jnp.zeros((D + A, 2 * E), jnp.float32)
    w_emb = w_emb.at[:D, :E].set(params["input_embed_w"])
    w_emb = w_emb.at[D:, E:].set(params["la_embed_w"])
    b_emb = jnp.concatenate([params["input_embed_b"],
                             params["la_embed_b"]])[None, :]

    def stack_w(fn):                                   # per-layer matmul weights
        return jnp.stack([fn(l) for l in layers]).astype(matmul_dtype)

    def stack_b(fn):                                   # biases / LN params -> [L, 1, N]
        return jnp.stack([fn(l)[None, :] for l in layers]).astype(jnp.float32)

    def cat_w(fn):                                     # layer-concat along lanes
        return jnp.concatenate([fn(l) for l in layers], axis=1).astype(matmul_dtype)

    def cat_b(fn):
        return jnp.concatenate([fn(l) for l in layers])[None, :].astype(jnp.float32)

    w_out = jnp.zeros((E, OUT_PAD), jnp.float32)
    w_out = w_out.at[:, :target_dim].set(params["to_obs_w"])
    b_out = jnp.zeros((1, OUT_PAD), jnp.float32)
    b_out = b_out.at[0, :target_dim].set(params["to_obs_b"])

    return dict(
        w_emb=w_emb.astype(matmul_dtype), b_emb=b_emb,
        # self-attention
        sa_wqkv=stack_w(lambda l: jnp.concatenate(
            [l["self_attn"]["wq"], l["self_attn"]["wk"], l["self_attn"]["wv"]],
            axis=1)),
        sa_bqkv=stack_b(lambda l: jnp.concatenate(
            [l["self_attn"]["bq"], l["self_attn"]["bk"], l["self_attn"]["bv"]])),
        sa_wqk_all=cat_w(lambda l: jnp.concatenate(
            [l["self_attn"]["wq"], l["self_attn"]["wk"]], axis=1)),
        sa_wo=stack_w(lambda l: l["self_attn"]["wo"]),
        sa_bo=stack_b(lambda l: l["self_attn"]["bo"]),
        # cross-attention
        ca_wq=stack_w(lambda l: l["cross_attn"]["wq"]),
        ca_bq=stack_b(lambda l: l["cross_attn"]["bq"]),
        ca_wq_all=cat_w(lambda l: l["cross_attn"]["wq"]),
        ca_wk_all=cat_w(lambda l: l["cross_attn"]["wk"]),
        ca_bk_all=cat_b(lambda l: l["cross_attn"]["bk"]),
        ca_wv_all=cat_w(lambda l: l["cross_attn"]["wv"]),
        ca_bv_all=cat_b(lambda l: l["cross_attn"]["bv"]),
        ca_wo=stack_w(lambda l: l["cross_attn"]["wo"]),
        ca_bo=stack_b(lambda l: l["cross_attn"]["bo"]),
        # FFN
        ffn_w1=stack_w(lambda l: l["ffn_w1"]), ffn_b1=stack_b(lambda l: l["ffn_b1"]),
        ffn_w2=stack_w(lambda l: l["ffn_w2"]), ffn_b2=stack_b(lambda l: l["ffn_b2"]),
        # layer norms
        n1g=stack_b(lambda l: l["norm1_g"]), n1b=stack_b(lambda l: l["norm1_b"]),
        n2g=stack_b(lambda l: l["norm2_g"]), n2b=stack_b(lambda l: l["norm2_b"]),
        n3g=stack_b(lambda l: l["norm3_g"]), n3b=stack_b(lambda l: l["norm3_b"]),
        fng=params["decoder"]["final_norm_g"][None, :],
        fnb=params["decoder"]["final_norm_b"][None, :],
        # lane-padded observation head
        w_out=w_out.astype(matmul_dtype), b_out=b_out,
    )


def get_sine_pos_encoding(max_len, dim):
    pos = jnp.arange(max_len, dtype=jnp.float32)[:, None]
    div = jnp.exp(jnp.arange(0, dim, 2, dtype=jnp.float32) * (-math.log(10000.0) / dim))
    pe = jnp.zeros((max_len, dim), dtype=jnp.float32)
    pe = pe.at[:, 0::2].set(jnp.sin(pos * div))
    pe = pe.at[:, 1::2].set(jnp.cos(pos * div))
    return pe


# -------------------------------- forward -----------------------------------


_WEIGHT_KEYS = (
    "w_emb", "b_emb",
    "sa_wqkv", "sa_bqkv", "sa_wqk_all", "sa_wo", "sa_bo",
    "ca_wq", "ca_bq", "ca_wq_all",
    "ca_wk_all", "ca_bk_all", "ca_wv_all", "ca_bv_all",
    "ca_wo", "ca_bo",
    "ffn_w1", "ffn_b1", "ffn_w2", "ffn_b2",
    "n1g", "n1b", "n2g", "n2b", "n3g", "n3b",
    "fng", "fnb", "w_out", "b_out",
)


def transformer_fdm_forward(packed, observations, la, timesteps, *,
                            num_heads, target_dim, pos_table):
    """
    observations: [B, T, D], la: [B, T, la_dim], timesteps: [B, T] int32
    returns reconstructed obs: [B, T-1, target_dim]
    """
    B, T, D = observations.shape
    Tc = T - 1
    E = packed["fng"].shape[-1]
    num_layers = packed["sa_wo"].shape[0]

    # fused embedding input (block-diagonal weight inside the kernel)
    ctxla = jnp.concatenate([observations[:, :-1], la[:, 1:]], axis=-1)   # [B,Tc,D+A]
    # sine positional table gather stays in XLA (tiny dynamic-index gather)
    dpos = pos_table[timesteps[:, :-1]]                                   # [B,Tc,E]
    epos = pos_table[timesteps[:, 1:]]                                    # [B,Tc,E]

    weights = [packed[k] for k in _WEIGHT_KEYS]

    def act_spec(a):  # one batch element per grid step, batch dim squeezed
        return pl.BlockSpec((None,) + a.shape[1:], lambda b: (b, 0, 0))

    def full_spec(a):  # whole weight resident; block index constant over the grid
        zeros = (0,) * a.ndim
        return pl.BlockSpec(a.shape, lambda b, _z=zeros: _z)

    kernel = functools.partial(
        _fdm_kernel, num_layers=int(num_layers), num_heads=int(num_heads),
        embed_dim=int(E))

    out = pl.pallas_call(
        kernel,
        grid=(B,),
        in_specs=[act_spec(ctxla), act_spec(dpos), act_spec(epos)]
                 + [full_spec(w) for w in weights],
        out_specs=pl.BlockSpec((None, Tc, OUT_PAD), lambda b: (b, 0, 0)),
        out_shape=jax.ShapeDtypeStruct((B, Tc, OUT_PAD), jnp.float32),
        compiler_params=pltpu.CompilerParams(
            dimension_semantics=("parallel",)),           # 2 TCs on v7x, no-op v5e/v6e
    )(ctxla, dpos, epos, *weights)

    return out[..., :target_dim]


# ---------------------------------- main -------------------------------------


if __name__ == "__main__":
    # small config consistent with the module's __init__
    B, T = 2, 9
    INPUT_DIM = 10
    LA_DIM = 8
    EMBED_DIM = 32          # cfg.input_embed_dim
    FFN_DIM = 64
    NUM_LAYERS = 2
    NUM_HEADS = 4
    MAX_LEN = 200

    key = jax.random.PRNGKey(0)
    k_obs, k_la, k_param = jax.random.split(key, 3)

    observations = jax.random.normal(k_obs, (B, T, INPUT_DIM), jnp.float32)
    la = jax.random.normal(k_la, (B, T, LA_DIM), jnp.float32)       # idm_output.la
    timesteps = jnp.broadcast_to(jnp.arange(T, dtype=jnp.int32), (B, T))

    params = init_params(k_param, INPUT_DIM, INPUT_DIM, LA_DIM, EMBED_DIM,
                         FFN_DIM, NUM_LAYERS, NUM_HEADS)
    packed = pack_params(params, target_dim=INPUT_DIM)
    pos_table = get_sine_pos_encoding(MAX_LEN, EMBED_DIM)            # 'sine' pos_enc

    fwd = jax.jit(functools.partial(
        transformer_fdm_forward, num_heads=NUM_HEADS, target_dim=INPUT_DIM,
        pos_table=pos_table))
    out = fwd(packed, observations, la, timesteps)
    out = jax.block_until_ready(out)

    assert out.shape == (B, T - 1, INPUT_DIM), out.shape
    assert bool(jnp.all(jnp.isfinite(out)))
    print("KERNEL_OK")
</pallas_src>

<mosaic_0001>
module attributes {stable_mosaic.version = 11 : i64} {
  func.func @_fdm_kernel(%arg0: i32, %arg1: memref<1x8x18xf32, #tpu.memory_space<vmem>>, %arg2: memref<1x8x32xf32, #tpu.memory_space<vmem>>, %arg3: memref<1x8x32xf32, #tpu.memory_space<vmem>>, %arg4: memref<18x64xbf16, #tpu.memory_space<vmem>>, %arg5: memref<1x64xf32, #tpu.memory_space<vmem>>, %arg6: memref<2x32x96xbf16, #tpu.memory_space<vmem>>, %arg7: memref<2x1x96xf32, #tpu.memory_space<vmem>>, %arg8: memref<32x128xbf16, #tpu.memory_space<vmem>>, %arg9: memref<2x32x32xbf16, #tpu.memory_space<vmem>>, %arg10: memref<2x1x32xf32, #tpu.memory_space<vmem>>, %arg11: memref<2x32x32xbf16, #tpu.memory_space<vmem>>, %arg12: memref<2x1x32xf32, #tpu.memory_space<vmem>>, %arg13: memref<32x64xbf16, #tpu.memory_space<vmem>>, %arg14: memref<32x64xbf16, #tpu.memory_space<vmem>>, %arg15: memref<1x64xf32, #tpu.memory_space<vmem>>, %arg16: memref<32x64xbf16, #tpu.memory_space<vmem>>, %arg17: memref<1x64xf32, #tpu.memory_space<vmem>>, %arg18: memref<2x32x32xbf16, #tpu.memory_space<vmem>>, %arg19: memref<2x1x32xf32, #tpu.memory_space<vmem>>, %arg20: memref<2x32x64xbf16, #tpu.memory_space<vmem>>, %arg21: memref<2x1x64xf32, #tpu.memory_space<vmem>>, %arg22: memref<2x64x32xbf16, #tpu.memory_space<vmem>>, %arg23: memref<2x1x32xf32, #tpu.memory_space<vmem>>, %arg24: memref<2x1x32xf32, #tpu.memory_space<vmem>>, %arg25: memref<2x1x32xf32, #tpu.memory_space<vmem>>, %arg26: memref<2x1x32xf32, #tpu.memory_space<vmem>>, %arg27: memref<2x1x32xf32, #tpu.memory_space<vmem>>, %arg28: memref<2x1x32xf32, #tpu.memory_space<vmem>>, %arg29: memref<2x1x32xf32, #tpu.memory_space<vmem>>, %arg30: memref<1x32xf32, #tpu.memory_space<vmem>>, %arg31: memref<1x32xf32, #tpu.memory_space<vmem>>, %arg32: memref<32x128xbf16, #tpu.memory_space<vmem>>, %arg33: memref<1x128xf32, #tpu.memory_space<vmem>>, %arg34: memref<1x8x128xf32, #tpu.memory_space<vmem>>) attributes {dimension_semantics = [#tpu.dimension_semantics<parallel>], iteration_bounds = array<i64: 2>, scalar_prefetch = 0 : i64, scratch_operands = 0 : i64, tpu.core_type = #tpu.core_type<tc>, window_params = [{transform_indices = @transform_0, window_bounds = array<i64: 1, 8, 18>}, {transform_indices = @transform_1, window_bounds = array<i64: 1, 8, 32>}, {transform_indices = @transform_2, window_bounds = array<i64: 1, 8, 32>}, {pipeline_mode = #tpu.pipeline_mode<synchronous>, transform_indices = @transform_3, window_bounds = array<i64: 18, 64>}, {pipeline_mode = #tpu.pipeline_mode<synchronous>, transform_indices = @transform_4, window_bounds = array<i64: 1, 64>}, {pipeline_mode = #tpu.pipeline_mode<synchronous>, transform_indices = @transform_5, window_bounds = array<i64: 2, 32, 96>}, {pipeline_mode = #tpu.pipeline_mode<synchronous>, transform_indices = @transform_6, window_bounds = array<i64: 2, 1, 96>}, {pipeline_mode = #tpu.pipeline_mode<synchronous>, transform_indices = @transform_7, window_bounds = array<i64: 32, 128>}, {pipeline_mode = #tpu.pipeline_mode<synchronous>, transform_indices = @transform_8, window_bounds = array<i64: 2, 32, 32>}, {pipeline_mode = #tpu.pipeline_mode<synchronous>, transform_indices = @transform_9, window_bounds = array<i64: 2, 1, 32>}, {pipeline_mode = #tpu.pipeline_mode<synchronous>, transform_indices = @transform_10, window_bounds = array<i64: 2, 32, 32>}, {pipeline_mode = #tpu.pipeline_mode<synchronous>, transform_indices = @transform_11, window_bounds = array<i64: 2, 1, 32>}, {pipeline_mode = #tpu.pipeline_mode<synchronous>, transform_indices = @transform_12, window_bounds = array<i64: 32, 64>}, {pipeline_mode = #tpu.pipeline_mode<synchronous>, transform_indices = @transform_13, window_bounds = array<i64: 32, 64>}, {pipeline_mode = #tpu.pipeline_mode<synchronous>, transform_indices = @transform_14, window_bounds = array<i64: 1, 64>}, {pipeline_mode = #tpu.pipeline_mode<synchronous>, transform_indices = @transform_15, window_bounds = array<i64: 32, 64>}, {pipeline_mode = #tpu.pipeline_mode<synchronous>, transform_indices = @transform_16, window_bounds = array<i64: 1, 64>}, {pipeline_mode = #tpu.pipeline_mode<synchronous>, transform_indices = @transform_17, window_bounds = array<i64: 2, 32, 32>}, {pipeline_mode = #tpu.pipeline_mode<synchronous>, transform_indices = @transform_18, window_bounds = array<i64: 2, 1, 32>}, {pipeline_mode = #tpu.pipeline_mode<synchronous>, transform_indices = @transform_19, window_bounds = array<i64: 2, 32, 64>}, {pipeline_mode = #tpu.pipeline_mode<synchronous>, transform_indices = @transform_20, window_bounds = array<i64: 2, 1, 64>}, {pipeline_mode = #tpu.pipeline_mode<synchronous>, transform_indices = @transform_21, window_bounds = array<i64: 2, 64, 32>}, {pipeline_mode = #tpu.pipeline_mode<synchronous>, transform_indices = @transform_22, window_bounds = array<i64: 2, 1, 32>}, {pipeline_mode = #tpu.pipeline_mode<synchronous>, transform_indices = @transform_23, window_bounds = array<i64: 2, 1, 32>}, {pipeline_mode = #tpu.pipeline_mode<synchronous>, transform_indices = @transform_24, window_bounds = array<i64: 2, 1, 32>}, {pipeline_mode = #tpu.pipeline_mode<synchronous>, transform_indices = @transform_25, window_bounds = array<i64: 2, 1, 32>}, {pipeline_mode = #tpu.pipeline_mode<synchronous>, transform_indices = @transform_26, window_bounds = array<i64: 2, 1, 32>}, {pipeline_mode = #tpu.pipeline_mode<synchronous>, transform_indices = @transform_27, window_bounds = array<i64: 2, 1, 32>}, {pipeline_mode = #tpu.pipeline_mode<synchronous>, transform_indices = @transform_28, window_bounds = array<i64: 2, 1, 32>}, {pipeline_mode = #tpu.pipeline_mode<synchronous>, transform_indices = @transform_29, window_bounds = array<i64: 1, 32>}, {pipeline_mode = #tpu.pipeline_mode<synchronous>, transform_indices = @transform_30, window_bounds = array<i64: 1, 32>}, {pipeline_mode = #tpu.pipeline_mode<synchronous>, transform_indices = @transform_31, window_bounds = array<i64: 32, 128>}, {pipeline_mode = #tpu.pipeline_mode<synchronous>, transform_indices = @transform_32, window_bounds = array<i64: 1, 128>}, {transform_indices = @transform_33, window_bounds = array<i64: 1, 8, 128>}]} {
    %c0 = arith.constant 0 : index
    %c0_0 = arith.constant 0 : index
    %c0_1 = arith.constant 0 : index
    %0 = vector.load %arg2[%c0, %c0_0, %c0_1] : memref<1x8x32xf32, #tpu.memory_space<vmem>>, vector<1x8x32xf32>
    %1 = vector.shape_cast %0 : vector<1x8x32xf32> to vector<8x32xf32>
    %c0_2 = arith.constant 0 : index
    %c0_3 = arith.constant 0 : index
    %c0_4 = arith.constant 0 : index
    %2 = vector.load %arg3[%c0_2, %c0_3, %c0_4] : memref<1x8x32xf32, #tpu.memory_space<vmem>>, vector<1x8x32xf32>
    %3 = vector.shape_cast %2 : vector<1x8x32xf32> to vector<8x32xf32>
    %c0_5 = arith.constant 0 : index
    %c0_6 = arith.constant 0 : index
    %c0_7 = arith.constant 0 : index
    %4 = vector.load %arg1[%c0_5, %c0_6, %c0_7] : memref<1x8x18xf32, #tpu.memory_space<vmem>>, vector<1x8x18xf32>
    %5 = vector.shape_cast %4 : vector<1x8x18xf32> to vector<8x18xf32>
    %c0_8 = arith.constant 0 : index
    %c0_9 = arith.constant 0 : index
    %6 = vector.load %arg4[%c0_8, %c0_9] : memref<18x64xbf16, #tpu.memory_space<vmem>>, vector<18x64xbf16>
    %7 = arith.truncf %5 : vector<8x18xf32> to vector<8x18xbf16>
    %cst = arith.constant dense<0.000000e+00> : vector<8x64xf32>
    %8 = tpu.matmul %7, %6, %cst {dimension_numbers = #tpu.dot_dimension_numbers<[1], [0], [0], [1], [0, 0, 1, 1], [], []>} : vector<8x18xbf16>, vector<18x64xbf16>, vector<8x64xf32> -> vector<8x64xf32>
    %c0_10 = arith.constant 0 : index
    %c0_11 = arith.constant 0 : index
    %9 = vector.load %arg5[%c0_10, %c0_11] : memref<1x64xf32, #tpu.memory_space<vmem>>, vector<1x64xf32>
    %10 = vector.broadcast %9 : vector<1x64xf32> to vector<8x64xf32>
    %11 = arith.addf %8, %10 : vector<8x64xf32>
    %12 = vector.extract_strided_slice %11 {offsets = [0, 0], sizes = [8, 32], strides = [1, 1]} : vector<8x64xf32> to vector<8x32xf32>
    %cst_12 = arith.constant 0.000000e+00 : f32
    %13 = vector.broadcast %cst_12 : f32 to vector<8x32xf32>
    %14 = arith.cmpf oge, %12, %13 : vector<8x32xf32>
    %cst_13 = arith.constant 2.000000e-01 : f32
    %15 = vector.broadcast %cst_13 : f32 to vector<8x32xf32>
    %16 = arith.mulf %15, %12 : vector<8x32xf32>
    %17 = arith.select %14, %12, %16 : vector<8x32xi1>, vector<8x32xf32>
    %18 = vector.extract_strided_slice %11 {offsets = [0, 32], sizes = [8, 32], strides = [1, 1]} : vector<8x64xf32> to vector<8x32xf32>
    %c0_14 = arith.constant 0 : index
    %c0_15 = arith.constant 0 : index
    %19 = vector.load %arg8[%c0_14, %c0_15] : memref<32x128xbf16, #tpu.memory_space<vmem>>, vector<32x128xbf16>
    %20 = arith.truncf %1 : vector<8x32xf32> to vector<8x32xbf16>
    %cst_16 = arith.constant dense<0.000000e+00> : vector<8x128xf32>
    %21 = tpu.matmul %20, %19, %cst_16 {dimension_numbers = #tpu.dot_dimension_numbers<[1], [0], [0], [1], [0, 0, 1, 1], [], []>} : vector<8x32xbf16>, vector<32x128xbf16>, vector<8x128xf32> -> vector<8x128xf32>
    %c0_17 = arith.constant 0 : index
    %c0_18 = arith.constant 0 : index
    %22 = vector.load %arg13[%c0_17, %c0_18] : memref<32x64xbf16, #tpu.memory_space<vmem>>, vector<32x64xbf16>
    %23 = arith.truncf %1 : vector<8x32xf32> to vector<8x32xbf16>
    %cst_19 = arith.constant dense<0.000000e+00> : vector<8x64xf32>
    %24 = tpu.matmul %23, %22, %cst_19 {dimension_numbers = #tpu.dot_dimension_numbers<[1], [0], [0], [1], [0, 0, 1, 1], [], []>} : vector<8x32xbf16>, vector<32x64xbf16>, vector<8x64xf32> -> vector<8x64xf32>
    %25 = arith.addf %18, %3 : vector<8x32xf32>
    %c0_20 = arith.constant 0 : index
    %c0_21 = arith.constant 0 : index
    %26 = vector.load %arg14[%c0_20, %c0_21] : memref<32x64xbf16, #tpu.memory_space<vmem>>, vector<32x64xbf16>
    %27 = arith.truncf %25 : vector<8x32xf32> to vector<8x32xbf16>
    %cst_22 = arith.constant dense<0.000000e+00> : vector<8x64xf32>
    %28 = tpu.matmul %27, %26, %cst_22 {dimension_numbers = #tpu.dot_dimension_numbers<[1], [0], [0], [1], [0, 0, 1, 1], [], []>} : vector<8x32xbf16>, vector<32x64xbf16>, vector<8x64xf32> -> vector<8x64xf32>
    %c0_23 = arith.constant 0 : index
    %c0_24 = arith.constant 0 : index
    %29 = vector.load %arg15[%c0_23, %c0_24] : memref<1x64xf32, #tpu.memory_space<vmem>>, vector<1x64xf32>
    %30 = vector.broadcast %29 : vector<1x64xf32> to vector<8x64xf32>
    %31 = arith.addf %28, %30 : vector<8x64xf32>
    %c0_25 = arith.constant 0 : index
    %c0_26 = arith.constant 0 : index
    %32 = vector.load %arg16[%c0_25, %c0_26] : memref<32x64xbf16, #tpu.memory_space<vmem>>, vector<32x64xbf16>
    %33 = arith.truncf %18 : vector<8x32xf32> to vector<8x32xbf16>
    %cst_27 = arith.constant dense<0.000000e+00> : vector<8x64xf32>
    %34 = tpu.matmul %33, %32, %cst_27 {dimension_numbers = #tpu.dot_dimension_numbers<[1], [0], [0], [1], [0, 0, 1, 1], [], []>} : vector<8x32xbf16>, vector<32x64xbf16>, vector<8x64xf32> -> vector<8x64xf32>
    %c0_28 = arith.constant 0 : index
    %c0_29 = arith.constant 0 : index
    %35 = vector.load %arg17[%c0_28, %c0_29] : memref<1x64xf32, #tpu.memory_space<vmem>>, vector<1x64xf32>
    %36 = vector.broadcast %35 : vector<1x64xf32> to vector<8x64xf32>
    %37 = arith.addf %34, %36 : vector<8x64xf32>
    %c0_30 = arith.constant 0 : index
    %c0_31 = arith.constant 0 : index
    %c0_32 = arith.constant 0 : index
    %38 = vector.load %arg6[%c0_30, %c0_31, %c0_32] : memref<2x32x96xbf16, #tpu.memory_space<vmem>>, vector<1x32x96xbf16>
    %39 = vector.shape_cast %38 : vector<1x32x96xbf16> to vector<32x96xbf16>
    %40 = arith.truncf %17 : vector<8x32xf32> to vector<8x32xbf16>
    %cst_33 = arith.constant dense<0.000000e+00> : vector<8x96xf32>
    %41 = tpu.matmul %40, %39, %cst_33 {dimension_numbers = #tpu.dot_dimension_numbers<[1], [0], [0], [1], [0, 0, 1, 1], [], []>} : vector<8x32xbf16>, vector<32x96xbf16>, vector<8x96xf32> -> vector<8x96xf32>
    %c0_34 = arith.constant 0 : index
    %c0_35 = arith.constant 0 : index
    %c0_36 = arith.constant 0 : index
    %42 = vector.load %arg7[%c0_34, %c0_35, %c0_36] : memref<2x1x96xf32, #tpu.memory_space<vmem>>, vector<1x1x96xf32>
    %43 = vector.shape_cast %42 : vector<1x1x96xf32> to vector<1x96xf32>
    %44 = vector.broadcast %43 : vector<1x96xf32> to vector<8x96xf32>
    %45 = arith.addf %41, %44 : vector<8x96xf32>
    %46 = vector.extract_strided_slice %45 {offsets = [0, 0], sizes = [8, 64], strides = [1, 1]} : vector<8x96xf32> to vector<8x64xf32>
    %47 = vector.extract_strided_slice %21 {offsets = [0, 0], sizes = [8, 64], strides = [1, 1]} : vector<8x128xf32> to vector<8x64xf32>
    %48 = arith.addf %46, %47 : vector<8x64xf32>
    %49 = vector.extract_strided_slice %45 {offsets = [0, 64], sizes = [8, 32], strides = [1, 1]} : vector<8x96xf32> to vector<8x32xf32>
    %50 = vector.extract_strided_slice %48 {offsets = [0, 0], sizes = [8, 32], strides = [1, 1]} : vector<8x64xf32> to vector<8x32xf32>
    %51 = vector.extract_strided_slice %48 {offsets = [0, 32], sizes = [8, 32], strides = [1, 1]} : vector<8x64xf32> to vector<8x32xf32>
    %c0_37 = arith.constant 0 : index
    %c0_38 = arith.constant 0 : index
    %c0_39 = arith.constant 0 : index
    %52 = vector.load %arg9[%c0_37, %c0_38, %c0_39] : memref<2x32x32xbf16, #tpu.memory_space<vmem>>, vector<1x32x32xbf16>
    %53 = vector.shape_cast %52 : vector<1x32x32xbf16> to vector<32x32xbf16>
    %c0_40 = arith.constant 0 : index
    %c0_41 = arith.constant 0 : index
    %c0_42 = arith.constant 0 : index
    %54 = vector.load %arg10[%c0_40, %c0_41, %c0_42] : memref<2x1x32xf32, #tpu.memory_space<vmem>>, vector<1x1x32xf32>
    %55 = vector.shape_cast %54 : vector<1x1x32xf32> to vector<1x32xf32>
    %56 = arith.truncf %50 : vector<8x32xf32> to vector<8x32xbf16>
    %57 = arith.truncf %51 : vector<8x32xf32> to vector<8x32xbf16>
    %58 = arith.truncf %49 : vector<8x32xf32> to vector<8x32xbf16>
    %59 = vector.extract_strided_slice %56 {offsets = [0, 0], sizes = [8, 8], strides = [1, 1]} : vector<8x32xbf16> to vector<8x8xbf16>
    %60 = vector.extract_strided_slice %57 {offsets = [0, 0], sizes = [8, 8], strides = [1, 1]} : vector<8x32xbf16> to vector<8x8xbf16>
    %61 = vector.extract_strided_slice %58 {offsets = [0, 0], sizes = [8, 8], strides = [1, 1]} : vector<8x32xbf16> to vector<8x8xbf16>
    %cst_43 = arith.constant dense<0.000000e+00> : vector<8x8xf32>
    %62 = tpu.matmul %59, %60, %cst_43 {dimension_numbers = #tpu.dot_dimension_numbers<[1], [1], [0], [0], [0, 0, 1, 0], [], []>} : vector<8x8xbf16>, vector<8x8xbf16>, vector<8x8xf32> -> vector<8x8xf32>
    %cst_44 = arith.constant 0.353553385 : f32
    %63 = vector.broadcast %cst_44 : f32 to vector<8x8xf32>
    %64 = arith.mulf %62, %63 : vector<8x8xf32>
    %cst_45 = arith.constant dense<0xFF800000> : vector<8xf32>
    %65 = vector.multi_reduction <maximumf>, %64, %cst_45 [1] : vector<8x8xf32> to vector<8xf32>
    %66 = vector.shape_cast %65 : vector<8xf32> to vector<8x1xf32>
    %67 = vector.broadcast %66 : vector<8x1xf32> to vector<8x8xf32>
    %68 = arith.subf %64, %67 : vector<8x8xf32>
    %69 = math.exp %68 : vector<8x8xf32>
    %cst_46 = arith.constant dense<0.000000e+00> : vector<8xf32>
    %70 = vector.multi_reduction <add>, %69, %cst_46 [1] : vector<8x8xf32> to vector<8xf32>
    %71 = vector.shape_cast %70 : vector<8xf32> to vector<8x1xf32>
    %72 = tpu.reciprocal %71 {approx = true} : vector<8x1xf32> -> vector<8x1xf32>
    %73 = vector.broadcast %72 : vector<8x1xf32> to vector<8x8xf32>
    %74 = arith.mulf %69, %73 : vector<8x8xf32>
    %75 = arith.truncf %74 : vector<8x8xf32> to vector<8x8xbf16>
    %cst_47 = arith.constant dense<0.000000e+00> : vector<8x8xf32>
    %76 = tpu.matmul %75, %61, %cst_47 {dimension_numbers = #tpu.dot_dimension_numbers<[1], [0], [0], [1], [0, 0, 1, 1], [], []>} : vector<8x8xbf16>, vector<8x8xbf16>, vector<8x8xf32> -> vector<8x8xf32>
    %77 = vector.extract_strided_slice %56 {offsets = [0, 8], sizes = [8, 8], strides = [1, 1]} : vector<8x32xbf16> to vector<8x8xbf16>
    %78 = vector.extract_strided_slice %57 {offsets = [0, 8], sizes = [8, 8], strides = [1, 1]} : vector<8x32xbf16> to vector<8x8xbf16>
    %79 = vector.extract_strided_slice %58 {offsets = [0, 8], sizes = [8, 8], strides = [1, 1]} : vector<8x32xbf16> to vector<8x8xbf16>
    %cst_48 = arith.constant dense<0.000000e+00> : vector<8x8xf32>
    %80 = tpu.matmul %77, %78, %cst_48 {dimension_numbers = #tpu.dot_dimension_numbers<[1], [1], [0], [0], [0, 0, 1, 0], [], []>} : vector<8x8xbf16>, vector<8x8xbf16>, vector<8x8xf32> -> vector<8x8xf32>
    %cst_49 = arith.constant 0.353553385 : f32
    %81 = vector.broadcast %cst_49 : f32 to vector<8x8xf32>
    %82 = arith.mulf %80, %81 : vector<8x8xf32>
    %cst_50 = arith.constant dense<0xFF800000> : vector<8xf32>
    %83 = vector.multi_reduction <maximumf>, %82, %cst_50 [1] : vector<8x8xf32> to vector<8xf32>
    %84 = vector.shape_cast %83 : vector<8xf32> to vector<8x1xf32>
    %85 = vector.broadcast %84 : vector<8x1xf32> to vector<8x8xf32>
    %86 = arith.subf %82, %85 : vector<8x8xf32>
    %87 = math.exp %86 : vector<8x8xf32>
    %cst_51 = arith.constant dense<0.000000e+00> : vector<8xf32>
    %88 = vector.multi_reduction <add>, %87, %cst_51 [1] : vector<8x8xf32> to vector<8xf32>
    %89 = vector.shape_cast %88 : vector<8xf32> to vector<8x1xf32>
    %90 = tpu.reciprocal %89 {approx = true} : vector<8x1xf32> -> vector<8x1xf32>
    %91 = vector.broadcast %90 : vector<8x1xf32> to vector<8x8xf32>
    %92 = arith.mulf %87, %91 : vector<8x8xf32>
    %93 = arith.truncf %92 : vector<8x8xf32> to vector<8x8xbf16>
    %cst_52 = arith.constant dense<0.000000e+00> : vector<8x8xf32>
    %94 = tpu.matmul %93, %79, %cst_52 {dimension_numbers = #tpu.dot_dimension_numbers<[1], [0], [0], [1], [0, 0, 1, 1], [], []>} : vector<8x8xbf16>, vector<8x8xbf16>, vector<8x8xf32> -> vector<8x8xf32>
    %95 = vector.extract_strided_slice %56 {offsets = [0, 16], sizes = [8, 8], strides = [1, 1]} : vector<8x32xbf16> to vector<8x8xbf16>
    %96 = vector.extract_strided_slice %57 {offsets = [0, 16], sizes = [8, 8], strides = [1, 1]} : vector<8x32xbf16> to vector<8x8xbf16>
    %97 = vector.extract_strided_slice %58 {offsets = [0, 16], sizes = [8, 8], strides = [1, 1]} : vector<8x32xbf16> to vector<8x8xbf16>
    %cst_53 = arith.constant dense<0.000000e+00> : vector<8x8xf32>
    %98 = tpu.matmul %95, %96, %cst_53 {dimension_numbers = #tpu.dot_dimension_numbers<[1], [1], [0], [0], [0, 0, 1, 0], [], []>} : vector<8x8xbf16>, vector<8x8xbf16>, vector<8x8xf32> -> vector<8x8xf32>
    %cst_54 = arith.constant 0.353553385 : f32
    %99 = vector.broadcast %cst_54 : f32 to vector<8x8xf32>
    %100 = arith.mulf %98, %99 : vector<8x8xf32>
    %cst_55 = arith.constant dense<0xFF800000> : vector<8xf32>
    %101 = vector.multi_reduction <maximumf>, %100, %cst_55 [1] : vector<8x8xf32> to vector<8xf32>
    %102 = vector.shape_cast %101 : vector<8xf32> to vector<8x1xf32>
    %103 = vector.broadcast %102 : vector<8x1xf32> to vector<8x8xf32>
    %104 = arith.subf %100, %103 : vector<8x8xf32>
    %105 = math.exp %104 : vector<8x8xf32>
    %cst_56 = arith.constant dense<0.000000e+00> : vector<8xf32>
    %106 = vector.multi_reduction <add>, %105, %cst_56 [1] : vector<8x8xf32> to vector<8xf32>
    %107 = vector.shape_cast %106 : vector<8xf32> to vector<8x1xf32>
    %108 = tpu.reciprocal %107 {approx = true} : vector<8x1xf32> -> vector<8x1xf32>
    %109 = vector.broadcast %108 : vector<8x1xf32> to vector<8x8xf32>
    %110 = arith.mulf %105, %109 : vector<8x8xf32>
    %111 = arith.truncf %110 : vector<8x8xf32> to vector<8x8xbf16>
    %cst_57 = arith.constant dense<0.000000e+00> : vector<8x8xf32>
    %112 = tpu.matmul %111, %97, %cst_57 {dimension_numbers = #tpu.dot_dimension_numbers<[1], [0], [0], [1], [0, 0, 1, 1], [], []>} : vector<8x8xbf16>, vector<8x8xbf16>, vector<8x8xf32> -> vector<8x8xf32>
    %113 = vector.extract_strided_slice %56 {offsets = [0, 24], sizes = [8, 8], strides = [1, 1]} : vector<8x32xbf16> to vector<8x8xbf16>
    %114 = vector.extract_strided_slice %57 {offsets = [0, 24], sizes = [8, 8], strides = [1, 1]} : vector<8x32xbf16> to vector<8x8xbf16>
    %115 = vector.extract_strided_slice %58 {offsets = [0, 24], sizes = [8, 8], strides = [1, 1]} : vector<8x32xbf16> to vector<8x8xbf16>
    %cst_58 = arith.constant dense<0.000000e+00> : vector<8x8xf32>
    %116 = tpu.matmul %113, %114, %cst_58 {dimension_numbers = #tpu.dot_dimension_numbers<[1], [1], [0], [0], [0, 0, 1, 0], [], []>} : vector<8x8xbf16>, vector<8x8xbf16>, vector<8x8xf32> -> vector<8x8xf32>
    %cst_59 = arith.constant 0.353553385 : f32
    %117 = vector.broadcast %cst_59 : f32 to vector<8x8xf32>
    %118 = arith.mulf %116, %117 : vector<8x8xf32>
    %cst_60 = arith.constant dense<0xFF800000> : vector<8xf32>
    %119 = vector.multi_reduction <maximumf>, %118, %cst_60 [1] : vector<8x8xf32> to vector<8xf32>
    %120 = vector.shape_cast %119 : vector<8xf32> to vector<8x1xf32>
    %121 = vector.broadcast %120 : vector<8x1xf32> to vector<8x8xf32>
    %122 = arith.subf %118, %121 : vector<8x8xf32>
    %123 = math.exp %122 : vector<8x8xf32>
    %cst_61 = arith.constant dense<0.000000e+00> : vector<8xf32>
    %124 = vector.multi_reduction <add>, %123, %cst_61 [1] : vector<8x8xf32> to vector<8xf32>
    %125 = vector.shape_cast %124 : vector<8xf32> to vector<8x1xf32>
    %126 = tpu.reciprocal %125 {approx = true} : vector<8x1xf32> -> vector<8x1xf32>
    %127 = vector.broadcast %126 : vector<8x1xf32> to vector<8x8xf32>
    %128 = arith.mulf %123, %127 : vector<8x8xf32>
    %129 = arith.truncf %128 : vector<8x8xf32> to vector<8x8xbf16>
    %cst_62 = arith.constant dense<0.000000e+00> : vector<8x8xf32>
    %130 = tpu.matmul %129, %115, %cst_62 {dimension_numbers = #tpu.dot_dimension_numbers<[1], [0], [0], [1], [0, 0, 1, 1], [], []>} : vector<8x8xbf16>, vector<8x8xbf16>, vector<8x8xf32> -> vector<8x8xf32>
    %131 = tpu.concatenate %76, %94, %112, %130 in 1 : vector<8x8xf32>, vector<8x8xf32>, vector<8x8xf32>, vector<8x8xf32> -> vector<8x32xf32>
    %132 = arith.truncf %131 : vector<8x32xf32> to vector<8x32xbf16>
    %cst_63 = arith.constant dense<0.000000e+00> : vector<8x32xf32>
    %133 = tpu.matmul %132, %53, %cst_63 {dimension_numbers = #tpu.dot_dimension_numbers<[1], [0], [0], [1], [0, 0, 1, 1], [], []>} : vector<8x32xbf16>, vector<32x32xbf16>, vector<8x32xf32> -> vector<8x32xf32>
    %134 = vector.broadcast %55 : vector<1x32xf32> to vector<8x32xf32>
    %135 = arith.addf %133, %134 : vector<8x32xf32>
    %136 = arith.addf %17, %135 : vector<8x32xf32>
    %c0_64 = arith.constant 0 : index
    %c0_65 = arith.constant 0 : index
    %c0_66 = arith.constant 0 : index
    %137 = vector.load %arg24[%c0_64, %c0_65, %c0_66] : memref<2x1x32xf32, #tpu.memory_space<vmem>>, vector<1x1x32xf32>
    %138 = vector.shape_cast %137 : vector<1x1x32xf32> to vector<1x32xf32>
    %c0_67 = arith.constant 0 : index
    %c0_68 = arith.constant 0 : index
    %c0_69 = arith.constant 0 : index
    %139 = vector.load %arg25[%c0_67, %c0_68, %c0_69] : memref<2x1x32xf32, #tpu.memory_space<vmem>>, vector<1x1x32xf32>
    %140 = vector.shape_cast %139 : vector<1x1x32xf32> to vector<1x32xf32>
    %cst_70 = arith.constant dense<0.000000e+00> : vector<8xf32>
    %141 = vector.multi_reduction <add>, %136, %cst_70 [1] : vector<8x32xf32> to vector<8xf32>
    %142 = vector.shape_cast %141 : vector<8xf32> to vector<8x1xf32>
    %cst_71 = arith.constant 3.200000e+01 : f32
    %143 = vector.broadcast %cst_71 : f32 to vector<8x1xf32>
    %144 = arith.divf %142, %143 : vector<8x1xf32>
    %145 = vector.broadcast %144 : vector<8x1xf32> to vector<8x32xf32>
    %146 = arith.subf %136, %145 : vector<8x32xf32>
    %147 = arith.mulf %146, %146 : vector<8x32xf32>
    %cst_72 = arith.constant dense<0.000000e+00> : vector<8xf32>
    %148 = vector.multi_reduction <add>, %147, %cst_72 [1] : vector<8x32xf32> to vector<8xf32>
    %149 = vector.shape_cast %148 : vector<8xf32> to vector<8x1xf32>
    %cst_73 = arith.constant 3.200000e+01 : f32
    %150 = vector.broadcast %cst_73 : f32 to vector<8x1xf32>
    %151 = arith.divf %149, %150 : vector<8x1xf32>
    %152 = vector.broadcast %144 : vector<8x1xf32> to vector<8x32xf32>
    %153 = arith.subf %136, %152 : vector<8x32xf32>
    %cst_74 = arith.constant 9.99999974E-6 : f32
    %154 = vector.broadcast %cst_74 : f32 to vector<8x1xf32>
    %155 = arith.addf %151, %154 : vector<8x1xf32>
    %156 = math.rsqrt %155 : vector<8x1xf32>
    %157 = vector.broadcast %156 : vector<8x1xf32> to vector<8x32xf32>
    %158 = arith.mulf %153, %157 : vector<8x32xf32>
    %159 = vector.broadcast %138 : vector<1x32xf32> to vector<8x32xf32>
    %160 = arith.mulf %158, %159 : vector<8x32xf32>
    %161 = vector.broadcast %140 : vector<1x32xf32> to vector<8x32xf32>
    %162 = arith.addf %160, %161 : vector<8x32xf32>
    %c0_75 = arith.constant 0 : index
    %c0_76 = arith.constant 0 : index
    %c0_77 = arith.constant 0 : index
    %163 = vector.load %arg11[%c0_75, %c0_76, %c0_77] : memref<2x32x32xbf16, #tpu.memory_space<vmem>>, vector<1x32x32xbf16>
    %164 = vector.shape_cast %163 : vector<1x32x32xbf16> to vector<32x32xbf16>
    %165 = arith.truncf %162 : vector<8x32xf32> to vector<8x32xbf16>
    %cst_78 = arith.constant dense<0.000000e+00> : vector<8x32xf32>
    %166 = tpu.matmul %165, %164, %cst_78 {dimension_numbers = #tpu.dot_dimension_numbers<[1], [0], [0], [1], [0, 0, 1, 1], [], []>} : vector<8x32xbf16>, vector<32x32xbf16>, vector<8x32xf32> -> vector<8x32xf32>
    %c0_79 = arith.constant 0 : index
    %c0_80 = arith.constant 0 : index
    %c0_81 = arith.constant 0 : index
    %167 = vector.load %arg12[%c0_79, %c0_80, %c0_81] : memref<2x1x32xf32, #tpu.memory_space<vmem>>, vector<1x1x32xf32>
    %168 = vector.shape_cast %167 : vector<1x1x32xf32> to vector<1x32xf32>
    %169 = vector.broadcast %168 : vector<1x32xf32> to vector<8x32xf32>
    %170 = arith.addf %166, %169 : vector<8x32xf32>
    %171 = vector.extract_strided_slice %24 {offsets = [0, 0], sizes = [8, 32], strides = [1, 1]} : vector<8x64xf32> to vector<8x32xf32>
    %172 = arith.addf %170, %171 : vector<8x32xf32>
    %173 = vector.extract_strided_slice %31 {offsets = [0, 0], sizes = [8, 32], strides = [1, 1]} : vector<8x64xf32> to vector<8x32xf32>
    %174 = vector.extract_strided_slice %37 {offsets = [0, 0], sizes = [8, 32], strides = [1, 1]} : vector<8x64xf32> to vector<8x32xf32>
    %c0_82 = arith.constant 0 : index
    %c0_83 = arith.constant 0 : index
    %c0_84 = arith.constant 0 : index
    %175 = vector.load %arg18[%c0_82, %c0_83, %c0_84] : memref<2x32x32xbf16, #tpu.memory_space<vmem>>, vector<1x32x32xbf16>
    %176 = vector.shape_cast %175 : vector<1x32x32xbf16> to vector<32x32xbf16>
    %c0_85 = arith.constant 0 : index
    %c0_86 = arith.constant 0 : index
    %c0_87 = arith.constant 0 : index
    %177 = vector.load %arg19[%c0_85, %c0_86, %c0_87] : memref<2x1x32xf32, #tpu.memory_space<vmem>>, vector<1x1x32xf32>
    %178 = vector.shape_cast %177 : vector<1x1x32xf32> to vector<1x32xf32>
    %179 = arith.truncf %172 : vector<8x32xf32> to vector<8x32xbf16>
    %180 = arith.truncf %173 : vector<8x32xf32> to vector<8x32xbf16>
    %181 = arith.truncf %174 : vector<8x32xf32> to vector<8x32xbf16>
    %182 = vector.extract_strided_slice %179 {offsets = [0, 0], sizes = [8, 8], strides = [1, 1]} : vector<8x32xbf16> to vector<8x8xbf16>
    %183 = vector.extract_strided_slice %180 {offsets = [0, 0], sizes = [8, 8], strides = [1, 1]} : vector<8x32xbf16> to vector<8x8xbf16>
    %184 = vector.extract_strided_slice %181 {offsets = [0, 0], sizes = [8, 8], strides = [1, 1]} : vector<8x32xbf16> to vector<8x8xbf16>
    %cst_88 = arith.constant dense<0.000000e+00> : vector<8x8xf32>
    %185 = tpu.matmul %182, %183, %cst_88 {dimension_numbers = #tpu.dot_dimension_numbers<[1], [1], [0], [0], [0, 0, 1, 0], [], []>} : vector<8x8xbf16>, vector<8x8xbf16>, vector<8x8xf32> -> vector<8x8xf32>
    %cst_89 = arith.constant 0.353553385 : f32
    %186 = vector.broadcast %cst_89 : f32 to vector<8x8xf32>
    %187 = arith.mulf %185, %186 : vector<8x8xf32>
    %cst_90 = arith.constant dense<0xFF800000> : vector<8xf32>
    %188 = vector.multi_reduction <maximumf>, %187, %cst_90 [1] : vector<8x8xf32> to vector<8xf32>
    %189 = vector.shape_cast %188 : vector<8xf32> to vector<8x1xf32>
    %190 = vector.broadcast %189 : vector<8x1xf32> to vector<8x8xf32>
    %191 = arith.subf %187, %190 : vector<8x8xf32>
    %192 = math.exp %191 : vector<8x8xf32>
    %cst_91 = arith.constant dense<0.000000e+00> : vector<8xf32>
    %193 = vector.multi_reduction <add>, %192, %cst_91 [1] : vector<8x8xf32> to vector<8xf32>
    %194 = vector.shape_cast %193 : vector<8xf32> to vector<8x1xf32>
    %195 = tpu.reciprocal %194 {approx = true} : vector<8x1xf32> -> vector<8x1xf32>
    %196 = vector.broadcast %195 : vector<8x1xf32> to vector<8x8xf32>
    %197 = arith.mulf %192, %196 : vector<8x8xf32>
    %198 = arith.truncf %197 : vector<8x8xf32> to vector<8x8xbf16>
    %cst_92 = arith.constant dense<0.000000e+00> : vector<8x8xf32>
    %199 = tpu.matmul %198, %184, %cst_92 {dimension_numbers = #tpu.dot_dimension_numbers<[1], [0], [0], [1], [0, 0, 1, 1], [], []>} : vector<8x8xbf16>, vector<8x8xbf16>, vector<8x8xf32> -> vector<8x8xf32>
    %200 = vector.extract_strided_slice %179 {offsets = [0, 8], sizes = [8, 8], strides = [1, 1]} : vector<8x32xbf16> to vector<8x8xbf16>
    %201 = vector.extract_strided_slice %180 {offsets = [0, 8], sizes = [8, 8], strides = [1, 1]} : vector<8x32xbf16> to vector<8x8xbf16>
    %202 = vector.extract_strided_slice %181 {offsets = [0, 8], sizes = [8, 8], strides = [1, 1]} : vector<8x32xbf16> to vector<8x8xbf16>
    %cst_93 = arith.constant dense<0.000000e+00> : vector<8x8xf32>
    %203 = tpu.matmul %200, %201, %cst_93 {dimension_numbers = #tpu.dot_dimension_numbers<[1], [1], [0], [0], [0, 0, 1, 0], [], []>} : vector<8x8xbf16>, vector<8x8xbf16>, vector<8x8xf32> -> vector<8x8xf32>
    %cst_94 = arith.constant 0.353553385 : f32
    %204 = vector.broadcast %cst_94 : f32 to vector<8x8xf32>
    %205 = arith.mulf %203, %204 : vector<8x8xf32>
    %cst_95 = arith.constant dense<0xFF800000> : vector<8xf32>
    %206 = vector.multi_reduction <maximumf>, %205, %cst_95 [1] : vector<8x8xf32> to vector<8xf32>
    %207 = vector.shape_cast %206 : vector<8xf32> to vector<8x1xf32>
    %208 = vector.broadcast %207 : vector<8x1xf32> to vector<8x8xf32>
    %209 = arith.subf %205, %208 : vector<8x8xf32>
    %210 = math.exp %209 : vector<8x8xf32>
    %cst_96 = arith.constant dense<0.000000e+00> : vector<8xf32>
    %211 = vector.multi_reduction <add>, %210, %cst_96 [1] : vector<8x8xf32> to vector<8xf32>
    %212 = vector.shape_cast %211 : vector<8xf32> to vector<8x1xf32>
    %213 = tpu.reciprocal %212 {approx = true} : vector<8x1xf32> -> vector<8x1xf32>
    %214 = vector.broadcast %213 : vector<8x1xf32> to vector<8x8xf32>
    %215 = arith.mulf %210, %214 : vector<8x8xf32>
    %216 = arith.truncf %215 : vector<8x8xf32> to vector<8x8xbf16>
    %cst_97 = arith.constant dense<0.000000e+00> : vector<8x8xf32>
    %217 = tpu.matmul %216, %202, %cst_97 {dimension_numbers = #tpu.dot_dimension_numbers<[1], [0], [0], [1], [0, 0, 1, 1], [], []>} : vector<8x8xbf16>, vector<8x8xbf16>, vector<8x8xf32> -> vector<8x8xf32>
    %218 = vector.extract_strided_slice %179 {offsets = [0, 16], sizes = [8, 8], strides = [1, 1]} : vector<8x32xbf16> to vector<8x8xbf16>
    %219 = vector.extract_strided_slice %180 {offsets = [0, 16], sizes = [8, 8], strides = [1, 1]} : vector<8x32xbf16> to vector<8x8xbf16>
    %220 = vector.extract_strided_slice %181 {offsets = [0, 16], sizes = [8, 8], strides = [1, 1]} : vector<8x32xbf16> to vector<8x8xbf16>
    %cst_98 = arith.constant dense<0.000000e+00> : vector<8x8xf32>
    %221 = tpu.matmul %218, %219, %cst_98 {dimension_numbers = #tpu.dot_dimension_numbers<[1], [1], [0], [0], [0, 0, 1, 0], [], []>} : vector<8x8xbf16>, vector<8x8xbf16>, vector<8x8xf32> -> vector<8x8xf32>
    %cst_99 = arith.constant 0.353553385 : f32
    %222 = vector.broadcast %cst_99 : f32 to vector<8x8xf32>
    %223 = arith.mulf %221, %222 : vector<8x8xf32>
    %cst_100 = arith.constant dense<0xFF800000> : vector<8xf32>
    %224 = vector.multi_reduction <maximumf>, %223, %cst_100 [1] : vector<8x8xf32> to vector<8xf32>
    %225 = vector.shape_cast %224 : vector<8xf32> to vector<8x1xf32>
    %226 = vector.broadcast %225 : vector<8x1xf32> to vector<8x8xf32>
    %227 = arith.subf %223, %226 : vector<8x8xf32>
    %228 = math.exp %227 : vector<8x8xf32>
    %cst_101 = arith.constant dense<0.000000e+00> : vector<8xf32>
    %229 = vector.multi_reduction <add>, %228, %cst_101 [1] : vector<8x8xf32> to vector<8xf32>
    %230 = vector.shape_cast %229 : vector<8xf32> to vector<8x1xf32>
    %231 = tpu.reciprocal %230 {approx = true} : vector<8x1xf32> -> vector<8x1xf32>
    %232 = vector.broadcast %231 : vector<8x1xf32> to vector<8x8xf32>
    %233 = arith.mulf %228, %232 : vector<8x8xf32>
    %234 = arith.truncf %233 : vector<8x8xf32> to vector<8x8xbf16>
    %cst_102 = arith.constant dense<0.000000e+00> : vector<8x8xf32>
    %235 = tpu.matmul %234, %220, %cst_102 {dimension_numbers = #tpu.dot_dimension_numbers<[1], [0], [0], [1], [0, 0, 1, 1], [], []>} : vector<8x8xbf16>, vector<8x8xbf16>, vector<8x8xf32> -> vector<8x8xf32>
    %236 = vector.extract_strided_slice %179 {offsets = [0, 24], sizes = [8, 8], strides = [1, 1]} : vector<8x32xbf16> to vector<8x8xbf16>
    %237 = vector.extract_strided_slice %180 {offsets = [0, 24], sizes = [8, 8], strides = [1, 1]} : vector<8x32xbf16> to vector<8x8xbf16>
    %238 = vector.extract_strided_slice %181 {offsets = [0, 24], sizes = [8, 8], strides = [1, 1]} : vector<8x32xbf16> to vector<8x8xbf16>
    %cst_103 = arith.constant dense<0.000000e+00> : vector<8x8xf32>
    %239 = tpu.matmul %236, %237, %cst_103 {dimension_numbers = #tpu.dot_dimension_numbers<[1], [1], [0], [0], [0, 0, 1, 0], [], []>} : vector<8x8xbf16>, vector<8x8xbf16>, vector<8x8xf32> -> vector<8x8xf32>
    %cst_104 = arith.constant 0.353553385 : f32
    %240 = vector.broadcast %cst_104 : f32 to vector<8x8xf32>
    %241 = arith.mulf %239, %240 : vector<8x8xf32>
    %cst_105 = arith.constant dense<0xFF800000> : vector<8xf32>
    %242 = vector.multi_reduction <maximumf>, %241, %cst_105 [1] : vector<8x8xf32> to vector<8xf32>
    %243 = vector.shape_cast %242 : vector<8xf32> to vector<8x1xf32>
    %244 = vector.broadcast %243 : vector<8x1xf32> to vector<8x8xf32>
    %245 = arith.subf %241, %244 : vector<8x8xf32>
    %246 = math.exp %245 : vector<8x8xf32>
    %cst_106 = arith.constant dense<0.000000e+00> : vector<8xf32>
    %247 = vector.multi_reduction <add>, %246, %cst_106 [1] : vector<8x8xf32> to vector<8xf32>
    %248 = vector.shape_cast %247 : vector<8xf32> to vector<8x1xf32>
    %249 = tpu.reciprocal %248 {approx = true} : vector<8x1xf32> -> vector<8x1xf32>
    %250 = vector.broadcast %249 : vector<8x1xf32> to vector<8x8xf32>
    %251 = arith.mulf %246, %250 : vector<8x8xf32>
    %252 = arith.truncf %251 : vector<8x8xf32> to vector<8x8xbf16>
    %cst_107 = arith.constant dense<0.000000e+00> : vector<8x8xf32>
    %253 = tpu.matmul %252, %238, %cst_107 {dimension_numbers = #tpu.dot_dimension_numbers<[1], [0], [0], [1], [0, 0, 1, 1], [], []>} : vector<8x8xbf16>, vector<8x8xbf16>, vector<8x8xf32> -> vector<8x8xf32>
    %254 = tpu.concatenate %199, %217, %235, %253 in 1 : vector<8x8xf32>, vector<8x8xf32>, vector<8x8xf32>, vector<8x8xf32> -> vector<8x32xf32>
    %255 = arith.truncf %254 : vector<8x32xf32> to vector<8x32xbf16>
    %cst_108 = arith.constant dense<0.000000e+00> : vector<8x32xf32>
    %256 = tpu.matmul %255, %176, %cst_108 {dimension_numbers = #tpu.dot_dimension_numbers<[1], [0], [0], [1], [0, 0, 1, 1], [], []>} : vector<8x32xbf16>, vector<32x32xbf16>, vector<8x32xf32> -> vector<8x32xf32>
    %257 = vector.broadcast %178 : vector<1x32xf32> to vector<8x32xf32>
    %258 = arith.addf %256, %257 : vector<8x32xf32>
    %259 = arith.addf %162, %258 : vector<8x32xf32>
    %c0_109 = arith.constant 0 : index
    %c0_110 = arith.constant 0 : index
    %c0_111 = arith.constant 0 : index
    %260 = vector.load %arg26[%c0_109, %c0_110, %c0_111] : memref<2x1x32xf32, #tpu.memory_space<vmem>>, vector<1x1x32xf32>
    %261 = vector.shape_cast %260 : vector<1x1x32xf32> to vector<1x32xf32>
    %c0_112 = arith.constant 0 : index
    %c0_113 = arith.constant 0 : index
    %c0_114 = arith.constant 0 : index
    %262 = vector.load %arg27[%c0_112, %c0_113, %c0_114] : memref<2x1x32xf32, #tpu.memory_space<vmem>>, vector<1x1x32xf32>
    %263 = vector.shape_cast %262 : vector<1x1x32xf32> to vector<1x32xf32>
    %cst_115 = arith.constant dense<0.000000e+00> : vector<8xf32>
    %264 = vector.multi_reduction <add>, %259, %cst_115 [1] : vector<8x32xf32> to vector<8xf32>
    %265 = vector.shape_cast %264 : vector<8xf32> to vector<8x1xf32>
    %cst_116 = arith.constant 3.200000e+01 : f32
    %266 = vector.broadcast %cst_116 : f32 to vector<8x1xf32>
    %267 = arith.divf %265, %266 : vector<8x1xf32>
    %268 = vector.broadcast %267 : vector<8x1xf32> to vector<8x32xf32>
    %269 = arith.subf %259, %268 : vector<8x32xf32>
    %270 = arith.mulf %269, %269 : vector<8x32xf32>
    %cst_117 = arith.constant dense<0.000000e+00> : vector<8xf32>
    %271 = vector.multi_reduction <add>, %270, %cst_117 [1] : vector<8x32xf32> to vector<8xf32>
    %272 = vector.shape_cast %271 : vector<8xf32> to vector<8x1xf32>
    %cst_118 = arith.constant 3.200000e+01 : f32
    %273 = vector.broadcast %cst_118 : f32 to vector<8x1xf32>
    %274 = arith.divf %272, %273 : vector<8x1xf32>
    %275 = vector.broadcast %267 : vector<8x1xf32> to vector<8x32xf32>
    %276 = arith.subf %259, %275 : vector<8x32xf32>
    %cst_119 = arith.constant 9.99999974E-6 : f32
    %277 = vector.broadcast %cst_119 : f32 to vector<8x1xf32>
    %278 = arith.addf %274, %277 : vector<8x1xf32>
    %279 = math.rsqrt %278 : vector<8x1xf32>
    %280 = vector.broadcast %279 : vector<8x1xf32> to vector<8x32xf32>
    %281 = arith.mulf %276, %280 : vector<8x32xf32>
    %282 = vector.broadcast %261 : vector<1x32xf32> to vector<8x32xf32>
    %283 = arith.mulf %281, %282 : vector<8x32xf32>
    %284 = vector.broadcast %263 : vector<1x32xf32> to vector<8x32xf32>
    %285 = arith.addf %283, %284 : vector<8x32xf32>
    %c0_120 = arith.constant 0 : index
    %c0_121 = arith.constant 0 : index
    %c0_122 = arith.constant 0 : index
    %286 = vector.load %arg20[%c0_120, %c0_121, %c0_122] : memref<2x32x64xbf16, #tpu.memory_space<vmem>>, vector<1x32x64xbf16>
    %287 = vector.shape_cast %286 : vector<1x32x64xbf16> to vector<32x64xbf16>
    %288 = arith.truncf %285 : vector<8x32xf32> to vector<8x32xbf16>
    %cst_123 = arith.constant dense<0.000000e+00> : vector<8x64xf32>
    %289 = tpu.matmul %288, %287, %cst_123 {dimension_numbers = #tpu.dot_dimension_numbers<[1], [0], [0], [1], [0, 0, 1, 1], [], []>} : vector<8x32xbf16>, vector<32x64xbf16>, vector<8x64xf32> -> vector<8x64xf32>
    %c0_124 = arith.constant 0 : index
    %c0_125 = arith.constant 0 : index
    %c0_126 = arith.constant 0 : index
    %290 = vector.load %arg21[%c0_124, %c0_125, %c0_126] : memref<2x1x64xf32, #tpu.memory_space<vmem>>, vector<1x1x64xf32>
    %291 = vector.shape_cast %290 : vector<1x1x64xf32> to vector<1x64xf32>
    %292 = vector.broadcast %291 : vector<1x64xf32> to vector<8x64xf32>
    %293 = arith.addf %289, %292 : vector<8x64xf32>
    %cst_127 = arith.constant 0.000000e+00 : f32
    %294 = vector.broadcast %cst_127 : f32 to vector<8x64xf32>
    %295 = arith.maximumf %293, %294 : vector<8x64xf32>
    %c0_128 = arith.constant 0 : index
    %c0_129 = arith.constant 0 : index
    %c0_130 = arith.constant 0 : index
    %296 = vector.load %arg22[%c0_128, %c0_129, %c0_130] : memref<2x64x32xbf16, #tpu.memory_space<vmem>>, vector<1x64x32xbf16>
    %297 = vector.shape_cast %296 : vector<1x64x32xbf16> to vector<64x32xbf16>
    %298 = arith.truncf %295 : vector<8x64xf32> to vector<8x64xbf16>
    %cst_131 = arith.constant dense<0.000000e+00> : vector<8x32xf32>
    %299 = tpu.matmul %298, %297, %cst_131 {dimension_numbers = #tpu.dot_dimension_numbers<[1], [0], [0], [1], [0, 0, 1, 1], [], []>} : vector<8x64xbf16>, vector<64x32xbf16>, vector<8x32xf32> -> vector<8x32xf32>
    %c0_132 = arith.constant 0 : index
    %c0_133 = arith.constant 0 : index
    %c0_134 = arith.constant 0 : index
    %300 = vector.load %arg23[%c0_132, %c0_133, %c0_134] : memref<2x1x32xf32, #tpu.memory_space<vmem>>, vector<1x1x32xf32>
    %301 = vector.shape_cast %300 : vector<1x1x32xf32> to vector<1x32xf32>
    %302 = vector.broadcast %301 : vector<1x32xf32> to vector<8x32xf32>
    %303 = arith.addf %299, %302 : vector<8x32xf32>
    %304 = arith.addf %285, %303 : vector<8x32xf32>
    %c0_135 = arith.constant 0 : index
    %c0_136 = arith.constant 0 : index
    %c0_137 = arith.constant 0 : index
    %305 = vector.load %arg28[%c0_135, %c0_136, %c0_137] : memref<2x1x32xf32, #tpu.memory_space<vmem>>, vector<1x1x32xf32>
    %306 = vector.shape_cast %305 : vector<1x1x32xf32> to vector<1x32xf32>
    %c0_138 = arith.constant 0 : index
    %c0_139 = arith.constant 0 : index
    %c0_140 = arith.constant 0 : index
    %307 = vector.load %arg29[%c0_138, %c0_139, %c0_140] : memref<2x1x32xf32, #tpu.memory_space<vmem>>, vector<1x1x32xf32>
    %308 = vector.shape_cast %307 : vector<1x1x32xf32> to vector<1x32xf32>
    %cst_141 = arith.constant dense<0.000000e+00> : vector<8xf32>
    %309 = vector.multi_reduction <add>, %304, %cst_141 [1] : vector<8x32xf32> to vector<8xf32>
    %310 = vector.shape_cast %309 : vector<8xf32> to vector<8x1xf32>
    %cst_142 = arith.constant 3.200000e+01 : f32
    %311 = vector.broadcast %cst_142 : f32 to vector<8x1xf32>
    %312 = arith.divf %310, %311 : vector<8x1xf32>
    %313 = vector.broadcast %312 : vector<8x1xf32> to vector<8x32xf32>
    %314 = arith.subf %304, %313 : vector<8x32xf32>
    %315 = arith.mulf %314, %314 : vector<8x32xf32>
    %cst_143 = arith.constant dense<0.000000e+00> : vector<8xf32>
    %316 = vector.multi_reduction <add>, %315, %cst_143 [1] : vector<8x32xf32> to vector<8xf32>
    %317 = vector.shape_cast %316 : vector<8xf32> to vector<8x1xf32>
    %cst_144 = arith.constant 3.200000e+01 : f32
    %318 = vector.broadcast %cst_144 : f32 to vector<8x1xf32>
    %319 = arith.divf %317, %318 : vector<8x1xf32>
    %320 = vector.broadcast %312 : vector<8x1xf32> to vector<8x32xf32>
    %321 = arith.subf %304, %320 : vector<8x32xf32>
    %cst_145 = arith.constant 9.99999974E-6 : f32
    %322 = vector.broadcast %cst_145 : f32 to vector<8x1xf32>
    %323 = arith.addf %319, %322 : vector<8x1xf32>
    %324 = math.rsqrt %323 : vector<8x1xf32>
    %325 = vector.broadcast %324 : vector<8x1xf32> to vector<8x32xf32>
    %326 = arith.mulf %321, %325 : vector<8x32xf32>
    %327 = vector.broadcast %306 : vector<1x32xf32> to vector<8x32xf32>
    %328 = arith.mulf %326, %327 : vector<8x32xf32>
    %329 = vector.broadcast %308 : vector<1x32xf32> to vector<8x32xf32>
    %330 = arith.addf %328, %329 : vector<8x32xf32>
    %c1 = arith.constant 1 : index
    %c0_146 = arith.constant 0 : index
    %c0_147 = arith.constant 0 : index
    %331 = vector.load %arg6[%c1, %c0_146, %c0_147] : memref<2x32x96xbf16, #tpu.memory_space<vmem>>, vector<1x32x96xbf16>
    %332 = vector.shape_cast %331 : vector<1x32x96xbf16> to vector<32x96xbf16>
    %333 = arith.truncf %330 : vector<8x32xf32> to vector<8x32xbf16>
    %cst_148 = arith.constant dense<0.000000e+00> : vector<8x96xf32>
    %334 = tpu.matmul %333, %332, %cst_148 {dimension_numbers = #tpu.dot_dimension_numbers<[1], [0], [0], [1], [0, 0, 1, 1], [], []>} : vector<8x32xbf16>, vector<32x96xbf16>, vector<8x96xf32> -> vector<8x96xf32>
    %c1_149 = arith.constant 1 : index
    %c0_150 = arith.constant 0 : index
    %c0_151 = arith.constant 0 : index
    %335 = vector.load %arg7[%c1_149, %c0_150, %c0_151] : memref<2x1x96xf32, #tpu.memory_space<vmem>>, vector<1x1x96xf32>
    %336 = vector.shape_cast %335 : vector<1x1x96xf32> to vector<1x96xf32>
    %337 = vector.broadcast %336 : vector<1x96xf32> to vector<8x96xf32>
    %338 = arith.addf %334, %337 : vector<8x96xf32>
    %339 = vector.extract_strided_slice %338 {offsets = [0, 0], sizes = [8, 64], strides = [1, 1]} : vector<8x96xf32> to vector<8x64xf32>
    %340 = vector.extract_strided_slice %21 {offsets = [0, 64], sizes = [8, 64], strides = [1, 1]} : vector<8x128xf32> to vector<8x64xf32>
    %341 = arith.addf %339, %340 : vector<8x64xf32>
    %342 = vector.extract_strided_slice %338 {offsets = [0, 64], sizes = [8, 32], strides = [1, 1]} : vector<8x96xf32> to vector<8x32xf32>
    %343 = vector.extract_strided_slice %341 {offsets = [0, 0], sizes = [8, 32], strides = [1, 1]} : vector<8x64xf32> to vector<8x32xf32>
    %344 = vector.extract_strided_slice %341 {offsets = [0, 32], sizes = [8, 32], strides = [1, 1]} : vector<8x64xf32> to vector<8x32xf32>
    %c1_152 = arith.constant 1 : index
    %c0_153 = arith.constant 0 : index
    %c0_154 = arith.constant 0 : index
    %345 = vector.load %arg9[%c1_152, %c0_153, %c0_154] : memref<2x32x32xbf16, #tpu.memory_space<vmem>>, vector<1x32x32xbf16>
    %346 = vector.shape_cast %345 : vector<1x32x32xbf16> to vector<32x32xbf16>
    %c1_155 = arith.constant 1 : index
    %c0_156 = arith.constant 0 : index
    %c0_157 = arith.constant 0 : index
    %347 = vector.load %arg10[%c1_155, %c0_156, %c0_157] : memref<2x1x32xf32, #tpu.memory_space<vmem>>, vector<1x1x32xf32>
    %348 = vector.shape_cast %347 : vector<1x1x32xf32> to vector<1x32xf32>
    %349 = arith.truncf %343 : vector<8x32xf32> to vector<8x32xbf16>
    %350 = arith.truncf %344 : vector<8x32xf32> to vector<8x32xbf16>
    %351 = arith.truncf %342 : vector<8x32xf32> to vector<8x32xbf16>
    %352 = vector.extract_strided_slice %349 {offsets = [0, 0], sizes = [8, 8], strides = [1, 1]} : vector<8x32xbf16> to vector<8x8xbf16>
    %353 = vector.extract_strided_slice %350 {offsets = [0, 0], sizes = [8, 8], strides = [1, 1]} : vector<8x32xbf16> to vector<8x8xbf16>
    %354 = vector.extract_strided_slice %351 {offsets = [0, 0], sizes = [8, 8], strides = [1, 1]} : vector<8x32xbf16> to vector<8x8xbf16>
    %cst_158 = arith.constant dense<0.000000e+00> : vector<8x8xf32>
    %355 = tpu.matmul %352, %353, %cst_158 {dimension_numbers = #tpu.dot_dimension_numbers<[1], [1], [0], [0], [0, 0, 1, 0], [], []>} : vector<8x8xbf16>, vector<8x8xbf16>, vector<8x8xf32> -> vector<8x8xf32>
    %cst_159 = arith.constant 0.353553385 : f32
    %356 = vector.broadcast %cst_159 : f32 to vector<8x8xf32>
    %357 = arith.mulf %355, %356 : vector<8x8xf32>
    %cst_160 = arith.constant dense<0xFF800000> : vector<8xf32>
    %358 = vector.multi_reduction <maximumf>, %357, %cst_160 [1] : vector<8x8xf32> to vector<8xf32>
    %359 = vector.shape_cast %358 : vector<8xf32> to vector<8x1xf32>
    %360 = vector.broadcast %359 : vector<8x1xf32> to vector<8x8xf32>
    %361 = arith.subf %357, %360 : vector<8x8xf32>
    %362 = math.exp %361 : vector<8x8xf32>
    %cst_161 = arith.constant dense<0.000000e+00> : vector<8xf32>
    %363 = vector.multi_reduction <add>, %362, %cst_161 [1] : vector<8x8xf32> to vector<8xf32>
    %364 = vector.shape_cast %363 : vector<8xf32> to vector<8x1xf32>
    %365 = tpu.reciprocal %364 {approx = true} : vector<8x1xf32> -> vector<8x1xf32>
    %366 = vector.broadcast %365 : vector<8x1xf32> to vector<8x8xf32>
    %367 = arith.mulf %362, %366 : vector<8x8xf32>
    %368 = arith.truncf %367 : vector<8x8xf32> to vector<8x8xbf16>
    %cst_162 = arith.constant dense<0.000000e+00> : vector<8x8xf32>
    %369 = tpu.matmul %368, %354, %cst_162 {dimension_numbers = #tpu.dot_dimension_numbers<[1], [0], [0], [1], [0, 0, 1, 1], [], []>} : vector<8x8xbf16>, vector<8x8xbf16>, vector<8x8xf32> -> vector<8x8xf32>
    %370 = vector.extract_strided_slice %349 {offsets = [0, 8], sizes = [8, 8], strides = [1, 1]} : vector<8x32xbf16> to vector<8x8xbf16>
    %371 = vector.extract_strided_slice %350 {offsets = [0, 8], sizes = [8, 8], strides = [1, 1]} : vector<8x32xbf16> to vector<8x8xbf16>
    %372 = vector.extract_strided_slice %351 {offsets = [0, 8], sizes = [8, 8], strides = [1, 1]} : vector<8x32xbf16> to vector<8x8xbf16>
    %cst_163 = arith.constant dense<0.000000e+00> : vector<8x8xf32>
    %373 = tpu.matmul %370, %371, %cst_163 {dimension_numbers = #tpu.dot_dimension_numbers<[1], [1], [0], [0], [0, 0, 1, 0], [], []>} : vector<8x8xbf16>, vector<8x8xbf16>, vector<8x8xf32> -> vector<8x8xf32>
    %cst_164 = arith.constant 0.353553385 : f32
    %374 = vector.broadcast %cst_164 : f32 to vector<8x8xf32>
    %375 = arith.mulf %373, %374 : vector<8x8xf32>
    %cst_165 = arith.constant dense<0xFF800000> : vector<8xf32>
    %376 = vector.multi_reduction <maximumf>, %375, %cst_165 [1] : vector<8x8xf32> to vector<8xf32>
    %377 = vector.shape_cast %376 : vector<8xf32> to vector<8x1xf32>
    %378 = vector.broadcast %377 : vector<8x1xf32> to vector<8x8xf32>
    %379 = arith.subf %375, %378 : vector<8x8xf32>
    %380 = math.exp %379 : vector<8x8xf32>
    %cst_166 = arith.constant dense<0.000000e+00> : vector<8xf32>
    %381 = vector.multi_reduction <add>, %380, %cst_166 [1] : vector<8x8xf32> to vector<8xf32>
    %382 = vector.shape_cast %381 : vector<8xf32> to vector<8x1xf32>
    %383 = tpu.reciprocal %382 {approx = true} : vector<8x1xf32> -> vector<8x1xf32>
    %384 = vector.broadcast %383 : vector<8x1xf32> to vector<8x8xf32>
    %385 = arith.mulf %380, %384 : vector<8x8xf32>
    %386 = arith.truncf %385 : vector<8x8xf32> to vector<8x8xbf16>
    %cst_167 = arith.constant dense<0.000000e+00> : vector<8x8xf32>
    %387 = tpu.matmul %386, %372, %cst_167 {dimension_numbers = #tpu.dot_dimension_numbers<[1], [0], [0], [1], [0, 0, 1, 1], [], []>} : vector<8x8xbf16>, vector<8x8xbf16>, vector<8x8xf32> -> vector<8x8xf32>
    %388 = vector.extract_strided_slice %349 {offsets = [0, 16], sizes = [8, 8], strides = [1, 1]} : vector<8x32xbf16> to vector<8x8xbf16>
    %389 = vector.extract_strided_slice %350 {offsets = [0, 16], sizes = [8, 8], strides = [1, 1]} : vector<8x32xbf16> to vector<8x8xbf16>
    %390 = vector.extract_strided_slice %351 {offsets = [0, 16], sizes = [8, 8], strides = [1, 1]} : vector<8x32xbf16> to vector<8x8xbf16>
    %cst_168 = arith.constant dense<0.000000e+00> : vector<8x8xf32>
    %391 = tpu.matmul %388, %389, %cst_168 {dimension_numbers = #tpu.dot_dimension_numbers<[1], [1], [0], [0], [0, 0, 1, 0], [], []>} : vector<8x8xbf16>, vector<8x8xbf16>, vector<8x8xf32> -> vector<8x8xf32>
    %cst_169 = arith.constant 0.353553385 : f32
    %392 = vector.broadcast %cst_169 : f32 to vector<8x8xf32>
    %393 = arith.mulf %391, %392 : vector<8x8xf32>
    %cst_170 = arith.constant dense<0xFF800000> : vector<8xf32>
    %394 = vector.multi_reduction <maximumf>, %393, %cst_170 [1] : vector<8x8xf32> to vector<8xf32>
    %395 = vector.shape_cast %394 : vector<8xf32> to vector<8x1xf32>
    %396 = vector.broadcast %395 : vector<8x1xf32> to vector<8x8xf32>
    %397 = arith.subf %393, %396 : vector<8x8xf32>
    %398 = math.exp %397 : vector<8x8xf32>
    %cst_171 = arith.constant dense<0.000000e+00> : vector<8xf32>
    %399 = vector.multi_reduction <add>, %398, %cst_171 [1] : vector<8x8xf32> to vector<8xf32>
    %400 = vector.shape_cast %399 : vector<8xf32> to vector<8x1xf32>
    %401 = tpu.reciprocal %400 {approx = true} : vector<8x1xf32> -> vector<8x1xf32>
    %402 = vector.broadcast %401 : vector<8x1xf32> to vector<8x8xf32>
    %403 = arith.mulf %398, %402 : vector<8x8xf32>
    %404 = arith.truncf %403 : vector<8x8xf32> to vector<8x8xbf16>
    %cst_172 = arith.constant dense<0.000000e+00> : vector<8x8xf32>
    %405 = tpu.matmul %404, %390, %cst_172 {dimension_numbers = #tpu.dot_dimension_numbers<[1], [0], [0], [1], [0, 0, 1, 1], [], []>} : vector<8x8xbf16>, vector<8x8xbf16>, vector<8x8xf32> -> vector<8x8xf32>
    %406 = vector.extract_strided_slice %349 {offsets = [0, 24], sizes = [8, 8], strides = [1, 1]} : vector<8x32xbf16> to vector<8x8xbf16>
    %407 = vector.extract_strided_slice %350 {offsets = [0, 24], sizes = [8, 8], strides = [1, 1]} : vector<8x32xbf16> to vector<8x8xbf16>
    %408 = vector.extract_strided_slice %351 {offsets = [0, 24], sizes = [8, 8], strides = [1, 1]} : vector<8x32xbf16> to vector<8x8xbf16>
    %cst_173 = arith.constant dense<0.000000e+00> : vector<8x8xf32>
    %409 = tpu.matmul %406, %407, %cst_173 {dimension_numbers = #tpu.dot_dimension_numbers<[1], [1], [0], [0], [0, 0, 1, 0], [], []>} : vector<8x8xbf16>, vector<8x8xbf16>, vector<8x8xf32> -> vector<8x8xf32>
    %cst_174 = arith.constant 0.353553385 : f32
    %410 = vector.broadcast %cst_174 : f32 to vector<8x8xf32>
    %411 = arith.mulf %409, %410 : vector<8x8xf32>
    %cst_175 = arith.constant dense<0xFF800000> : vector<8xf32>
    %412 = vector.multi_reduction <maximumf>, %411, %cst_175 [1] : vector<8x8xf32> to vector<8xf32>
    %413 = vector.shape_cast %412 : vector<8xf32> to vector<8x1xf32>
    %414 = vector.broadcast %413 : vector<8x1xf32> to vector<8x8xf32>
    %415 = arith.subf %411, %414 : vector<8x8xf32>
    %416 = math.exp %415 : vector<8x8xf32>
    %cst_176 = arith.constant dense<0.000000e+00> : vector<8xf32>
    %417 = vector.multi_reduction <add>, %416, %cst_176 [1] : vector<8x8xf32> to vector<8xf32>
    %418 = vector.shape_cast %417 : vector<8xf32> to vector<8x1xf32>
    %419 = tpu.reciprocal %418 {approx = true} : vector<8x1xf32> -> vector<8x1xf32>
    %420 = vector.broadcast %419 : vector<8x1xf32> to vector<8x8xf32>
    %421 = arith.mulf %416, %420 : vector<8x8xf32>
    %422 = arith.truncf %421 : vector<8x8xf32> to vector<8x8xbf16>
    %cst_177 = arith.constant dense<0.000000e+00> : vector<8x8xf32>
    %423 = tpu.matmul %422, %408, %cst_177 {dimension_numbers = #tpu.dot_dimension_numbers<[1], [0], [0], [1], [0, 0, 1, 1], [], []>} : vector<8x8xbf16>, vector<8x8xbf16>, vector<8x8xf32> -> vector<8x8xf32>
    %424 = tpu.concatenate %369, %387, %405, %423 in 1 : vector<8x8xf32>, vector<8x8xf32>, vector<8x8xf32>, vector<8x8xf32> -> vector<8x32xf32>
    %425 = arith.truncf %424 : vector<8x32xf32> to vector<8x32xbf16>
    %cst_178 = arith.constant dense<0.000000e+00> : vector<8x32xf32>
    %426 = tpu.matmul %425, %346, %cst_178 {dimension_numbers = #tpu.dot_dimension_numbers<[1], [0], [0], [1], [0, 0, 1, 1], [], []>} : vector<8x32xbf16>, vector<32x32xbf16>, vector<8x32xf32> -> vector<8x32xf32>
    %427 = vector.broadcast %348 : vector<1x32xf32> to vector<8x32xf32>
    %428 = arith.addf %426, %427 : vector<8x32xf32>
    %429 = arith.addf %330, %428 : vector<8x32xf32>
    %c1_179 = arith.constant 1 : index
    %c0_180 = arith.constant 0 : index
    %c0_181 = arith.constant 0 : index
    %430 = vector.load %arg24[%c1_179, %c0_180, %c0_181] : memref<2x1x32xf32, #tpu.memory_space<vmem>>, vector<1x1x32xf32>
    %431 = vector.shape_cast %430 : vector<1x1x32xf32> to vector<1x32xf32>
    %c1_182 = arith.constant 1 : index
    %c0_183 = arith.constant 0 : index
    %c0_184 = arith.constant 0 : index
    %432 = vector.load %arg25[%c1_182, %c0_183, %c0_184] : memref<2x1x32xf32, #tpu.memory_space<vmem>>, vector<1x1x32xf32>
    %433 = vector.shape_cast %432 : vector<1x1x32xf32> to vector<1x32xf32>
    %cst_185 = arith.constant dense<0.000000e+00> : vector<8xf32>
    %434 = vector.multi_reduction <add>, %429, %cst_185 [1] : vector<8x32xf32> to vector<8xf32>
    %435 = vector.shape_cast %434 : vector<8xf32> to vector<8x1xf32>
    %cst_186 = arith.constant 3.200000e+01 : f32
    %436 = vector.broadcast %cst_186 : f32 to vector<8x1xf32>
    %437 = arith.divf %435, %436 : vector<8x1xf32>
    %438 = vector.broadcast %437 : vector<8x1xf32> to vector<8x32xf32>
    %439 = arith.subf %429, %438 : vector<8x32xf32>
    %440 = arith.mulf %439, %439 : vector<8x32xf32>
    %cst_187 = arith.constant dense<0.000000e+00> : vector<8xf32>
    %441 = vector.multi_reduction <add>, %440, %cst_187 [1] : vector<8x32xf32> to vector<8xf32>
    %442 = vector.shape_cast %441 : vector<8xf32> to vector<8x1xf32>
    %cst_188 = arith.constant 3.200000e+01 : f32
    %443 = vector.broadcast %cst_188 : f32 to vector<8x1xf32>
    %444 = arith.divf %442, %443 : vector<8x1xf32>
    %445 = vector.broadcast %437 : vector<8x1xf32> to vector<8x32xf32>
    %446 = arith.subf %429, %445 : vector<8x32xf32>
    %cst_189 = arith.constant 9.99999974E-6 : f32
    %447 = vector.broadcast %cst_189 : f32 to vector<8x1xf32>
    %448 = arith.addf %444, %447 : vector<8x1xf32>
    %449 = math.rsqrt %448 : vector<8x1xf32>
    %450 = vector.broadcast %449 : vector<8x1xf32> to vector<8x32xf32>
    %451 = arith.mulf %446, %450 : vector<8x32xf32>
    %452 = vector.broadcast %431 : vector<1x32xf32> to vector<8x32xf32>
    %453 = arith.mulf %451, %452 : vector<8x32xf32>
    %454 = vector.broadcast %433 : vector<1x32xf32> to vector<8x32xf32>
    %455 = arith.addf %453, %454 : vector<8x32xf32>
    %c1_190 = arith.constant 1 : index
    %c0_191 = arith.constant 0 : index
    %c0_192 = arith.constant 0 : index
    %456 = vector.load %arg11[%c1_190, %c0_191, %c0_192] : memref<2x32x32xbf16, #tpu.memory_space<vmem>>, vector<1x32x32xbf16>
    %457 = vector.shape_cast %456 : vector<1x32x32xbf16> to vector<32x32xbf16>
    %458 = arith.truncf %455 : vector<8x32xf32> to vector<8x32xbf16>
    %cst_193 = arith.constant dense<0.000000e+00> : vector<8x32xf32>
    %459 = tpu.matmul %458, %457, %cst_193 {dimension_numbers = #tpu.dot_dimension_numbers<[1], [0], [0], [1], [0, 0, 1, 1], [], []>} : vector<8x32xbf16>, vector<32x32xbf16>, vector<8x32xf32> -> vector<8x32xf32>
    %c1_194 = arith.constant 1 : index
    %c0_195 = arith.constant 0 : index
    %c0_196 = arith.constant 0 : index
    %460 = vector.load %arg12[%c1_194, %c0_195, %c0_196] : memref<2x1x32xf32, #tpu.memory_space<vmem>>, vector<1x1x32xf32>
    %461 = vector.shape_cast %460 : vector<1x1x32xf32> to vector<1x32xf32>
    %462 = vector.broadcast %461 : vector<1x32xf32> to vector<8x32xf32>
    %463 = arith.addf %459, %462 : vector<8x32xf32>
    %464 = vector.extract_strided_slice %24 {offsets = [0, 32], sizes = [8, 32], strides = [1, 1]} : vector<8x64xf32> to vector<8x32xf32>
    %465 = arith.addf %463, %464 : vector<8x32xf32>
    %466 = vector.extract_strided_slice %31 {offsets = [0, 32], sizes = [8, 32], strides = [1, 1]} : vector<8x64xf32> to vector<8x32xf32>
    %467 = vector.extract_strided_slice %37 {offsets = [0, 32], sizes = [8, 32], strides = [1, 1]} : vector<8x64xf32> to vector<8x32xf32>
    %c1_197 = arith.constant 1 : index
    %c0_198 = arith.constant 0 : index
    %c0_199 = arith.constant 0 : index
    %468 = vector.load %arg18[%c1_197, %c0_198, %c0_199] : memref<2x32x32xbf16, #tpu.memory_space<vmem>>, vector<1x32x32xbf16>
    %469 = vector.shape_cast %468 : vector<1x32x32xbf16> to vector<32x32xbf16>
    %c1_200 = arith.constant 1 : index
    %c0_201 = arith.constant 0 : index
    %c0_202 = arith.constant 0 : index
    %470 = vector.load %arg19[%c1_200, %c0_201, %c0_202] : memref<2x1x32xf32, #tpu.memory_space<vmem>>, vector<1x1x32xf32>
    %471 = vector.shape_cast %470 : vector<1x1x32xf32> to vector<1x32xf32>
    %472 = arith.truncf %465 : vector<8x32xf32> to vector<8x32xbf16>
    %473 = arith.truncf %466 : vector<8x32xf32> to vector<8x32xbf16>
    %474 = arith.truncf %467 : vector<8x32xf32> to vector<8x32xbf16>
    %475 = vector.extract_strided_slice %472 {offsets = [0, 0], sizes = [8, 8], strides = [1, 1]} : vector<8x32xbf16> to vector<8x8xbf16>
    %476 = vector.extract_strided_slice %473 {offsets = [0, 0], sizes = [8, 8], strides = [1, 1]} : vector<8x32xbf16> to vector<8x8xbf16>
    %477 = vector.extract_strided_slice %474 {offsets = [0, 0], sizes = [8, 8], strides = [1, 1]} : vector<8x32xbf16> to vector<8x8xbf16>
    %cst_203 = arith.constant dense<0.000000e+00> : vector<8x8xf32>
    %478 = tpu.matmul %475, %476, %cst_203 {dimension_numbers = #tpu.dot_dimension_numbers<[1], [1], [0], [0], [0, 0, 1, 0], [], []>} : vector<8x8xbf16>, vector<8x8xbf16>, vector<8x8xf32> -> vector<8x8xf32>
    %cst_204 = arith.constant 0.353553385 : f32
    %479 = vector.broadcast %cst_204 : f32 to vector<8x8xf32>
    %480 = arith.mulf %478, %479 : vector<8x8xf32>
    %cst_205 = arith.constant dense<0xFF800000> : vector<8xf32>
    %481 = vector.multi_reduction <maximumf>, %480, %cst_205 [1] : vector<8x8xf32> to vector<8xf32>
    %482 = vector.shape_cast %481 : vector<8xf32> to vector<8x1xf32>
    %483 = vector.broadcast %482 : vector<8x1xf32> to vector<8x8xf32>
    %484 = arith.subf %480, %483 : vector<8x8xf32>
    %485 = math.exp %484 : vector<8x8xf32>
    %cst_206 = arith.constant dense<0.000000e+00> : vector<8xf32>
    %486 = vector.multi_reduction <add>, %485, %cst_206 [1] : vector<8x8xf32> to vector<8xf32>
    %487 = vector.shape_cast %486 : vector<8xf32> to vector<8x1xf32>
    %488 = tpu.reciprocal %487 {approx = true} : vector<8x1xf32> -> vector<8x1xf32>
    %489 = vector.broadcast %488 : vector<8x1xf32> to vector<8x8xf32>
    %490 = arith.mulf %485, %489 : vector<8x8xf32>
    %491 = arith.truncf %490 : vector<8x8xf32> to vector<8x8xbf16>
    %cst_207 = arith.constant dense<0.000000e+00> : vector<8x8xf32>
    %492 = tpu.matmul %491, %477, %cst_207 {dimension_numbers = #tpu.dot_dimension_numbers<[1], [0], [0], [1], [0, 0, 1, 1], [], []>} : vector<8x8xbf16>, vector<8x8xbf16>, vector<8x8xf32> -> vector<8x8xf32>
    %493 = vector.extract_strided_slice %472 {offsets = [0, 8], sizes = [8, 8], strides = [1, 1]} : vector<8x32xbf16> to vector<8x8xbf16>
    %494 = vector.extract_strided_slice %473 {offsets = [0, 8], sizes = [8, 8], strides = [1, 1]} : vector<8x32xbf16> to vector<8x8xbf16>
    %495 = vector.extract_strided_slice %474 {offsets = [0, 8], sizes = [8, 8], strides = [1, 1]} : vector<8x32xbf16> to vector<8x8xbf16>
    %cst_208 = arith.constant dense<0.000000e+00> : vector<8x8xf32>
    %496 = tpu.matmul %493, %494, %cst_208 {dimension_numbers = #tpu.dot_dimension_numbers<[1], [1], [0], [0], [0, 0, 1, 0], [], []>} : vector<8x8xbf16>, vector<8x8xbf16>, vector<8x8xf32> -> vector<8x8xf32>
    %cst_209 = arith.constant 0.353553385 : f32
    %497 = vector.broadcast %cst_209 : f32 to vector<8x8xf32>
    %498 = arith.mulf %496, %497 : vector<8x8xf32>
    %cst_210 = arith.constant dense<0xFF800000> : vector<8xf32>
    %499 = vector.multi_reduction <maximumf>, %498, %cst_210 [1] : vector<8x8xf32> to vector<8xf32>
    %500 = vector.shape_cast %499 : vector<8xf32> to vector<8x1xf32>
    %501 = vector.broadcast %500 : vector<8x1xf32> to vector<8x8xf32>
    %502 = arith.subf %498, %501 : vector<8x8xf32>
    %503 = math.exp %502 : vector<8x8xf32>
    %cst_211 = arith.constant dense<0.000000e+00> : vector<8xf32>
    %504 = vector.multi_reduction <add>, %503, %cst_211 [1] : vector<8x8xf32> to vector<8xf32>
    %505 = vector.shape_cast %504 : vector<8xf32> to vector<8x1xf32>
    %506 = tpu.reciprocal %505 {approx = true} : vector<8x1xf32> -> vector<8x1xf32>
    %507 = vector.broadcast %506 : vector<8x1xf32> to vector<8x8xf32>
    %508 = arith.mulf %503, %507 : vector<8x8xf32>
    %509 = arith.truncf %508 : vector<8x8xf32> to vector<8x8xbf16>
    %cst_212 = arith.constant dense<0.000000e+00> : vector<8x8xf32>
    %510 = tpu.matmul %509, %495, %cst_212 {dimension_numbers = #tpu.dot_dimension_numbers<[1], [0], [0], [1], [0, 0, 1, 1], [], []>} : vector<8x8xbf16>, vector<8x8xbf16>, vector<8x8xf32> -> vector<8x8xf32>
    %511 = vector.extract_strided_slice %472 {offsets = [0, 16], sizes = [8, 8], strides = [1, 1]} : vector<8x32xbf16> to vector<8x8xbf16>
    %512 = vector.extract_strided_slice %473 {offsets = [0, 16], sizes = [8, 8], strides = [1, 1]} : vector<8x32xbf16> to vector<8x8xbf16>
    %513 = vector.extract_strided_slice %474 {offsets = [0, 16], sizes = [8, 8], strides = [1, 1]} : vector<8x32xbf16> to vector<8x8xbf16>
    %cst_213 = arith.constant dense<0.000000e+00> : vector<8x8xf32>
    %514 = tpu.matmul %511, %512, %cst_213 {dimension_numbers = #tpu.dot_dimension_numbers<[1], [1], [0], [0], [0, 0, 1, 0], [], []>} : vector<8x8xbf16>, vector<8x8xbf16>, vector<8x8xf32> -> vector<8x8xf32>
    %cst_214 = arith.constant 0.353553385 : f32
    %515 = vector.broadcast %cst_214 : f32 to vector<8x8xf32>
    %516 = arith.mulf %514, %515 : vector<8x8xf32>
    %cst_215 = arith.constant dense<0xFF800000> : vector<8xf32>
    %517 = vector.multi_reduction <maximumf>, %516, %cst_215 [1] : vector<8x8xf32> to vector<8xf32>
    %518 = vector.shape_cast %517 : vector<8xf32> to vector<8x1xf32>
    %519 = vector.broadcast %518 : vector<8x1xf32> to vector<8x8xf32>
    %520 = arith.subf %516, %519 : vector<8x8xf32>
    %521 = math.exp %520 : vector<8x8xf32>
    %cst_216 = arith.constant dense<0.000000e+00> : vector<8xf32>
    %522 = vector.multi_reduction <add>, %521, %cst_216 [1] : vector<8x8xf32> to vector<8xf32>
    %523 = vector.shape_cast %522 : vector<8xf32> to vector<8x1xf32>
    %524 = tpu.reciprocal %523 {approx = true} : vector<8x1xf32> -> vector<8x1xf32>
    %525 = vector.broadcast %524 : vector<8x1xf32> to vector<8x8xf32>
    %526 = arith.mulf %521, %525 : vector<8x8xf32>
    %527 = arith.truncf %526 : vector<8x8xf32> to vector<8x8xbf16>
    %cst_217 = arith.constant dense<0.000000e+00> : vector<8x8xf32>
    %528 = tpu.matmul %527, %513, %cst_217 {dimension_numbers = #tpu.dot_dimension_numbers<[1], [0], [0], [1], [0, 0, 1, 1], [], []>} : vector<8x8xbf16>, vector<8x8xbf16>, vector<8x8xf32> -> vector<8x8xf32>
    %529 = vector.extract_strided_slice %472 {offsets = [0, 24], sizes = [8, 8], strides = [1, 1]} : vector<8x32xbf16> to vector<8x8xbf16>
    %530 = vector.extract_strided_slice %473 {offsets = [0, 24], sizes = [8, 8], strides = [1, 1]} : vector<8x32xbf16> to vector<8x8xbf16>
    %531 = vector.extract_strided_slice %474 {offsets = [0, 24], sizes = [8, 8], strides = [1, 1]} : vector<8x32xbf16> to vector<8x8xbf16>
    %cst_218 = arith.constant dense<0.000000e+00> : vector<8x8xf32>
    %532 = tpu.matmul %529, %530, %cst_218 {dimension_numbers = #tpu.dot_dimension_numbers<[1], [1], [0], [0], [0, 0, 1, 0], [], []>} : vector<8x8xbf16>, vector<8x8xbf16>, vector<8x8xf32> -> vector<8x8xf32>
    %cst_219 = arith.constant 0.353553385 : f32
    %533 = vector.broadcast %cst_219 : f32 to vector<8x8xf32>
    %534 = arith.mulf %532, %533 : vector<8x8xf32>
    %cst_220 = arith.constant dense<0xFF800000> : vector<8xf32>
    %535 = vector.multi_reduction <maximumf>, %534, %cst_220 [1] : vector<8x8xf32> to vector<8xf32>
    %536 = vector.shape_cast %535 : vector<8xf32> to vector<8x1xf32>
    %537 = vector.broadcast %536 : vector<8x1xf32> to vector<8x8xf32>
    %538 = arith.subf %534, %537 : vector<8x8xf32>
    %539 = math.exp %538 : vector<8x8xf32>
    %cst_221 = arith.constant dense<0.000000e+00> : vector<8xf32>
    %540 = vector.multi_reduction <add>, %539, %cst_221 [1] : vector<8x8xf32> to vector<8xf32>
    %541 = vector.shape_cast %540 : vector<8xf32> to vector<8x1xf32>
    %542 = tpu.reciprocal %541 {approx = true} : vector<8x1xf32> -> vector<8x1xf32>
    %543 = vector.broadcast %542 : vector<8x1xf32> to vector<8x8xf32>
    %544 = arith.mulf %539, %543 : vector<8x8xf32>
    %545 = arith.truncf %544 : vector<8x8xf32> to vector<8x8xbf16>
    %cst_222 = arith.constant dense<0.000000e+00> : vector<8x8xf32>
    %546 = tpu.matmul %545, %531, %cst_222 {dimension_numbers = #tpu.dot_dimension_numbers<[1], [0], [0], [1], [0, 0, 1, 1], [], []>} : vector<8x8xbf16>, vector<8x8xbf16>, vector<8x8xf32> -> vector<8x8xf32>
    %547 = tpu.concatenate %492, %510, %528, %546 in 1 : vector<8x8xf32>, vector<8x8xf32>, vector<8x8xf32>, vector<8x8xf32> -> vector<8x32xf32>
    %548 = arith.truncf %547 : vector<8x32xf32> to vector<8x32xbf16>
    %cst_223 = arith.constant dense<0.000000e+00> : vector<8x32xf32>
    %549 = tpu.matmul %548, %469, %cst_223 {dimension_numbers = #tpu.dot_dimension_numbers<[1], [0], [0], [1], [0, 0, 1, 1], [], []>} : vector<8x32xbf16>, vector<32x32xbf16>, vector<8x32xf32> -> vector<8x32xf32>
    %550 = vector.broadcast %471 : vector<1x32xf32> to vector<8x32xf32>
    %551 = arith.addf %549, %550 : vector<8x32xf32>
    %552 = arith.addf %455, %551 : vector<8x32xf32>
    %c1_224 = arith.constant 1 : index
    %c0_225 = arith.constant 0 : index
    %c0_226 = arith.constant 0 : index
    %553 = vector.load %arg26[%c1_224, %c0_225, %c0_226] : memref<2x1x32xf32, #tpu.memory_space<vmem>>, vector<1x1x32xf32>
    %554 = vector.shape_cast %553 : vector<1x1x32xf32> to vector<1x32xf32>
    %c1_227 = arith.constant 1 : index
    %c0_228 = arith.constant 0 : index
    %c0_229 = arith.constant 0 : index
    %555 = vector.load %arg27[%c1_227, %c0_228, %c0_229] : memref<2x1x32xf32, #tpu.memory_space<vmem>>, vector<1x1x32xf32>
    %556 = vector.shape_cast %555 : vector<1x1x32xf32> to vector<1x32xf32>
    %cst_230 = arith.constant dense<0.000000e+00> : vector<8xf32>
    %557 = vector.multi_reduction <add>, %552, %cst_230 [1] : vector<8x32xf32> to vector<8xf32>
    %558 = vector.shape_cast %557 : vector<8xf32> to vector<8x1xf32>
    %cst_231 = arith.constant 3.200000e+01 : f32
    %559 = vector.broadcast %cst_231 : f32 to vector<8x1xf32>
    %560 = arith.divf %558, %559 : vector<8x1xf32>
    %561 = vector.broadcast %560 : vector<8x1xf32> to vector<8x32xf32>
    %562 = arith.subf %552, %561 : vector<8x32xf32>
    %563 = arith.mulf %562, %562 : vector<8x32xf32>
    %cst_232 = arith.constant dense<0.000000e+00> : vector<8xf32>
    %564 = vector.multi_reduction <add>, %563, %cst_232 [1] : vector<8x32xf32> to vector<8xf32>
    %565 = vector.shape_cast %564 : vector<8xf32> to vector<8x1xf32>
    %cst_233 = arith.constant 3.200000e+01 : f32
    %566 = vector.broadcast %cst_233 : f32 to vector<8x1xf32>
    %567 = arith.divf %565, %566 : vector<8x1xf32>
    %568 = vector.broadcast %560 : vector<8x1xf32> to vector<8x32xf32>
    %569 = arith.subf %552, %568 : vector<8x32xf32>
    %cst_234 = arith.constant 9.99999974E-6 : f32
    %570 = vector.broadcast %cst_234 : f32 to vector<8x1xf32>
    %571 = arith.addf %567, %570 : vector<8x1xf32>
    %572 = math.rsqrt %571 : vector<8x1xf32>
    %573 = vector.broadcast %572 : vector<8x1xf32> to vector<8x32xf32>
    %574 = arith.mulf %569, %573 : vector<8x32xf32>
    %575 = vector.broadcast %554 : vector<1x32xf32> to vector<8x32xf32>
    %576 = arith.mulf %574, %575 : vector<8x32xf32>
    %577 = vector.broadcast %556 : vector<1x32xf32> to vector<8x32xf32>
    %578 = arith.addf %576, %577 : vector<8x32xf32>
    %c1_235 = arith.constant 1 : index
    %c0_236 = arith.constant 0 : index
    %c0_237 = arith.constant 0 : index
    %579 = vector.load %arg20[%c1_235, %c0_236, %c0_237] : memref<2x32x64xbf16, #tpu.memory_space<vmem>>, vector<1x32x64xbf16>
    %580 = vector.shape_cast %579 : vector<1x32x64xbf16> to vector<32x64xbf16>
    %581 = arith.truncf %578 : vector<8x32xf32> to vector<8x32xbf16>
    %cst_238 = arith.constant dense<0.000000e+00> : vector<8x64xf32>
    %582 = tpu.matmul %581, %580, %cst_238 {dimension_numbers = #tpu.dot_dimension_numbers<[1], [0], [0], [1], [0, 0, 1, 1], [], []>} : vector<8x32xbf16>, vector<32x64xbf16>, vector<8x64xf32> -> vector<8x64xf32>
    %c1_239 = arith.constant 1 : index
    %c0_240 = arith.constant 0 : index
    %c0_241 = arith.constant 0 : index
    %583 = vector.load %arg21[%c1_239, %c0_240, %c0_241] : memref<2x1x64xf32, #tpu.memory_space<vmem>>, vector<1x1x64xf32>
    %584 = vector.shape_cast %583 : vector<1x1x64xf32> to vector<1x64xf32>
    %585 = vector.broadcast %584 : vector<1x64xf32> to vector<8x64xf32>
    %586 = arith.addf %582, %585 : vector<8x64xf32>
    %cst_242 = arith.constant 0.000000e+00 : f32
    %587 = vector.broadcast %cst_242 : f32 to vector<8x64xf32>
    %588 = arith.maximumf %586, %587 : vector<8x64xf32>
    %c1_243 = arith.constant 1 : index
    %c0_244 = arith.constant 0 : index
    %c0_245 = arith.constant 0 : index
    %589 = vector.load %arg22[%c1_243, %c0_244, %c0_245] : memref<2x64x32xbf16, #tpu.memory_space<vmem>>, vector<1x64x32xbf16>
    %590 = vector.shape_cast %589 : vector<1x64x32xbf16> to vector<64x32xbf16>
    %591 = arith.truncf %588 : vector<8x64xf32> to vector<8x64xbf16>
    %cst_246 = arith.constant dense<0.000000e+00> : vector<8x32xf32>
    %592 = tpu.matmul %591, %590, %cst_246 {dimension_numbers = #tpu.dot_dimension_numbers<[1], [0], [0], [1], [0, 0, 1, 1], [], []>} : vector<8x64xbf16>, vector<64x32xbf16>, vector<8x32xf32> -> vector<8x32xf32>
    %c1_247 = arith.constant 1 : index
    %c0_248 = arith.constant 0 : index
    %c0_249 = arith.constant 0 : index
    %593 = vector.load %arg23[%c1_247, %c0_248, %c0_249] : memref<2x1x32xf32, #tpu.memory_space<vmem>>, vector<1x1x32xf32>
    %594 = vector.shape_cast %593 : vector<1x1x32xf32> to vector<1x32xf32>
    %595 = vector.broadcast %594 : vector<1x32xf32> to vector<8x32xf32>
    %596 = arith.addf %592, %595 : vector<8x32xf32>
    %597 = arith.addf %578, %596 : vector<8x32xf32>
    %c1_250 = arith.constant 1 : index
    %c0_251 = arith.constant 0 : index
    %c0_252 = arith.constant 0 : index
    %598 = vector.load %arg28[%c1_250, %c0_251, %c0_252] : memref<2x1x32xf32, #tpu.memory_space<vmem>>, vector<1x1x32xf32>
    %599 = vector.shape_cast %598 : vector<1x1x32xf32> to vector<1x32xf32>
    %c1_253 = arith.constant 1 : index
    %c0_254 = arith.constant 0 : index
    %c0_255 = arith.constant 0 : index
    %600 = vector.load %arg29[%c1_253, %c0_254, %c0_255] : memref<2x1x32xf32, #tpu.memory_space<vmem>>, vector<1x1x32xf32>
    %601 = vector.shape_cast %600 : vector<1x1x32xf32> to vector<1x32xf32>
    %cst_256 = arith.constant dense<0.000000e+00> : vector<8xf32>
    %602 = vector.multi_reduction <add>, %597, %cst_256 [1] : vector<8x32xf32> to vector<8xf32>
    %603 = vector.shape_cast %602 : vector<8xf32> to vector<8x1xf32>
    %cst_257 = arith.constant 3.200000e+01 : f32
    %604 = vector.broadcast %cst_257 : f32 to vector<8x1xf32>
    %605 = arith.divf %603, %604 : vector<8x1xf32>
    %606 = vector.broadcast %605 : vector<8x1xf32> to vector<8x32xf32>
    %607 = arith.subf %597, %606 : vector<8x32xf32>
    %608 = arith.mulf %607, %607 : vector<8x32xf32>
    %cst_258 = arith.constant dense<0.000000e+00> : vector<8xf32>
    %609 = vector.multi_reduction <add>, %608, %cst_258 [1] : vector<8x32xf32> to vector<8xf32>
    %610 = vector.shape_cast %609 : vector<8xf32> to vector<8x1xf32>
    %cst_259 = arith.constant 3.200000e+01 : f32
    %611 = vector.broadcast %cst_259 : f32 to vector<8x1xf32>
    %612 = arith.divf %610, %611 : vector<8x1xf32>
    %613 = vector.broadcast %605 : vector<8x1xf32> to vector<8x32xf32>
    %614 = arith.subf %597, %613 : vector<8x32xf32>
    %cst_260 = arith.constant 9.99999974E-6 : f32
    %615 = vector.broadcast %cst_260 : f32 to vector<8x1xf32>
    %616 = arith.addf %612, %615 : vector<8x1xf32>
    %617 = math.rsqrt %616 : vector<8x1xf32>
    %618 = vector.broadcast %617 : vector<8x1xf32> to vector<8x32xf32>
    %619 = arith.mulf %614, %618 : vector<8x32xf32>
    %620 = vector.broadcast %599 : vector<1x32xf32> to vector<8x32xf32>
    %621 = arith.mulf %619, %620 : vector<8x32xf32>
    %622 = vector.broadcast %601 : vector<1x32xf32> to vector<8x32xf32>
    %623 = arith.addf %621, %622 : vector<8x32xf32>
    %c0_261 = arith.constant 0 : index
    %c0_262 = arith.constant 0 : index
    %624 = vector.load %arg30[%c0_261, %c0_262] : memref<1x32xf32, #tpu.memory_space<vmem>>, vector<1x32xf32>
    %c0_263 = arith.constant 0 : index
    %c0_264 = arith.constant 0 : index
    %625 = vector.load %arg31[%c0_263, %c0_264] : memref<1x32xf32, #tpu.memory_space<vmem>>, vector<1x32xf32>
    %cst_265 = arith.constant dense<0.000000e+00> : vector<8xf32>
    %626 = vector.multi_reduction <add>, %623, %cst_265 [1] : vector<8x32xf32> to vector<8xf32>
    %627 = vector.shape_cast %626 : vector<8xf32> to vector<8x1xf32>
    %cst_266 = arith.constant 3.200000e+01 : f32
    %628 = vector.broadcast %cst_266 : f32 to vector<8x1xf32>
    %629 = arith.divf %627, %628 : vector<8x1xf32>
    %630 = vector.broadcast %629 : vector<8x1xf32> to vector<8x32xf32>
    %631 = arith.subf %623, %630 : vector<8x32xf32>
    %632 = arith.mulf %631, %631 : vector<8x32xf32>
    %cst_267 = arith.constant dense<0.000000e+00> : vector<8xf32>
    %633 = vector.multi_reduction <add>, %632, %cst_267 [1] : vector<8x32xf32> to vector<8xf32>
    %634 = vector.shape_cast %633 : vector<8xf32> to vector<8x1xf32>
    %cst_268 = arith.constant 3.200000e+01 : f32
    %635 = vector.broadcast %cst_268 : f32 to vector<8x1xf32>
    %636 = arith.divf %634, %635 : vector<8x1xf32>
    %637 = vector.broadcast %629 : vector<8x1xf32> to vector<8x32xf32>
    %638 = arith.subf %623, %637 : vector<8x32xf32>
    %cst_269 = arith.constant 9.99999974E-6 : f32
    %639 = vector.broadcast %cst_269 : f32 to vector<8x1xf32>
    %640 = arith.addf %636, %639 : vector<8x1xf32>
    %641 = math.rsqrt %640 : vector<8x1xf32>
    %642 = vector.broadcast %641 : vector<8x1xf32> to vector<8x32xf32>
    %643 = arith.mulf %638, %642 : vector<8x32xf32>
    %644 = vector.broadcast %624 : vector<1x32xf32> to vector<8x32xf32>
    %645 = arith.mulf %643, %644 : vector<8x32xf32>
    %646 = vector.broadcast %625 : vector<1x32xf32> to vector<8x32xf32>
    %647 = arith.addf %645, %646 : vector<8x32xf32>
    %c0_270 = arith.constant 0 : index
    %c0_271 = arith.constant 0 : index
    %648 = vector.load %arg32[%c0_270, %c0_271] : memref<32x128xbf16, #tpu.memory_space<vmem>>, vector<32x128xbf16>
    %649 = arith.truncf %647 : vector<8x32xf32> to vector<8x32xbf16>
    %cst_272 = arith.constant dense<0.000000e+00> : vector<8x128xf32>
    %650 = tpu.matmul %649, %648, %cst_272 {dimension_numbers = #tpu.dot_dimension_numbers<[1], [0], [0], [1], [0, 0, 1, 1], [], []>} : vector<8x32xbf16>, vector<32x128xbf16>, vector<8x128xf32> -> vector<8x128xf32>
    %c0_273 = arith.constant 0 : index
    %c0_274 = arith.constant 0 : index
    %651 = vector.load %arg33[%c0_273, %c0_274] : memref<1x128xf32, #tpu.memory_space<vmem>>, vector<1x128xf32>
    %652 = vector.broadcast %651 : vector<1x128xf32> to vector<8x128xf32>
    %653 = arith.addf %650, %652 : vector<8x128xf32>
    %c0_275 = arith.constant 0 : index
    %c0_276 = arith.constant 0 : index
    %c0_277 = arith.constant 0 : index
    %654 = vector.load %arg34[%c0_275, %c0_276, %c0_277] : memref<1x8x128xf32, #tpu.memory_space<vmem>>, vector<1x8x128xf32>
    %655 = vector.shape_cast %654 : vector<1x8x128xf32> to vector<8x128xf32>
    %656 = vector.shape_cast %653 : vector<8x128xf32> to vector<1x8x128xf32>
    tpu.vector_store %arg34[%c0_275, %c0_276, %c0_277], %656 {strides = array<i32>} : memref<1x8x128xf32, #tpu.memory_space<vmem>>, vector<1x8x128xf32>,
    return
  }
  func.func @transform_0(%arg0: i32) -> (i32, i32, i32) {
    %c0_i32 = arith.constant 0 : i32
    %c0_i32_0 = arith.constant 0 : i32
    %c0_i32_1 = arith.constant 0 : i32
    return %arg0, %c0_i32, %c0_i32_0 : i32, i32, i32
  }
  func.func @transform_1(%arg0: i32) -> (i32, i32, i32) {
    %c0_i32 = arith.constant 0 : i32
    %c0_i32_0 = arith.constant 0 : i32
    %c0_i32_1 = arith.constant 0 : i32
    return %arg0, %c0_i32, %c0_i32_0 : i32, i32, i32
  }
  func.func @transform_2(%arg0: i32) -> (i32, i32, i32) {
    %c0_i32 = arith.constant 0 : i32
    %c0_i32_0 = arith.constant 0 : i32
    %c0_i32_1 = arith.constant 0 : i32
    return %arg0, %c0_i32, %c0_i32_0 : i32, i32, i32
  }
  func.func @transform_3(%arg0: i32) -> (i32, i32) {
    %c0_i32 = arith.constant 0 : i32
    %c0_i32_0 = arith.constant 0 : i32
    %c0_i32_1 = arith.constant 0 : i32
    return %c0_i32, %c0_i32_0 : i32, i32
  }
  func.func @transform_4(%arg0: i32) -> (i32, i32) {
    %c0_i32 = arith.constant 0 : i32
    %c0_i32_0 = arith.constant 0 : i32
    %c0_i32_1 = arith.constant 0 : i32
    return %c0_i32, %c0_i32_0 : i32, i32
  }
  func.func @transform_5(%arg0: i32) -> (i32, i32, i32) {
    %c0_i32 = arith.constant 0 : i32
    %c0_i32_0 = arith.constant 0 : i32
    %c0_i32_1 = arith.constant 0 : i32
    %c0_i32_2 = arith.constant 0 : i32
    return %c0_i32, %c0_i32_0, %c0_i32_1 : i32, i32, i32
  }
  func.func @transform_6(%arg0: i32) -> (i32, i32, i32) {
    %c0_i32 = arith.constant 0 : i32
    %c0_i32_0 = arith.constant 0 : i32
    %c0_i32_1 = arith.constant 0 : i32
    %c0_i32_2 = arith.constant 0 : i32
    return %c0_i32, %c0_i32_0, %c0_i32_1 : i32, i32, i32
  }
  func.func @transform_7(%arg0: i32) -> (i32, i32) {
    %c0_i32 = arith.constant 0 : i32
    %c0_i32_0 = arith.constant 0 : i32
    %c0_i32_1 = arith.constant 0 : i32
    return %c0_i32, %c0_i32_0 : i32, i32
  }
  func.func @transform_8(%arg0: i32) -> (i32, i32, i32) {
    %c0_i32 = arith.constant 0 : i32
    %c0_i32_0 = arith.constant 0 : i32
    %c0_i32_1 = arith.constant 0 : i32
    %c0_i32_2 = arith.constant 0 : i32
    return %c0_i32, %c0_i32_0, %c0_i32_1 : i32, i32, i32
  }
  func.func @transform_9(%arg0: i32) -> (i32, i32, i32) {
    %c0_i32 = arith.constant 0 : i32
    %c0_i32_0 = arith.constant 0 : i32
    %c0_i32_1 = arith.constant 0 : i32
    %c0_i32_2 = arith.constant 0 : i32
    return %c0_i32, %c0_i32_0, %c0_i32_1 : i32, i32, i32
  }
  func.func @transform_10(%arg0: i32) -> (i32, i32, i32) {
    %c0_i32 = arith.constant 0 : i32
    %c0_i32_0 = arith.constant 0 : i32
    %c0_i32_1 = arith.constant 0 : i32
    %c0_i32_2 = arith.constant 0 : i32
    return %c0_i32, %c0_i32_0, %c0_i32_1 : i32, i32, i32
  }
  func.func @transform_11(%arg0: i32) -> (i32, i32, i32) {
    %c0_i32 = arith.constant 0 : i32
    %c0_i32_0 = arith.constant 0 : i32
    %c0_i32_1 = arith.constant 0 : i32
    %c0_i32_2 = arith.constant 0 : i32
    return %c0_i32, %c0_i32_0, %c0_i32_1 : i32, i32, i32
  }
  func.func @transform_12(%arg0: i32) -> (i32, i32) {
    %c0_i32 = arith.constant 0 : i32
    %c0_i32_0 = arith.constant 0 : i32
    %c0_i32_1 = arith.constant 0 : i32
    return %c0_i32, %c0_i32_0 : i32, i32
  }
  func.func @transform_13(%arg0: i32) -> (i32, i32) {
    %c0_i32 = arith.constant 0 : i32
    %c0_i32_0 = arith.constant 0 : i32
    %c0_i32_1 = arith.constant 0 : i32
    return %c0_i32, %c0_i32_0 : i32, i32
  }
  func.func @transform_14(%arg0: i32) -> (i32, i32) {
    %c0_i32 = arith.constant 0 : i32
    %c0_i32_0 = arith.constant 0 : i32
    %c0_i32_1 = arith.constant 0 : i32
    return %c0_i32, %c0_i32_0 : i32, i32
  }
  func.func @transform_15(%arg0: i32) -> (i32, i32) {
    %c0_i32 = arith.constant 0 : i32
    %c0_i32_0 = arith.constant 0 : i32
    %c0_i32_1 = arith.constant 0 : i32
    return %c0_i32, %c0_i32_0 : i32, i32
  }
  func.func @transform_16(%arg0: i32) -> (i32, i32) {
    %c0_i32 = arith.constant 0 : i32
    %c0_i32_0 = arith.constant 0 : i32
    %c0_i32_1 = arith.constant 0 : i32
    return %c0_i32, %c0_i32_0 : i32, i32
  }
  func.func @transform_17(%arg0: i32) -> (i32, i32, i32) {
    %c0_i32 = arith.constant 0 : i32
    %c0_i32_0 = arith.constant 0 : i32
    %c0_i32_1 = arith.constant 0 : i32
    %c0_i32_2 = arith.constant 0 : i32
    return %c0_i32, %c0_i32_0, %c0_i32_1 : i32, i32, i32
  }
  func.func @transform_18(%arg0: i32) -> (i32, i32, i32) {
    %c0_i32 = arith.constant 0 : i32
    %c0_i32_0 = arith.constant 0 : i32
    %c0_i32_1 = arith.constant 0 : i32
    %c0_i32_2 = arith.constant 0 : i32
    return %c0_i32, %c0_i32_0, %c0_i32_1 : i32, i32, i32
  }
  func.func @transform_19(%arg0: i32) -> (i32, i32, i32) {
    %c0_i32 = arith.constant 0 : i32
    %c0_i32_0 = arith.constant 0 : i32
    %c0_i32_1 = arith.constant 0 : i32
    %c0_i32_2 = arith.constant 0 : i32
    return %c0_i32, %c0_i32_0, %c0_i32_1 : i32, i32, i32
  }
  func.func @transform_20(%arg0: i32) -> (i32, i32, i32) {
    %c0_i32 = arith.constant 0 : i32
    %c0_i32_0 = arith.constant 0 : i32
    %c0_i32_1 = arith.constant 0 : i32
    %c0_i32_2 = arith.constant 0 : i32
    return %c0_i32, %c0_i32_0, %c0_i32_1 : i32, i32, i32
  }
  func.func @transform_21(%arg0: i32) -> (i32, i32, i32) {
    %c0_i32 = arith.constant 0 : i32
    %c0_i32_0 = arith.constant 0 : i32
    %c0_i32_1 = arith.constant 0 : i32
    %c0_i32_2 = arith.constant 0 : i32
    return %c0_i32, %c0_i32_0, %c0_i32_1 : i32, i32, i32
  }
  func.func @transform_22(%arg0: i32) -> (i32, i32, i32) {
    %c0_i32 = arith.constant 0 : i32
    %c0_i32_0 = arith.constant 0 : i32
    %c0_i32_1 = arith.constant 0 : i32
    %c0_i32_2 = arith.constant 0 : i32
    return %c0_i32, %c0_i32_0, %c0_i32_1 : i32, i32, i32
  }
  func.func @transform_23(%arg0: i32) -> (i32, i32, i32) {
    %c0_i32 = arith.constant 0 : i32
    %c0_i32_0 = arith.constant 0 : i32
    %c0_i32_1 = arith.constant 0 : i32
    %c0_i32_2 = arith.constant 0 : i32
    return %c0_i32, %c0_i32_0, %c0_i32_1 : i32, i32, i32
  }
  func.func @transform_24(%arg0: i32) -> (i32, i32, i32) {
    %c0_i32 = arith.constant 0 : i32
    %c0_i32_0 = arith.constant 0 : i32
    %c0_i32_1 = arith.constant 0 : i32
    %c0_i32_2 = arith.constant 0 : i32
    return %c0_i32, %c0_i32_0, %c0_i32_1 : i32, i32, i32
  }
  func.func @transform_25(%arg0: i32) -> (i32, i32, i32) {
    %c0_i32 = arith.constant 0 : i32
    %c0_i32_0 = arith.constant 0 : i32
    %c0_i32_1 = arith.constant 0 : i32
    %c0_i32_2 = arith.constant 0 : i32
    return %c0_i32, %c0_i32_0, %c0_i32_1 : i32, i32, i32
  }
  func.func @transform_26(%arg0: i32) -> (i32, i32, i32) {
    %c0_i32 = arith.constant 0 : i32
    %c0_i32_0 = arith.constant 0 : i32
    %c0_i32_1 = arith.constant 0 : i32
    %c0_i32_2 = arith.constant 0 : i32
    return %c0_i32, %c0_i32_0, %c0_i32_1 : i32, i32, i32
  }
  func.func @transform_27(%arg0: i32) -> (i32, i32, i32) {
    %c0_i32 = arith.constant 0 : i32
    %c0_i32_0 = arith.constant 0 : i32
    %c0_i32_1 = arith.constant 0 : i32
    %c0_i32_2 = arith.constant 0 : i32
    return %c0_i32, %c0_i32_0, %c0_i32_1 : i32, i32, i32
  }
  func.func @transform_28(%arg0: i32) -> (i32, i32, i32) {
    %c0_i32 = arith.constant 0 : i32
    %c0_i32_0 = arith.constant 0 : i32
    %c0_i32_1 = arith.constant 0 : i32
    %c0_i32_2 = arith.constant 0 : i32
    return %c0_i32, %c0_i32_0, %c0_i32_1 : i32, i32, i32
  }
  func.func @transform_29(%arg0: i32) -> (i32, i32) {
    %c0_i32 = arith.constant 0 : i32
    %c0_i32_0 = arith.constant 0 : i32
    %c0_i32_1 = arith.constant 0 : i32
    return %c0_i32, %c0_i32_0 : i32, i32
  }
  func.func @transform_30(%arg0: i32) -> (i32, i32) {
    %c0_i32 = arith.constant 0 : i32
    %c0_i32_0 = arith.constant 0 : i32
    %c0_i32_1 = arith.constant 0 : i32
    return %c0_i32, %c0_i32_0 : i32, i32
  }
  func.func @transform_31(%arg0: i32) -> (i32, i32) {
    %c0_i32 = arith.constant 0 : i32
    %c0_i32_0 = arith.constant 0 : i32
    %c0_i32_1 = arith.constant 0 : i32
    return %c0_i32, %c0_i32_0 : i32, i32
  }
  func.func @transform_32(%arg0: i32) -> (i32, i32) {
    %c0_i32 = arith.constant 0 : i32
    %c0_i32_0 = arith.constant 0 : i32
    %c0_i32_1 = arith.constant 0 : i32
    return %c0_i32, %c0_i32_0 : i32, i32
  }
  func.func @transform_33(%arg0: i32) -> (i32, i32, i32) {
    %c0_i32 = arith.constant 0 : i32
    %c0_i32_0 = arith.constant 0 : i32
    %c0_i32_1 = arith.constant 0 : i32
    return %arg0, %c0_i32, %c0_i32_0 : i32, i32, i32
  }
}

</mosaic_0001>

<bundles_post_ra>
// kernel: transformer_fdm_forward.1
= control target key start
LH: loop header
LB: loop body
LE: loop exit
PB: predicated region body
PF: predicated region fallthrough
CT: control target
= control target key end

     0   :  { %s3708_s6 = smov 1   ;;  %s3709_s10 = smov 2   ;;  %s4372_s0 = inlined_call_operand.smem [shape: u32[34], index: -1, kind: input, shape index: {}] }
   0x1   :  { %s3765_s5 = sld [smem:[%s4372_s0]]   ;;  %s3710_s14 = smov 3  }
   0x2   :  { %s3770_s9 = sld [smem:[%s4372_s0 + %s3708_s6]]   ;;  %s3711_s18 = smov 4  }
   0x3   :  { %s3775_s13 = sld [smem:[%s4372_s0 + %s3709_s10]]   ;;  %s3712_s22 = smov 5  }
   0x4   :  { %s3780_s17 = sld [smem:[%s4372_s0 + %s3710_s14]]   ;;  %s3713_s26 = smov 6  }
   0x5   :  { %s3785_s21 = sld [smem:[%s4372_s0 + %s3711_s18]]   ;;  %s3714_s30 = smov 7  }
   0x6   :  { %s3790_s25 = sld [smem:[%s4372_s0 + %s3712_s22]]   ;;  %s3715_s4 = smov 8  }
   0x7   :  { %4432 = sst [smem:[#allocation5_spill]] %s3765_s5  ;;  %s3716_s10 = smov 9  }
   0x8   :  { %4433 = sst [smem:[#allocation6_spill]] %s3770_s9  ;;  %s3717_s15 = smov 10  }
   0x9   :  { %4434 = sst [smem:[#allocation7_spill]] %s3775_s13  ;;  %s3718_s20 = smov 11  }
   0xa   :  { %4435 = sst [smem:[#allocation8_spill]] %s3780_s17  ;;  %s3720_s1 = smov 13  }
   0xb   :  { %4436 = sst [smem:[#allocation9_spill]] %s3785_s21  ;;  %s3721_s7 = smov 14  }
   0xc   :  { %4437 = sst [smem:[#allocation10_spill]] %s3790_s25  ;;  %s3723_s22 = smov 16  }
   0xd   :  { %s3795_s29 = sld [smem:[%s4372_s0 + %s3713_s26]]   ;;  %s3719_s26 = smov 12  }
   0xe   :  { %s3800_s3 = sld [smem:[%s4372_s0 + %s3714_s30]]   ;;  %s3724_s28 = smov 17  }
   0xf   :  { %s3805_s8 = sld [smem:[%s4372_s0 + %s3715_s4]]  }
  0x10   :  { %s3810_s14 = sld [smem:[%s4372_s0 + %s3716_s10]]  }
  0x11   :  { %s3815_s19 = sld [smem:[%s4372_s0 + %s3717_s15]]   ;;  %s3722_s15 = smov 15  }
  0x12   :  { %s3820_s24 = sld [smem:[%s4372_s0 + %s3718_s20]]  }
  0x13   :  { %4438 = sst [smem:[#allocation11_spill]] %s3795_s29 }
  0x14   :  { %4439 = sst [smem:[#allocation12_spill]] %s3800_s3 }
  0x15   :  { %s3825_s30 = sld [smem:[%s4372_s0 + %s3719_s26]]  }
  0x16   :  { %4440 = sst [smem:[#allocation13_spill]] %s3810_s14 }
  0x17   :  { %4441 = sst [smem:[#allocation14_spill]] %s3815_s19 }
  0x18   :  { %4442 = sst [smem:[#allocation15_spill]] %s3820_s24 }
  0x19   :  { %s3830_s6 = sld [smem:[%s4372_s0 + %s3720_s1]]  }
  0x1a   :  { %s3835_s12 = sld [smem:[%s4372_s0 + %s3721_s7]]   ;;  %s3725_s7 = smov 18  }
  0x1b   :  { %4443 = sst [smem:[#allocation16_spill]] %s3825_s30 }
  0x1c   :  { %s3840_s20 = sld [smem:[%s4372_s0 + %s3722_s15]]   ;;  %s3726_s15 = smov 19  }
  0x1d   :  { %s3845_s27 = sld [smem:[%s4372_s0 + %s3723_s22]]   ;;  %s3727_s22 = smov 20  }
  0x1e   :  { %s3850_s4 = sld [smem:[%s4372_s0 + %s3724_s28]]   ;;  %s3728_s28 = smov 21  }
  0x1f   :  { %4444 = sst [smem:[#allocation17_spill]] %s3830_s6 }
  0x20   :  { %4445 = sst [smem:[#allocation18_spill]] %s3835_s12 }
  0x21   :  { %s3855_s24 = sld [smem:[%s4372_s0 + %s3725_s7]]   ;;  %s3729_s7 = smov 22  }
  0x22   :  { %4446 = sst [smem:[#allocation19_spill]] %s3840_s20 }
  0x23   :  { %4447 = sst [smem:[#allocation20_spill]] %s3845_s27 }
  0x24   :  { %4448 = sst [smem:[#allocation21_spill]] %s3850_s4 }
  0x25   :  { %s3860_s19 = sld [smem:[%s4372_s0 + %s3726_s15]]   ;;  %s3730_s15 = smov 23  }
  0x26   :  { %s3865_s14 = sld [smem:[%s4372_s0 + %s3727_s22]]   ;;  %s3731_s22 = smov 24  }
  0x27   :  { %4449 = sst [smem:[#allocation22_spill]] %s3855_s24 }
  0x28   :  { %s3870_s4 = sld [smem:[%s4372_s0 + %s3728_s28]]   ;;  %s3732_s28 = smov 25  }
  0x29   :  { %s3875_s24 = sld [smem:[%s4372_s0 + %s3729_s7]]   ;;  %s3733_s7 = smov 26  }
  0x2b   :  { %4450 = sst [smem:[#allocation23_spill]] %s3860_s19 }
  0x2c   :  { %4451 = sst [smem:[#allocation24_spill]] %s3865_s14 }
  0x2d   :  { %s3880_s19 = sld [smem:[%s4372_s0 + %s3730_s15]]   ;;  %s3734_s15 = smov 27  }
  0x2e   :  { %4452 = sst [smem:[#allocation25_spill]] %s3870_s4 }
  0x2f   :  { %4453 = sst [smem:[#allocation26_spill]] %s3875_s24 }
  0x30   :  { %s3885_s14 = sld [smem:[%s4372_s0 + %s3731_s22]]   ;;  %s3735_s22 = smov 28  }
  0x31   :  { %s3890_s4 = sld [smem:[%s4372_s0 + %s3732_s28]]   ;;  %s3736_s28 = smov 29  }
  0x32   :  { %s3895_s24 = sld [smem:[%s4372_s0 + %s3733_s7]]   ;;  %s3737_s7 = smov 30  }
  0x33   :  { %4454 = sst [smem:[#allocation27_spill]] %s3880_s19 }
  0x34   :  { %s3900_s19 = sld [smem:[%s4372_s0 + %s3734_s15]]   ;;  %s3738_s15 = smov 31  }
  0x36   :  { %4455 = sst [smem:[#allocation28_spill]] %s3885_s14 }
  0x37   :  { %4456 = sst [smem:[#allocation29_spill]] %s3890_s4 }
  0x38   :  { %4457 = sst [smem:[#allocation30_spill]] %s3895_s24 }
  0x39   :  { %s3905_s14 = sld [smem:[%s4372_s0 + %s3735_s22]]   ;;  %s3739_s22 = smov 32  }
  0x3a   :  { %4458 = sst [smem:[#allocation31_spill]] %s3900_s19 }
  0x3b   :  { %s3910_s4 = sld [smem:[%s4372_s0 + %s3736_s28]]   ;;  %s3740_s28 = smov 33  }
  0x3c   :  { %s3915_s24 = sld [smem:[%s4372_s0 + %s3737_s7]]  }
  0x3d   :  { %s3920_s19 = sld [smem:[%s4372_s0 + %s3738_s15]]  }
  0x3f   :  { %4459 = sst [smem:[#allocation32_spill]] %s3905_s14 }
  0x40   :  { %s3925_s14 = sld [smem:[%s4372_s0 + %s3739_s22]]  }
  0x41   :  { %4460 = sst [smem:[#allocation33_spill]] %s3910_s4 }
  0x42   :  { %s3930_s4 = sld [smem:[%s4372_s0 + %s3740_s28]]  }
  0x46   :  { %4461 = sst [smem:[#allocation34_spill]] %s3925_s14 }
  0x48   :  { %4462 = sst [smem:[#allocation35_spill]] %s3930_s4 }
  0x49   :  { %72 = vsyncpa [#allocation3], 0 }
  0x4a   :  { %74 = vsyncpa [#allocation3 + $0x1], 0  ;;  %s3932_s7 = smov 0   ;;  %s3934_s10 = smov 0  }
  0x4b   :  { %s3936_s11 = smov 0   ;;  %s3938_s15 = smov 0  }
  0x4c LB: > { %s4463_s29 = sld [smem:[#allocation11_spill]]  ;;  %s3953_s0 = sadd.s32 4294967295, %s3706_s15   ;;  %s3702_s11 = sphi %s3936_s11, %s4528_s11   ;;  %s3698_s10 = sphi %s3934_s10, %s4530_s10   ;;  %s3694_s7 = sphi %s3932_s7, %s4529_s7   ;;  %s3706_s15 = sphi %s3938_s15, %s4526_s15  }
  0x4d   : > { %s4464_s25 = sld [smem:[#allocation10_spill]]  ;;  %s3149_s16 = sadd.s32 4294967294, %s3706_s15  }
  0x4e   : > { %s4465_s30 = sld [smem:[#allocation16_spill]]  ;;  %s3957_s18 = sadd.s32 1, %s3706_s15  }
  0x4f   : > { %s4466_s20 = sld [smem:[#allocation19_spill]]  ;;  %s795_s22 = sadd.s32 1, %s3702_s11 }
  0x50   : > { %s4467_s6 = sld [smem:[#allocation17_spill]]  ;;  %s792_s23 = ssub.s32 %s3706_s15, %s3957_s18 }
  0x51   : > { %s4468_s17 = sld [smem:[#allocation8_spill]]  ;;  %p805_p0 = scmp.ne.s32.totalorder %s3702_s11, %s3698_s10 }
  0x52   : > { %s4469_s3 = sld [smem:[#allocation12_spill]]  ;;  %p793_p1 = scmp.eq.s32.totalorder %s792_s23, 0 }
  0x53   : > { %4470 = sst [smem:[#allocation36_spill]] %s3694_s7  ;;  %p806_p2 = scmp.eq.s32.totalorder %s3953_s0, 1 }
  0x54   : > { %4471 = sst [smem:[#allocation37_spill]] %s3702_s11  ;;  %p811_p3 = scmp.ne.s32.totalorder %s3698_s10, %s3694_s7 }
  0x55   : > { %4472 = sst [smem:[#allocation38_spill]] %s3706_s15  ;;  %p812_p4 = scmp.eq.s32.totalorder %s3149_s16, 1 }
  0x56   : > { %4473 = sst [smem:[#allocation39_spill]] %s3953_s0  ;;  %p3970_p5 = por %p806_p2, %p805_p0 }
  0x57   : > { %4474 = sst [smem:[#allocation40_spill]] %s3957_s18  ;;  %p3974_p6 = por %p812_p4, %p811_p3 }
  0x58   : > { %s3968_s26 = scalar_select %p793_p1, %s3702_s11, %s795_s22  }
  0x59   : > { %s4476_s28 = scalar_select %p3970_p5, 1, 0 }
  0x5a   : > { %4475 = sst [smem:[#allocation41_spill]] %s3968_s26  ;;  %p3152_p7 = scmp.ge.s32.totalorder %s3706_s15, 1 }
  0x5b   : > { %4477 = sst [smem:[#allocation42_spill]] %s4476_s28  ;;  %p941_p8 = scmp.lt.s32.totalorder %s3706_s15, 3 }
  0x5c   : > { %s4478_s1 = scalar_select %p3974_p6, 1, 0 }
  0x5d   : > { %p942_p9 = pnand %p3152_p7, %p941_p8 }
  0x5e   : > { %4479 = sst [smem:[#allocation43_spill]] %s4478_s1  ;;  %p1032_p10 = scmp.lt.s32.totalorder (!%p942_p9), %s3953_s0, 1 }
  0x5f   : > { %945 = sbr.rel (%p942_p9) target bundleno = 7013 (0x1b65), region = 152  ;;  %s4480_s5 = sld [smem:[#allocation5_spill]] (!%p942_p9) }
  0x60   : > { %s4481_s9 = sld [smem:[#allocation6_spill]] (!%p942_p9)  ;;  %s4512_s15 = smov (!%p942_p9), 104  }
  0x61   : > { %s4482_s21 = sld [smem:[#allocation9_spill]] (!%p942_p9)  ;;  %s4513_s4 = smov (!%p942_p9), 96  }
  0x62   : > { %s4483_s13 = sld [smem:[#allocation7_spill]] (!%p942_p9) }
  0x63   : > { %s4484_s27 = sld [smem:[#allocation20_spill]] (!%p942_p9) }
  0x64   : > { %v1050_v0 = vld [vmem:[%s4468_s17 + $0x8] sm:$0x1]  ;;  %vm1069_vm0 = vcmask 1040384   ;;  %s1033_s2 = scalar_select %p1032_p10, %s3953_s0, 1  ;;  %v3408_v3 = vld [vmem:[%s4469_s3] sm:$0xff]  ;;  %vm1065_vm1 = vcmask 146432  }
  0x65   : > { %v1061_v1 = vunpack.c.l.b16 %v1050_v0  ;;  %v3409_v2 = vld [vmem:[%s4469_s3 + $0x8] sm:$0xff]  ;;  %v3407_v6 = vld [vmem:[%s4468_s17] sm:$0xff]  ;;  %vm1106_vm2 = vcmask 261120   ;;  %s4413_s3 = smov 112   ;;  %s3748_s17 = smov 32   ;;  %vm1287_vm4 = vcmask 64512  }
  0x66   : > { %1116 = vmatpush.bf16.msra.mxu1 %v3409_v2  ;;  %s3985_s16 = sshll.u32 %s1033_s2, 3  ;;  %v3417_v11 = vld [vmem:[%s4464_s25 + $0x8] sm:$0xff]  ;;  %v3416_v12 = vld [vmem:[%s4464_s25] sm:$0xff]  ;;  %s4389_s2 = smov 120   ;;  %vm1328_vm5 = vcmask 1043456   ;;  %vm1529_vm6 = vcmask 130048  }
  0x67   : > { %v1063_v4 = vpack.c.b16 %v1061_v1, %v1061_v1  ;;  %s1035_s22 = scalar_lea.vmem %s4480_s5, %s3985_s16  ;;  %s1039_s23 = scalar_lea.vmem %s4481_s9, %s3985_s16  ;;  %v3534_v13 = vld [vmem:[%s4482_s21] ss:$0 sm:$0xff]  ;;  %v3411_v32 = vld [vmem:[%s4465_s30 + $0x8] sm:$0xff]  ;;  %vm1531_vm7 = vcmask 195584   ;;  %vm2037_vm15 = vcmask 523264  }
  0x68   : > { %v1047_v7 = vld [vmem:[%s1035_s22] sm:$0xff]  ;;  %s4391_s22 = smov 88   ;;  %s4394_s5 = smov 80   ;;  %1145 = vmatpush.bf16.msra.mxu2 %v3411_v32  ;;  %v3415_v34 = vld [vmem:[%s4466_s20 + $0x8] sm:$0xff] }
  0x69   : > { %v1071_v5 = vsel %vm1069_vm0, %v1063_v4, 0  ;;  %v1045_v8 = vld [vmem:[%s1039_s23] sm:$0xff]  ;;  %v1051_v10 = vpack.c.bf16 %v1047_v7, %v1047_v7  ;;  %s4399_s23 = smov 96   ;;  %s1043_s9 = scalar_lea.vmem %s4483_s13, %s3985_s16  ;;  %v3413_v7 = vld [vmem:[%s4467_s6 + $0x8] sm:$0xff] }
  0x6a   : > { %1079 = vmatpush.bf16.msra.mxu0 %v1071_v5  ;;  %1117 = vmatpush.bf16.msra.mxu1 %v3408_v3  ;;  %v1093_v9 = vpack.c.bf16 %v1045_v8, %v1045_v8  ;;  %v3535_v22 = vld [vmem:[%s4463_s29] ss:$0 sm:$0xff]  ;;  %s4397_s16 = smov 48   ;;  %s4485_s12 = sld [smem:[#allocation18_spill]] }
  0x6b   : > { %v1046_v31 = vld [vmem:[%s1043_s9] sm:$0xff]  ;;  %1190 = vmatpush.bf16.msra.mxu3 %v3413_v7  ;;  %s4403_s9 = smov 64   ;;  %s4496_s13 = smov 24  }
  0x6c   : > { %v3410_v33 = vld [vmem:[%s4465_s30] sm:$0xff]  ;;  %s4498_s21 = sld [smem:[#allocation25_spill]]  ;;  %s4515_s0 = smov 56  }
  0x6d   : > { %3170 = vmatmul.msk.bf16.vlgmr.msra.gmra.mxu1 %vm1106_vm2, %v1093_v9  ;;  %1146 = vmatpush.bf16.msra.mxu2 %v3410_v33  ;;  %v3414_v35 = vld [vmem:[%s4466_s20] sm:$0xff]  ;;  %s4497_s20 = sld [smem:[#allocation23_spill]] }
  0x6e   : > { %1080 = vmatpush.bf16.msra.mxu0 %v3407_v6  ;;  %1267 = vmatpush.bf16.msrb.mxu1 %v3417_v11  ;;  %v3412_v8 = vld [vmem:[%s4467_s6] sm:$0xff]  ;;  %s4494_s6 = smov 16   ;;  %s4500_s30 = sld [smem:[#allocation29_spill]] }
  0x6f   : > { %1191 = vmatpush.bf16.msra.mxu3 %v3412_v8  ;;  %s4501_s26 = sld [smem:[#allocation30_spill]] }
  0x70   : > { %3179 = vmatmul.msk.bf16.vlgmr.msra.gmra.mxu2 %vm1106_vm2, %v1093_v9  ;;  %s4502_s11 = sld [smem:[#allocation24_spill]] }
  0x71   : > { %3161 = vmatmul.msk.bf16.vlgmr.msra.gmra.mxu0 %vm1065_vm1, %v1051_v10  ;;  %s4504_s1 = sld [smem:[#allocation26_spill]] }
  0x72   : > { %1268 = vmatpush.bf16.msrb.mxu1 %v3416_v12  ;;  %1230 = vmatpush.bf16.msrb.mxu0 %v3415_v34  ;;  %s4507_s7 = sld [smem:[#allocation32_spill]] }
  0x76   : > { %1231 = vmatpush.bf16.msrb.mxu0 %v3414_v35  ;;  %s4503_s18 = smov %s4502_s11 }
  0x78   : > { %s4508_s14 = smov %s4507_s7 }
  0xea   : > { %v3996_v14 = vpop.f32.mrf.mxu1 }
  0xee   : > { %v1082_v15 = vpop.f32.mrf.mxu0 }
  0xef   : > { %v3998_v16 = vadd.f32 %v3534_v13, %v1082_v15 }
  0xf1   : > { %vm1086_vm3 = vcmp.ge.f32.partialorder %v3998_v16, 0.0  ;;  %v1087_v17 = vmul.f32 0.2, %v3998_v16  ;;  %v1201_v30 = vpack.c.bf16 %v3998_v16, %v3998_v16 }
  0xf2   : > { %v1121_v19 = vpop.f32.mrf.mxu1 }
  0xf3   : > { %v4003_v18 = vsel %vm1086_vm3, %v3998_v16, %v1087_v17  ;;  %v4039_v48 = vpop.f32.mrf.mxu2 }
  0xf4   : > { %v1241_v20 = vpack.c.bf16 %v4003_v18, %v4003_v18 }
  0xf6   : > { %v1084_v21 = vpop.f32.mrf.mxu0  ;;  %3206 = vmatmul.msk.bf16.vlgmr.msrb.gmra.mxu1 %vm1106_vm2, %v1241_v20 }
  0xfb   : > { %v1150_v49 = vpop.f32.mrf.mxu2 }
  0xfc   : > { %v3536_v49 = vld [vmem:[%s4484_s27] ss:$0 sm:$0xff]  ;;  %s4499_s27 = smov 64  }
 0x173   : > { %v1270_v23 = vpop.f32.mrf.mxu1 }
 0x174   : > { %v4009_v24 = vadd.f32 %v3535_v22, %v1270_v23 }
 0x176   : > { %v1274_v25 = vadd.f32 %v4009_v24, %v3996_v14 }
 0x178   : > { %v1280_v26 = vpack.c.bf16 %v1274_v25, %v1274_v25 }
 0x17a   : > { %v1283_v27 = vunpack.c.l.b16 %v1280_v26 }
 0x17b   : > { %v1272_v28 = vpop.f32.mrf.mxu1 }
 0x17c   : > { %v1284_v29 = vpack.c.b16 %v1283_v27, %v1283_v27  ;;  %v1281_v27 = vpack.c.bf16 %v4009_v24, %v4009_v24 }
 0x17e   : > { %1345 = vrot.lane.b32.xlu2 %v1284_v29, %s4389_s2  ;;  %1347 = vrot.lane.b32.xlu1 %v1284_v29, %s4391_s22  ;;  %s4411_s2 = smov 104   ;;  %s4401_s22 = smov 72  }
 0x17f   : > { %1285 = vrot.lane.b32.xlu0 %v1284_v29, %s4399_s23 }
 0x186   : > { %1402 = vrot.lane.b32.xlu2 %v1284_v29, %s4413_s3  ;;  %1404 = vrot.lane.b32.xlu1 %v1284_v29, %s4394_s5  ;;  %s4396_s5 = smov 40  }
 0x187   : > { %1207 = vrot.lane.b32.xlu0 %v1201_v30, %s4399_s23 }
 0x18e   : > { %1459 = vrot.lane.b32.xlu1 %v1284_v29, %s4411_s2 }
 0x18f   : > { %1461 = vrot.lane.b32.xlu0 %v1284_v29, %s4401_s22  ;;  %v1321_v29 = vunpack.c.l.b16 %v1281_v27  ;;  %s4487_s22 = sld [smem:[#allocation14_spill]] }
 0x197   : > { %1153 = vrot.lane.b32.xlu0 %v1046_v31, %s3748_s17  ;;  %v1322_v31 = vpack.c.b16 %v1321_v29, %v1321_v29  ;;  %s4398_s17 = smov 56  }
 0x1d8   : > { %v1346_v43 = vpop.permute.xlu2 %1345 }
 0x1e0   : > { %v1403_v46 = vpop.permute.xlu2 %1402 }
 0x1f0   : > { %v1348_v36 = vpop.permute.xlu1 %1347 }
 0x1f1   : > { %v1353_v37 = vsel %vm1287_vm4, %v1348_v36, 0  ;;  %v1286_v38 = vpop.permute.xlu0 %1285 }
 0x1f2   : > { %v1292_v39 = vsel %vm1287_vm4, %v1286_v38, 0  ;;  %1362 = vmatpush.bf16.xpose.msra.mxu0 %v1353_v37 }
 0x1f3   : > { %1301 = vmatpush.bf16.xpose.msrb.mxu2 %v1292_v39 }
 0x1f8   : > { %v1405_v40 = vpop.permute.xlu1 %1404 }
 0x1f9   : > { %v1410_v41 = vsel %vm1287_vm4, %v1405_v40, 0  ;;  %v1208_v42 = vpop.permute.xlu0 %1207 }
 0x1fa   : > { %3197 = vmatmul.msk.bf16.vlgmr.msrb.gmra.mxu0 %vm1106_vm2, %v1208_v42  ;;  %3207 = vmatmul.msk.bf16.vlgmr.msrb.gmra.mxu2 %vm1287_vm4, %v1280_v26 }
 0x1fb   : > { %1419 = vmatpush.bf16.xpose.msra.mxu2 %v1410_v41 }
 0x200   : > { %v1460_v47 = vpop.permute.xlu1 %1459 }
 0x201   : > { %v1462_v44 = vpop.permute.xlu0 %1461 }
 0x202   : > { %v1467_v45 = vsel %vm1287_vm4, %v1462_v44, 0 }
 0x203   : > { %1476 = vmatpush.bf16.xpose.msrb.mxu0 %v1467_v45 }
 0x209   : > { %v1154_v4 = vpop.permute.xlu0 %1153 }
 0x20a   : > { %3209 = vmatmul.msk.bf16.vlgmr.msra.gmra.mxu0 %vm1287_vm4, %v1346_v43  ;;  %3211 = vmatmul.msk.bf16.vlgmr.msra.gmra.mxu2 %vm1287_vm4, %v1403_v46  ;;  %v1156_v5 = vadd.f32 %v1154_v4, %v3998_v16 }
 0x20c   : > { %v1161_v6 = vpack.c.bf16 %v1156_v5, %v1156_v5 }
 0x21a   : > { %3213 = vmatmul.msk.bf16.vlgmr.msrb.gmra.mxu0 %vm1287_vm4, %v1460_v47 }
 0x277   : > { %v4041_v50 = vpop.f32.mrf.mxu0 }
 0x27d   : > { %v1303_v51 = vpop.f32.mrf.mxu2 }
 0x27e   : > { %v1307_v52 = vmul.f32 0.35355338, %v1303_v51  ;;  %v3537_v51 = vld [vmem:[%s4485_s12] ss:$0 sm:$0xff]  ;;  %s4495_s12 = sld [smem:[#allocation22_spill]] }
 0x27f   : > { %v1235_v53 = vpop.f32.mrf.mxu0 }
 0x280   : > { %v1308_v54 = vsel %vm1287_vm4, %v1307_v52, -inf }
 0x281   : > { %1309 = vmax.xlane.f32.xlu2 %v1308_v54 }
 0x285   : > { %v1305_v55 = vpop.f32.mrf.mxu2 }
 0x287   : > { %v1364_v56 = vpop.f32.mrf.mxu0 }
 0x288   : > { %v1368_v57 = vmul.f32 0.35355338, %v1364_v56  ;;  %v1234_v56 = vadd.f32 %v3536_v49, %v4041_v50 }
 0x28a   : > { %v1369_v58 = vsel %vm1287_vm4, %v1368_v57, -inf }
 0x28b   : > { %1370 = vmax.xlane.f32.xlu1 %v1369_v58 }
 0x28d   : > { %v1421_v59 = vpop.f32.mrf.mxu2 }
 0x28e   : > { %v1425_v60 = vmul.f32 0.35355338, %v1421_v59 }
 0x28f   : > { %v1366_v61 = vpop.f32.mrf.mxu0 }
 0x290   : > { %v1426_v62 = vsel %vm1287_vm4, %v1425_v60, -inf }
 0x291   : > { %1427 = vmax.xlane.f32.xlu0 %v1426_v62 }
 0x295   : > { %v1423_v63 = vpop.f32.mrf.mxu2 }
 0x297   : > { %v1478_v0 = vpop.f32.mrf.mxu0 }
 0x298   : > { %v1482_v1 = vmul.f32 0.35355338, %v1478_v0 }
 0x29a   : > { %v1483_v2 = vsel %vm1287_vm4, %v1482_v1, -inf }
 0x29b   : > { %1484 = vmax.xlane.f32.xlu2 %v1483_v2 }
 0x29f   : > { %v1480_v3 = vpop.f32.mrf.mxu0 }
 0x2b3   : > { %1167 = vrot.lane.b32.xlu2 %v1161_v6, %s4399_s23  ;;  %s4486_s23 = sld [smem:[#allocation13_spill]] }
 0x2f4   : > { %v1310_v9 = vpop.xlane.xlu2 %1309 }
 0x2f5   : > { %v1311_v10 = vsub.f32 %v1307_v52, %v1310_v9 }
 0x2f7   : > { %v1312_v11 = vmul.f32 1.442695, %v1311_v10 }
 0x2f9   : > { %3564 = vpow2.f32 %v1312_v11 }
 0x2fe   : > { %v1371_v12 = vpop.xlane.xlu1 %1370 }
 0x2ff   : > { %v3565_v13 = vpop.eup %3564  ;;  %v1372_v15 = vsub.f32 %v1368_v57, %v1371_v12 }
 0x300   : > { %v1314_v17 = vsel %vm1287_vm4, %v3565_v13, 0.0 }
 0x301   : > { %v1373_v19 = vmul.f32 1.442695, %v1372_v15  ;;  %1315 = vadd.xlane.f32.xlu1 %v1314_v17  ;;  %v3419_v15 = vld [vmem:[%s3805_s8 + $0x8] sm:$0xff]  ;;  %v3418_v17 = vld [vmem:[%s3805_s8] sm:$0xff] }
 0x302   : > { %1558 = vmatpush.bf16.msrb.mxu2 %v3419_v15 }
 0x303   : > { %3566 = vpow2.f32 %v1373_v19 }
 0x304   : > { %v1428_v16 = vpop.xlane.xlu0 %1427 }
 0x305   : > { %v1429_v20 = vsub.f32 %v1425_v60, %v1428_v16  ;;  %v4072_v60 = vpack.c.bf16 %v1234_v56, %v1234_v56 }
 0x306   : > { %1559 = vmatpush.bf16.msrb.mxu2 %v3418_v17 }
 0x307   : > { %v1430_v21 = vmul.f32 1.442695, %v1429_v20  ;;  %v1687_v50 = vsel %vm1328_vm5, %v4072_v60, 0 }
 0x309   : > { %v3567_v22 = vpop.eup %3566  ;;  %3568 = vpow2.f32 %v1430_v21 }
 0x30a   : > { %v1375_v23 = vsel %vm1287_vm4, %v3567_v22, 0.0 }
 0x30b   : > { %1376 = vadd.xlane.f32.xlu0 %v1375_v23 }
 0x30e   : > { %v1485_v25 = vpop.xlane.xlu2 %1484 }
 0x30f   : > { %v3569_v26 = vpop.eup %3568  ;;  %v1486_v24 = vsub.f32 %v1482_v1, %v1485_v25 }
 0x310   : > { %v1432_v28 = vsel %vm1287_vm4, %v3569_v26, 0.0 }
 0x311   : > { %1433 = vadd.xlane.f32.xlu2 %v1432_v28  ;;  %v1487_v32 = vmul.f32 1.442695, %v1486_v24  ;;  %v3756_v24 = vmov 32.0  }
 0x313   : > { %3570 = vpow2.f32 %v1487_v32 }
 0x316   : > { %v1168_v30 = vpop.permute.xlu2 %1167 }
 0x317   : > { %3188 = vmatmul.msk.bf16.vlgmr.msra.gmra.mxu3 %vm1106_vm2, %v1168_v30 }
 0x319   : > { %v3571_v33 = vpop.eup %3570 }
 0x31a   : > { %1323 = vrot.lane.b32.xlu1 %v1322_v31, %s4403_s9  ;;  %v1489_v34 = vsel %vm1287_vm4, %v3571_v33, 0.0  ;;  %s4488_s9 = smov 120  }
 0x31f   : > { %1381 = vrot.lane.b32.xlu0 %v1322_v31, %s4398_s17  ;;  %s4405_s17 = smov 24  }
 0x327   : > { %1438 = vrot.lane.b32.xlu0 %v1322_v31, %s4397_s16  ;;  %s4407_s16 = smov 16  }
 0x32f   : > { %1495 = vrot.lane.b32.xlu0 %v1322_v31, %s4396_s5  ;;  %s4409_s5 = smov 8  }
 0x344   : > { %1490 = vadd.xlane.f32.xlu1 %v1489_v34 }
 0x374   : > { %v1316_v35 = vpop.xlane.xlu1 %1315 }
 0x375   : > { %3572 = vrcp.f32 %v1316_v35 }
 0x37b   : > { %v3573_v37 = vpop.eup %3572 }
 0x37c   : > { %v1318_v38 = vmul.f32 %v3573_v37, %v3565_v13 }
 0x37e   : > { %v1377_v36 = vpop.xlane.xlu0 %1376  ;;  %v1319_v43 = vpack.c.bf16 %v1318_v38, %v1318_v38 }
 0x37f   : > { %3574 = vrcp.f32 %v1377_v36 }
 0x384   : > { %v1434_v42 = vpop.xlane.xlu2 %1433 }
 0x385   : > { %v3575_v40 = vpop.eup %3574  ;;  %3576 = vrcp.f32 %v1434_v42 }
 0x386   : > { %v1379_v44 = vmul.f32 %v3575_v40, %v3567_v22 }
 0x388   : > { %v1380_v47 = vpack.c.bf16 %v1379_v44, %v1379_v44  ;;  %v3421_v44 = vld [vmem:[%s4487_s22 + $0x8] sm:$0xff] }
 0x38b   : > { %v3577_v52 = vpop.eup %3576 }
 0x38c   : > { %v1324_v39 = vpop.permute.xlu1 %1323  ;;  %v1436_v57 = vmul.f32 %v3577_v52, %v3569_v26  ;;  %v3538_v26 = vld [vmem:[%s4486_s23] ss:$0 sm:$0xff] }
 0x38d   : > { %v1330_v41 = vsel %vm1328_vm5, %v1324_v39, 0 }
 0x38e   : > { %1339 = vmatpush.bf16.msrb.mxu3 %v1330_v41  ;;  %v1437_v61 = vpack.c.bf16 %v1436_v57, %v1436_v57 }
 0x391   : > { %3208 = vmatmul.msk.bf16.vlgmr.msrb.gmra.mxu3 %vm1287_vm4, %v1319_v43  ;;  %v1382_v45 = vpop.permute.xlu0 %1381 }
 0x392   : > { %v1387_v46 = vsel %vm1328_vm5, %v1382_v45, 0  ;;  %v3420_v45 = vld [vmem:[%s4487_s22] sm:$0xff] }
 0x393   : > { %1396 = vmatpush.bf16.msra.mxu1 %v1387_v46 }
 0x396   : > { %3210 = vmatmul.msk.bf16.vlgmr.msra.gmra.mxu1 %vm1287_vm4, %v1380_v47 }
 0x399   : > { %v1439_v53 = vpop.permute.xlu0 %1438 }
 0x39a   : > { %v1444_v54 = vsel %vm1328_vm5, %v1439_v53, 0  ;;  %v1193_v55 = vpop.f32.mrf.mxu3 }
 0x39b   : > { %v1194_v58 = vadd.f32 %v3537_v51, %v1193_v55  ;;  %1453 = vmatpush.bf16.msra.mxu3 %v1444_v54 }
 0x39d   : > { %v4070_v59 = vpack.c.bf16 %v1194_v58, %v1194_v58 }
 0x39f   : > { %v1655_v62 = vsel %vm1287_vm4, %v4070_v59, 0  ;;  %v1708_v42 = vunpack.c.l.b16 %v4070_v59  ;;  %1635 = vmatpush.bf16.msrb.mxu3 %v3421_v44 }
 0x3a0   : > { %1664 = vmatpush.bf16.xpose.msra.mxu0 %v1655_v62 }
 0x3a1   : > { %3212 = vmatmul.msk.bf16.vlgmr.msra.gmra.mxu3 %vm1287_vm4, %v1437_v61  ;;  %v1496_v63 = vpop.permute.xlu0 %1495  ;;  %v4098_v43 = vpack.c.b16 %v1708_v42, %v1708_v42 }
 0x3a2   : > { %v1501_v0 = vsel %vm1328_vm5, %v1496_v63, 0  ;;  %v1195_v1 = vpop.f32.mrf.mxu3 }
 0x3a3   : > { %1510 = vmatpush.bf16.msrb.mxu1 %v1501_v0  ;;  %1636 = vmatpush.bf16.msrb.mxu3 %v3420_v45 }
 0x3a7   : > { %1696 = vmatpush.bf16.msra.mxu1 %v1687_v50 }
 0x3b7   : > { %v1491_v2 = vpop.xlane.xlu1 %1490 }
 0x3b8   : > { %3578 = vrcp.f32 %v1491_v2 }
 0x3b9   : > { %3580 = vrcp.f32 %v3756_v24 }
 0x3be   : > { %v3579_v3 = vpop.eup %3578 }
 0x3bf   : > { %v1493_v4 = vmul.f32 %v3579_v3, %v3571_v33  ;;  %v3581_v32 = vpop.eup %3580 }
 0x3c0   : > { %v1572_v33 = vmul.f32 32.0, %v3581_v32  ;;  %vm1576_vm8 = vweird.f32 %v3581_v32 }
 0x3c1   : > { %v1494_v5 = vpack.c.bf16 %v1493_v4, %v1493_v4 }
 0x3c2   : > { %v1573_v34 = vsub.f32 1.0, %v1572_v33 }
 0x3c3   : > { %3214 = vmatmul.msk.bf16.vlgmr.msrb.gmra.mxu1 %vm1287_vm4, %v1494_v5 }
 0x3c4   : > { %v1574_v35 = vmul.f32 %v3581_v32, %v1573_v34 }
 0x3c6   : > { %v1575_v36 = vadd.f32 %v3581_v32, %v1574_v35 }
 0x3c8   : > { %v4093_v37 = vsel %vm1576_vm8, %v3581_v32, %v1575_v36 }
 0x413   : > { %v1398_v6 = vpop.f32.mrf.mxu1 }
 0x414   : > { %v1341_v7 = vpop.f32.mrf.mxu3  ;;  %1517 = vrot.lane.b32.xlu0 %v1398_v6, %s4409_s5  ;;  %s4491_s5 = sld [smem:[#allocation15_spill]] }
 0x41a   : > { %v3541_v4 = vld [vmem:[%s4491_s5] ss:$0 sm:$0xff] }
 0x41b   : > { %v1400_v8 = vpop.f32.mrf.mxu1 }
 0x41c   : > { %v1343_v9 = vpop.f32.mrf.mxu3 }
 0x424   : > { %v1455_v10 = vpop.f32.mrf.mxu3 }
 0x425   : > { %1521 = vrot.lane.b32.xlu0 %v1455_v10, %s4407_s16  ;;  %s4490_s16 = sld [smem:[#allocation28_spill]] }
 0x42b   : > { %v3540_v59 = vld [vmem:[%s4490_s16] ss:$0 sm:$0xff] }
 0x42c   : > { %v1457_v11 = vpop.f32.mrf.mxu3 }
 0x440   : > { %v1512_v12 = vpop.f32.mrf.mxu1 }
 0x441   : > { %1525 = vrot.lane.b32.xlu2 %v1512_v12, %s4405_s17  ;;  %s4489_s17 = sld [smem:[#allocation27_spill]] }
 0x447   : > { %v3539_v57 = vld [vmem:[%s4489_s17] ss:$0 sm:$0xff] }
 0x448   : > { %v1514_v13 = vpop.f32.mrf.mxu1 }
 0x486   : > { %v1518_v19 = vpop.permute.xlu0 %1517 }
 0x487   : > { %v1528_v20 = vsel %vm1287_vm4, %v1341_v7, %v1518_v19 }
 0x497   : > { %v1522_v16 = vpop.permute.xlu0 %1521 }
 0x498   : > { %v1530_v21 = vsel %vm1529_vm6, %v1528_v20, %v1522_v16 }
 0x49b   : > { %v1526_v22 = vpop.permute.xlu2 %1525 }
 0x49c   : > { %v1532_v23 = vsel %vm1531_vm7, %v1530_v21, %v1526_v22 }
 0x49d   : > { %v1533_v25 = vpack.c.bf16 %v1532_v23, %v1532_v23 }
 0x49f   : > { %3223 = vmatmul.msk.bf16.vlgmr.msrb.gmra.mxu2 %vm1106_vm2, %v1533_v25 }
 0x522   : > { %v1561_v27 = vpop.f32.mrf.mxu2 }
 0x523   : > { %v1562_v28 = vadd.f32 %v3538_v26, %v1561_v27 }
 0x525   : > { %v1565_v29 = vadd.f32 %v1562_v28, %v4003_v18 }
 0x527   : > { %v1568_v30 = vsel %vm1106_vm2, %v1565_v29, 0.0 }
 0x528   : > { %1569 = vadd.xlane.f32.xlu0 %v1568_v30 }
 0x52a   : > { %v1563_v31 = vpop.f32.mrf.mxu2 }
 0x59b   : > { %v1570_v38 = vpop.xlane.xlu0 %1569 }
 0x59c   : > { %v1578_v39 = vmul.f32 %v4093_v37, %v1570_v38 }
 0x59e   : > { %v1579_v18 = vsub.f32 %v1565_v29, %v1578_v39 }
 0x5a0   : > { %v1580_v40 = vmul.f32 %v1579_v18, %v1579_v18 }
 0x5a2   : > { %v1581_v41 = vsel %vm1106_vm2, %v1580_v40, 0.0 }
 0x5a3   : > { %1582 = vadd.xlane.f32.xlu1 %v1581_v41 }
 0x5bc   : > { %1710 = vrot.lane.b32.xlu1 %v4098_v43, %s4488_s9 }
 0x5c4   : > { %1770 = vrot.lane.b32.xlu1 %v4098_v43, %s4413_s3 }
 0x616   : > { %v1583_v46 = vpop.xlane.xlu1 %1582 }
 0x617   : > { %v1584_v47 = vmul.f32 %v1583_v46, %v4093_v37 }
 0x619   : > { %v1585_v49 = vadd.f32 1e-05, %v1584_v47 }
 0x61b   : > { %3582 = vrsqrt.f32 %v1585_v49  ;;  %vm1592_vm10 = vweird.f32 %v1585_v49 }
 0x621   : > { %v3583_v51 = vpop.eup %3582 }
 0x622   : > { %v1587_v52 = vmul.f32 %v3583_v51, %v1585_v49  ;;  %vm1593_vm9 = vweird.f32 %v3583_v51 }
 0x623   : > { %vm1594_vm11 = vmor %vm1592_vm10, %vm1593_vm9 }
 0x624   : > { %v1588_v53 = vmul.f32 %v3583_v51, %v1587_v52 }
 0x626   : > { %v1589_v54 = vmul.f32 0.5, %v1588_v53 }
 0x628   : > { %v1590_v55 = vsub.f32 1.5, %v1589_v54 }
 0x62a   : > { %v1591_v56 = vmul.f32 %v3583_v51, %v1590_v55 }
 0x62c   : > { %v1595_v58 = vsel %vm1594_vm11, %v3583_v51, %v1591_v56 }
 0x62d   : > { %v1596_v61 = vmul.f32 %v1595_v58, %v1579_v18 }
 0x62e   : > { %v1711_v62 = vpop.permute.xlu1 %1710 }
 0x62f   : > { %v1600_v63 = vmul.f32 %v3539_v57, %v1596_v61  ;;  %v1716_v0 = vsel %vm1287_vm4, %v1711_v62, 0 }
 0x630   : > { %1725 = vmatpush.bf16.xpose.msra.mxu2 %v1716_v0 }
 0x631   : > { %v4110_v1 = vadd.f32 %v3540_v59, %v1600_v63  ;;  %v1745_v59 = vunpack.c.l.b16 %v4072_v60 }
 0x633   : > { %v1609_v50 = vpack.c.bf16 %v4110_v1, %v4110_v1  ;;  %v4137_v63 = vpack.c.b16 %v1745_v59, %v1745_v59 }
 0x635   : > { %3232 = vmatmul.msk.bf16.vlgmr.msrb.gmra.mxu3 %vm1106_vm2, %v1609_v50 }
 0x636   : > { %v1771_v2 = vpop.permute.xlu1 %1770 }
 0x637   : > { %v1776_v3 = vsel %vm1287_vm4, %v1771_v2, 0 }
 0x638   : > { %1785 = vmatpush.bf16.xpose.msrb.mxu0 %v1776_v3 }
 0x6b8   : > { %v1638_v5 = vpop.f32.mrf.mxu3 }
 0x6b9   : > { %v1639_v6 = vadd.f32 %v3541_v4, %v1638_v5 }
 0x6bb   : > { %v1642_v7 = vadd.f32 %v1639_v6, %v4039_v48 }
 0x6bd   : > { %v1648_v8 = vpack.c.bf16 %v1642_v7, %v1642_v7 }
 0x6bf   : > { %3233 = vmatmul.msk.bf16.vlgmr.msra.gmra.mxu0 %vm1287_vm4, %v1648_v8  ;;  %v1703_v9 = vunpack.c.l.b16 %v1648_v8 }
 0x6c0   : > { %v1640_v10 = vpop.f32.mrf.mxu3 }
 0x6c1   : > { %v1704_v11 = vpack.c.b16 %v1703_v9, %v1703_v9 }
 0x6c3   : > { %1768 = vrot.lane.b32.xlu0 %v1704_v11, %s4413_s3  ;;  %1705 = vrot.lane.b32.xlu2 %v1704_v11, %s4488_s9 }
 0x6cb   : > { %1827 = vrot.lane.b32.xlu2 %v4098_v43, %s4411_s2 }
 0x6d3   : > { %1825 = vrot.lane.b32.xlu2 %v1704_v11, %s4411_s2 }
 0x71d   : > { %v1706_v12 = vpop.permute.xlu2 %1705 }
 0x71e   : > { %3235 = vmatmul.msk.bf16.vlgmr.msra.gmra.mxu2 %vm1287_vm4, %v1706_v12 }
 0x725   : > { %v1828_v13 = vpop.permute.xlu2 %1827 }
 0x726   : > { %v1833_v15 = vsel %vm1287_vm4, %v1828_v13, 0 }
 0x727   : > { %1842 = vmatpush.bf16.xpose.msrb.mxu2 %v1833_v15 }
 0x72d   : > { %v1826_v17 = vpop.permute.xlu2 %1825 }
 0x72e   : > { %3239 = vmatmul.msk.bf16.vlgmr.msrb.gmra.mxu2 %vm1287_vm4, %v1826_v17 }
 0x735   : > { %v1769_v19 = vpop.permute.xlu0 %1768 }
 0x736   : > { %3237 = vmatmul.msk.bf16.vlgmr.msrb.gmra.mxu0 %vm1287_vm4, %v1769_v19 }
 0x73c   : > { %v1666_v16 = vpop.f32.mrf.mxu0 }
 0x73d   : > { %v1670_v20 = vmul.f32 0.35355338, %v1666_v16 }
 0x73f   : > { %v1671_v21 = vsel %vm1287_vm4, %v1670_v20, -inf }
 0x740   : > { %1672 = vmax.xlane.f32.xlu1 %v1671_v21 }
 0x744   : > { %v1668_v22 = vpop.f32.mrf.mxu0 }
 0x7a1   : > { %v1727_v23 = vpop.f32.mrf.mxu2 }
 0x7a2   : > { %v1731_v25 = vmul.f32 0.35355338, %v1727_v23 }
 0x7a4   : > { %v1732_v26 = vsel %vm1287_vm4, %v1731_v25, -inf }
 0x7a5   : > { %1733 = vmax.xlane.f32.xlu2 %v1732_v26 }
 0x7a9   : > { %v1729_v27 = vpop.f32.mrf.mxu2 }
 0x7b1   : > { %v1844_v28 = vpop.f32.mrf.mxu2 }
 0x7b2   : > { %v1848_v29 = vmul.f32 0.35355338, %v1844_v28 }
 0x7b3   : > { %v1787_v30 = vpop.f32.mrf.mxu0  ;;  %v1673_v31 = vpop.xlane.xlu1 %1672 }
 0x7b4   : > { %v1791_v24 = vmul.f32 0.35355338, %v1787_v30  ;;  %v1674_v32 = vsub.f32 %v1670_v20, %v1673_v31  ;;  %v1849_v33 = vsel %vm1287_vm4, %v1848_v29, -inf }
 0x7b5   : > { %1850 = vmax.xlane.f32.xlu0 %v1849_v33 }
 0x7b6   : > { %v1675_v34 = vmul.f32 1.442695, %v1674_v32  ;;  %v1792_v35 = vsel %vm1287_vm4, %v1791_v24, -inf }
 0x7b7   : > { %1793 = vmax.xlane.f32.xlu2 %v1792_v35 }
 0x7b8   : > { %3584 = vpow2.f32 %v1675_v34 }
 0x7b9   : > { %v1846_v36 = vpop.f32.mrf.mxu2 }
 0x7bb   : > { %v1789_v38 = vpop.f32.mrf.mxu0 }
 0x7bc   : > { %v3542_v38 = vld [vmem:[%s4495_s12] ss:$0 sm:$0xff] }
 0x7be   : > { %v3585_v39 = vpop.eup %3584 }
 0x7bf   : > { %v1677_v18 = vsel %vm1287_vm4, %v3585_v39, 0.0 }
 0x7c0   : > { %1678 = vadd.xlane.f32.xlu2 %v1677_v18 }
 0x818   : > { %v1734_v40 = vpop.xlane.xlu2 %1733 }
 0x819   : > { %v1735_v41 = vsub.f32 %v1731_v25, %v1734_v40 }
 0x81b   : > { %v1736_v42 = vmul.f32 1.442695, %v1735_v41 }
 0x81d   : > { %3586 = vpow2.f32 %v1736_v42 }
 0x823   : > { %v3587_v44 = vpop.eup %3586 }
 0x824   : > { %v1738_v45 = vsel %vm1287_vm4, %v3587_v44, 0.0 }
 0x825   : > { %1739 = vadd.xlane.f32.xlu1 %v1738_v45 }
 0x828   : > { %v1851_v46 = vpop.xlane.xlu0 %1850 }
 0x829   : > { %v1852_v47 = vsub.f32 %v1848_v29, %v1851_v46 }
 0x82a   : > { %v1794_v49 = vpop.xlane.xlu2 %1793 }
 0x82b   : > { %v1853_v51 = vmul.f32 1.442695, %v1852_v47  ;;  %v1795_v52 = vsub.f32 %v1791_v24, %v1794_v49 }
 0x82d   : > { %3588 = vpow2.f32 %v1853_v51  ;;  %v1796_v53 = vmul.f32 1.442695, %v1795_v52  ;;  %v3425_v51 = vld [vmem:[%s4497_s20 + $0x8] sm:$0xff]  ;;  %v3424_v52 = vld [vmem:[%s4497_s20] sm:$0xff] }
 0x82f   : > { %3590 = vpow2.f32 %v1796_v53 }
 0x833   : > { %v3589_v54 = vpop.eup %3588  ;;  %v1679_v55 = vpop.xlane.xlu2 %1678 }
 0x834   : > { %3592 = vrcp.f32 %v1679_v55  ;;  %v1855_v56 = vsel %vm1287_vm4, %v3589_v54, 0.0  ;;  %v3428_v55 = vld [vmem:[%s4498_s21 + $0x10] sm:$0xff] }
 0x835   : > { %v3591_v57 = vpop.eup %3590  ;;  %1856 = vadd.xlane.f32.xlu2 %v1855_v56 }
 0x836   : > { %v1798_v58 = vsel %vm1287_vm4, %v3591_v57, 0.0 }
 0x837   : > { %1799 = vadd.xlane.f32.xlu0 %v1798_v58 }
 0x83a   : > { %v3593_v61 = vpop.eup %3592 }
 0x83b   : > { %v1681_v62 = vmul.f32 %v3593_v61, %v3585_v39 }
 0x83d   : > { %v1682_v0 = vpack.c.bf16 %v1681_v62, %v1681_v62 }
 0x83e   : > { %1747 = vrot.lane.b32.xlu1 %v4137_v63, %s4488_s9 }
 0x83f   : > { %3234 = vmatmul.msk.bf16.vlgmr.msra.gmra.mxu1 %vm1287_vm4, %v1682_v0  ;;  %v3543_v0 = vld [vmem:[%s4500_s30] ss:$0 sm:$0xff] }
 0x84b   : > { %1804 = vrot.lane.b32.xlu0 %v4137_v63, %s4413_s3  ;;  %s4493_s3 = smov 8  }
 0x84d   : > { %1861 = vrot.lane.b32.xlu2 %v4137_v63, %s4411_s2  ;;  %s4492_s2 = sld [smem:[#allocation21_spill]] }
 0x853   : > { %v3423_v29 = vld [vmem:[%s4492_s2 + $0x8] sm:$0xff]  ;;  %v3422_v30 = vld [vmem:[%s4492_s2] sm:$0xff] }
 0x854   : > { %1922 = vmatpush.bf16.msra.mxu0 %v3423_v29  ;;  %v3430_v29 = vld [vmem:[%s4464_s25 + $0x10] sm:$0xff] }
 0x858   : > { %1923 = vmatpush.bf16.msra.mxu0 %v3422_v30 }
 0x898   : > { %v1740_v50 = vpop.xlane.xlu1 %1739 }
 0x899   : > { %3594 = vrcp.f32 %v1740_v50 }
 0x89f   : > { %v3595_v60 = vpop.eup %3594 }
 0x8a0   : > { %v1742_v3 = vmul.f32 %v3595_v60, %v3587_v44 }
 0x8a2   : > { %v1743_v9 = vpack.c.bf16 %v1742_v3, %v1742_v3 }
 0x8a8   : > { %v1857_v2 = vpop.xlane.xlu2 %1856 }
 0x8aa   : > { %v1800_v4 = vpop.xlane.xlu0 %1799 }
 0x8ab   : > { %3596 = vrcp.f32 %v1800_v4 }
 0x8ac   : > { %3598 = vrcp.f32 %v1857_v2  ;;  %v3544_v2 = vld [vmem:[%s4501_s26] ss:$0 sm:$0xff] }
 0x8b0   : > { %v1862_v5 = vpop.permute.xlu2 %1861  ;;  %v1748_v6 = vpop.permute.xlu1 %1747 }
 0x8b1   : > { %v1867_v7 = vsel %vm1328_vm5, %v1862_v5, 0  ;;  %v1753_v8 = vsel %vm1328_vm5, %v1748_v6, 0  ;;  %v3597_v10 = vpop.eup %3596  ;;  %v3427_v6 = vld [vmem:[%s4498_s21 + $0x8] sm:$0xff] }
 0x8b2   : > { %1762 = vmatpush.bf16.msra.mxu3 %v1753_v8  ;;  %v3599_v11 = vpop.eup %3598  ;;  %v1802_v12 = vmul.f32 %v3597_v10, %v3591_v57  ;;  %v3545_v8 = vld [vmem:[%s4502_s11] ss:$0 sm:$0xff]  ;;  %s4505_s11 = sld [smem:[#allocation31_spill]] }
 0x8b3   : > { %v1859_v19 = vmul.f32 %v3599_v11, %v3589_v54 }
 0x8b4   : > { %v1803_v16 = vpack.c.bf16 %v1802_v12, %v1802_v12 }
 0x8b5   : > { %3236 = vmatmul.msk.bf16.vlgmr.msra.gmra.mxu3 %vm1287_vm4, %v1743_v9  ;;  %v1860_v20 = vpack.c.bf16 %v1859_v19, %v1859_v19 }
 0x8b6   : > { %1876 = vmatpush.bf16.msrb.mxu3 %v1867_v7  ;;  %v3426_v7 = vld [vmem:[%s4498_s21] sm:$0xff] }
 0x8b8   : > { %s4506_s28 = smov %s4505_s11 }
 0x8bc   : > { %v1698_v13 = vpop.f32.mrf.mxu1 }
 0x8bd   : > { %v1805_v15 = vpop.permute.xlu0 %1804 }
 0x8be   : > { %v1810_v17 = vsel %vm1328_vm5, %v1805_v15, 0  ;;  %v3546_v15 = vld [vmem:[%s4504_s1] ss:$0 sm:$0xff] }
 0x8bf   : > { %1819 = vmatpush.bf16.msrb.mxu1 %v1810_v17 }
 0x8c2   : > { %3238 = vmatmul.msk.bf16.vlgmr.msrb.gmra.mxu1 %vm1287_vm4, %v1803_v16 }
 0x8c3   : > { %1992 = vmatpush.bf16.msra.mxu1 %v3425_v51 }
 0x8c4   : > { %v1700_v21 = vpop.f32.mrf.mxu1 }
 0x8c5   : > { %3240 = vmatmul.msk.bf16.vlgmr.msrb.gmra.mxu3 %vm1287_vm4, %v1860_v20 }
 0x8c7   : > { %1993 = vmatpush.bf16.msra.mxu1 %v3424_v52 }
 0x938   : > { %v1764_v22 = vpop.f32.mrf.mxu3 }
 0x939   : > { %1883 = vrot.lane.b32.xlu1 %v1764_v22, %s4493_s3 }
 0x93f   : > { %v1821_v23 = vpop.f32.mrf.mxu1 }
 0x940   : > { %v1766_v25 = vpop.f32.mrf.mxu3 }
 0x941   : > { %1887 = vrot.lane.b32.xlu1 %v1821_v23, %s4494_s6 }
 0x947   : > { %v1823_v26 = vpop.f32.mrf.mxu1 }
 0x948   : > { %v1878_v27 = vpop.f32.mrf.mxu3 }
 0x949   : > { %1891 = vrot.lane.b32.xlu0 %v1878_v27, %s4496_s13 }
 0x950   : > { %v1880_v28 = vpop.f32.mrf.mxu3 }
 0x951   : > { %v3431_v28 = vld [vmem:[%s4464_s25 + $0x18] sm:$0xff]  ;;  %s4511_s25 = smov 112  }
 0x952   : > { %2119 = vmatpush.bf16.msra.mxu3 %v3431_v28 }
 0x956   : > { %2120 = vmatpush.bf16.msra.mxu3 %v3430_v29 }
 0x9ab   : > { %v1884_v31 = vpop.permute.xlu1 %1883 }
 0x9ac   : > { %v1894_v32 = vsel %vm1287_vm4, %v1698_v13, %v1884_v31 }
 0x9b3   : > { %v1888_v24 = vpop.permute.xlu1 %1887 }
 0x9b4   : > { %v1895_v33 = vsel %vm1529_vm6, %v1894_v32, %v1888_v24 }
 0x9bb   : > { %v1892_v34 = vpop.permute.xlu0 %1891 }
 0x9bc   : > { %v1896_v35 = vsel %vm1531_vm7, %v1895_v33, %v1892_v34 }
 0x9bd   : > { %v1897_v36 = vpack.c.bf16 %v1896_v35, %v1896_v35 }
 0x9bf   : > { %3249 = vmatmul.msk.bf16.vlgmr.msra.gmra.mxu0 %vm1106_vm2, %v1897_v36 }
 0xa3c   : > { %v1925_v39 = vpop.f32.mrf.mxu0 }
 0xa3d   : > { %v1926_v18 = vadd.f32 %v3542_v38, %v1925_v39  ;;  %v3547_v39 = vld [vmem:[%s4505_s11] ss:$0 sm:$0xff]  ;;  %s4509_s11 = smov 72  }
 0xa3f   : > { %v1929_v40 = vadd.f32 %v1926_v18, %v4110_v1  ;;  %v3429_v1 = vld [vmem:[%s4498_s21 + $0x18] sm:$0xff] }
 0xa40   : > { %2045 = vmatpush.bf16.msra.mxu2 %v3429_v1 }
 0xa41   : > { %v1932_v41 = vsel %vm1106_vm2, %v1929_v40, 0.0 }
 0xa42   : > { %1933 = vadd.xlane.f32.xlu2 %v1932_v41 }
 0xa44   : > { %v1927_v42 = vpop.f32.mrf.mxu0  ;;  %2046 = vmatpush.bf16.msra.mxu2 %v3428_v55 }
 0xa48   : > { %2047 = vmatpush.bf16.msra.mxu2 %v3427_v6 }
 0xa4c   : > { %2048 = vmatpush.bf16.msra.mxu2 %v3426_v7 }
 0xab5   : > { %v1934_v44 = vpop.xlane.xlu2 %1933 }
 0xab6   : > { %v1935_v45 = vmul.f32 %v1934_v44, %v4093_v37 }
 0xab8   : > { %v1936_v46 = vsub.f32 %v1929_v40, %v1935_v45  ;;  %v3548_v40 = vld [vmem:[%s4507_s7] ss:$0 sm:$0xff]  ;;  %s4510_s7 = smov 88  }
 0xaba   : > { %v1937_v47 = vmul.f32 %v1936_v46, %v1936_v46 }
 0xabc   : > { %v1938_v49 = vsel %vm1106_vm2, %v1937_v47, 0.0 }
 0xabd   : > { %1939 = vadd.xlane.f32.xlu1 %v1938_v49 }
 0xad6   : > { %2127 = vrot.lane.b32.xlu1 %v3996_v14, %s4499_s27 }
 0xb30   : > { %v1940_v53 = vpop.xlane.xlu1 %1939 }
 0xb31   : > { %v1941_v54 = vmul.f32 %v1940_v53, %v4093_v37 }
 0xb33   : > { %v1942_v56 = vadd.f32 1e-05, %v1941_v54 }
 0xb35   : > { %3600 = vrsqrt.f32 %v1942_v56  ;;  %vm1949_vm13 = vweird.f32 %v1942_v56 }
 0xb3b   : > { %v3601_v57 = vpop.eup %3600 }
 0xb3c   : > { %v1944_v58 = vmul.f32 %v3601_v57, %v1942_v56  ;;  %vm1950_vm12 = vweird.f32 %v3601_v57 }
 0xb3d   : > { %vm1951_vm14 = vmor %vm1949_vm13, %vm1950_vm12 }
 0xb3e   : > { %v1945_v59 = vmul.f32 %v3601_v57, %v1944_v58 }
 0xb40   : > { %v1946_v14 = vmul.f32 0.5, %v1945_v59 }
 0xb42   : > { %v1947_v61 = vsub.f32 1.5, %v1946_v14 }
 0xb44   : > { %v1948_v62 = vmul.f32 %v3601_v57, %v1947_v61 }
 0xb46   : > { %v1952_v50 = vsel %vm1951_vm14, %v3601_v57, %v1948_v62 }
 0xb47   : > { %v1953_v60 = vmul.f32 %v1952_v50, %v1936_v46  ;;  %v3549_v46 = vld [vmem:[%s4463_s29 + $0x1] ss:$0 sm:$0xff]  ;;  %s4514_s29 = smov 80  }
 0xb48   : > { %v2128_v51 = vpop.permute.xlu1 %2127 }
 0xb49   : > { %v1957_v3 = vmul.f32 %v3543_v0, %v1953_v60 }
 0xb4b   : > { %v1961_v4 = vadd.f32 %v3544_v2, %v1957_v3 }
 0xb4d   : > { %v1966_v5 = vpack.c.bf16 %v1961_v4, %v1961_v4 }
 0xb4f   : > { %3258 = vmatmul.msk.bf16.vlgmr.msra.gmra.mxu1 %vm1106_vm2, %v1966_v5 }
 0xbcc   : > { %v1995_v9 = vpop.f32.mrf.mxu1 }
 0xbcd   : > { %v1996_v10 = vadd.f32 %v3545_v8, %v1995_v9 }
 0xbcf   : > { %v1999_v11 = vmax.f32 %v1996_v10, 0.0 }
 0xbd1   : > { %v2008_v12 = vpack.c.bf16 %v1999_v11, %v1999_v11 }
 0xbd3   : > { %3275 = vmatmul.msk.bf16.vlgmr.msra.gmra.mxu2 %vm2037_vm15, %v2008_v12 }
 0xbd4   : > { %v1997_v13 = vpop.f32.mrf.mxu1 }
 0xc56   : > { %v2050_v17 = vpop.f32.mrf.mxu2 }
 0xc57   : > { %v2051_v19 = vadd.f32 %v3546_v15, %v2050_v17 }
 0xc59   : > { %v2054_v16 = vadd.f32 %v2051_v19, %v1961_v4 }
 0xc5b   : > { %v2057_v20 = vsel %vm1106_vm2, %v2054_v16, 0.0 }
 0xc5c   : > { %2058 = vadd.xlane.f32.xlu0 %v2057_v20 }
 0xc5e   : > { %v2052_v21 = vpop.f32.mrf.mxu2 }
 0xccf   : > { %v2059_v22 = vpop.xlane.xlu0 %2058 }
 0xcd0   : > { %v2060_v23 = vmul.f32 %v2059_v22, %v4093_v37 }
 0xcd2   : > { %v2061_v25 = vsub.f32 %v2054_v16, %v2060_v23 }
 0xcd4   : > { %v2062_v26 = vmul.f32 %v2061_v25, %v2061_v25 }
 0xcd6   : > { %v2063_v27 = vsel %vm1106_vm2, %v2062_v26, 0.0 }
 0xcd7   : > { %2064 = vadd.xlane.f32.xlu2 %v2063_v27 }
 0xd4a   : > { %v2065_v30 = vpop.xlane.xlu2 %2064 }
 0xd4b   : > { %v2066_v31 = vmul.f32 %v2065_v30, %v4093_v37 }
 0xd4d   : > { %v2067_v24 = vadd.f32 1e-05, %v2066_v31 }
 0xd4f   : > { %3602 = vrsqrt.f32 %v2067_v24  ;;  %vm2074_vm1 = vweird.f32 %v2067_v24 }
 0xd55   : > { %v3603_v32 = vpop.eup %3602 }
 0xd56   : > { %v2069_v33 = vmul.f32 %v3603_v32, %v2067_v24  ;;  %vm2075_vm0 = vweird.f32 %v3603_v32 }
 0xd57   : > { %vm2076_vm3 = vmor %vm2074_vm1, %vm2075_vm0 }
 0xd58   : > { %v2070_v34 = vmul.f32 %v3603_v32, %v2069_v33 }
 0xd5a   : > { %v2071_v35 = vmul.f32 0.5, %v2070_v34 }
 0xd5c   : > { %v2072_v36 = vsub.f32 1.5, %v2071_v35 }
 0xd5e   : > { %v2073_v38 = vmul.f32 %v3603_v32, %v2072_v36 }
 0xd60   : > { %v2077_v18 = vsel %vm2076_vm3, %v3603_v32, %v2073_v38 }
 0xd61   : > { %v2078_v41 = vmul.f32 %v2077_v18, %v2061_v25 }
 0xd63   : > { %v2082_v42 = vmul.f32 %v3547_v39, %v2078_v41 }
 0xd65   : > { %v4189_v44 = vadd.f32 %v3548_v40, %v2082_v42 }
 0xd67   : > { %v2092_v45 = vpack.c.bf16 %v4189_v44, %v4189_v44 }
 0xd69   : > { %3289 = vmatmul.msk.bf16.vlgmr.msra.gmra.mxu3 %vm1106_vm2, %v2092_v45 }
 0xdec   : > { %v2122_v47 = vpop.f32.mrf.mxu3 }
 0xded   : > { %v2123_v49 = vadd.f32 %v3549_v46, %v2122_v47 }
 0xdef   : > { %v2130_v52 = vadd.f32 %v2128_v51, %v2123_v49  ;;  %v2139_v11 = vpack.c.bf16 %v2123_v49, %v2123_v49 }
 0xdf1   : > { %v2138_v1 = vpack.c.bf16 %v2130_v52, %v2130_v52  ;;  %v2178_v16 = vunpack.c.l.b16 %v2139_v11 }
 0xdf3   : > { %v2141_v53 = vunpack.c.l.b16 %v2138_v1  ;;  %v2179_v21 = vpack.c.b16 %v2178_v16, %v2178_v16 }
 0xdf4   : > { %v2124_v54 = vpop.f32.mrf.mxu3 }
 0xdf5   : > { %v2142_v55 = vpack.c.b16 %v2141_v53, %v2141_v53 }
 0xdf7   : > { %2317 = vrot.lane.b32.xlu1 %v2142_v55, %s4509_s11  ;;  %2201 = vrot.lane.b32.xlu2 %v2142_v55, %s4488_s9 }
 0xdf8   : > { %2203 = vrot.lane.b32.xlu0 %v2142_v55, %s4510_s7 }
 0xdff   : > { %2258 = vrot.lane.b32.xlu1 %v2142_v55, %s4511_s25  ;;  %2315 = vrot.lane.b32.xlu2 %v2142_v55, %s4512_s15 }
 0xe00   : > { %2143 = vrot.lane.b32.xlu0 %v2142_v55, %s4513_s4 }
 0xe08   : > { %2260 = vrot.lane.b32.xlu0 %v2142_v55, %s4514_s29 }
 0xe51   : > { %v2202_v14 = vpop.permute.xlu2 %2201 }
 0xe59   : > { %v2316_v2 = vpop.permute.xlu2 %2315 }
 0xe69   : > { %v2318_v56 = vpop.permute.xlu1 %2317 }
 0xe6a   : > { %v2323_v57 = vsel %vm1287_vm4, %v2318_v56, 0  ;;  %v2204_v58 = vpop.permute.xlu0 %2203 }
 0xe6b   : > { %v2209_v59 = vsel %vm1287_vm4, %v2204_v58, 0 }
 0xe6c   : > { %2218 = vmatpush.bf16.xpose.msrb.mxu2 %v2209_v59 }
 0xe71   : > { %v2259_v60 = vpop.permute.xlu1 %2258 }
 0xe72   : > { %v2144_v61 = vpop.permute.xlu0 %2143 }
 0xe73   : > { %v2149_v62 = vsel %vm1287_vm4, %v2144_v61, 0  ;;  %3297 = vmatmul.msk.bf16.vlgmr.msrb.gmra.mxu2 %vm1287_vm4, %v2202_v14  ;;  %v3433_v61 = vld [vmem:[%s3805_s8 + $0x18] sm:$0xff] }
 0xe74   : > { %2332 = vmatpush.bf16.xpose.msra.mxu2 %v2323_v57  ;;  %2158 = vmatpush.bf16.xpose.msrb.mxu0 %v2149_v62 }
 0xe7a   : > { %v2261_v0 = vpop.permute.xlu0 %2260 }
 0xe7b   : > { %v2266_v50 = vsel %vm1287_vm4, %v2261_v0, 0  ;;  %3295 = vmatmul.msk.bf16.vlgmr.msrb.gmra.mxu0 %vm1287_vm4, %v2138_v1  ;;  %v3432_v0 = vld [vmem:[%s3805_s8 + $0x10] sm:$0xff] }
 0xe7c   : > { %2275 = vmatpush.bf16.xpose.msra.mxu0 %v2266_v50 }
 0xe83   : > { %3301 = vmatmul.msk.bf16.vlgmr.msra.gmra.mxu2 %vm1287_vm4, %v2316_v2 }
 0xe84   : > { %2412 = vmatpush.bf16.msrb.mxu0 %v3433_v61 }
 0xe88   : > { %2413 = vmatpush.bf16.msrb.mxu0 %v3432_v0  ;;  %v3553_v0 = vld [vmem:[%s4491_s5 + $0x1] ss:$0 sm:$0xff] }
 0xe8b   : > { %3299 = vmatmul.msk.bf16.vlgmr.msra.gmra.mxu0 %vm1287_vm4, %v2259_v60 }
 0xef6   : > { %v2220_v3 = vpop.f32.mrf.mxu2 }
 0xef7   : > { %v2224_v4 = vmul.f32 0.35355338, %v2220_v3 }
 0xef8   : > { %v2160_v5 = vpop.f32.mrf.mxu0 }
 0xef9   : > { %v2164_v6 = vmul.f32 0.35355338, %v2160_v5  ;;  %v2225_v7 = vsel %vm1287_vm4, %v2224_v4, -inf }
 0xefa   : > { %2226 = vmax.xlane.f32.xlu2 %v2225_v7 }
 0xefb   : > { %v2165_v8 = vsel %vm1287_vm4, %v2164_v6, -inf }
 0xefc   : > { %2166 = vmax.xlane.f32.xlu0 %v2165_v8 }
 0xefe   : > { %v2222_v9 = vpop.f32.mrf.mxu2 }
 0xf00   : > { %v2162_v10 = vpop.f32.mrf.mxu0 }
 0xf06   : > { %v2334_v12 = vpop.f32.mrf.mxu2 }
 0xf07   : > { %v2338_v13 = vmul.f32 0.35355338, %v2334_v12 }
 0xf08   : > { %v2277_v15 = vpop.f32.mrf.mxu0 }
 0xf09   : > { %v2281_v17 = vmul.f32 0.35355338, %v2277_v15  ;;  %v2339_v19 = vsel %vm1287_vm4, %v2338_v13, -inf }
 0xf0a   : > { %2340 = vmax.xlane.f32.xlu1 %v2339_v19 }
 0xf0b   : > { %v2282_v20 = vsel %vm1287_vm4, %v2281_v17, -inf }
 0xf0c   : > { %2283 = vmax.xlane.f32.xlu2 %v2282_v20 }
 0xf0e   : > { %v2336_v22 = vpop.f32.mrf.mxu2 }
 0xf10   : > { %2180 = vrot.lane.b32.xlu0 %v2179_v21, %s4499_s27  ;;  %v2279_v23 = vpop.f32.mrf.mxu0  ;;  %s4516_s27 = smov 48  }
 0xf23   : > { %2237 = vrot.lane.b32.xlu1 %v2179_v21, %s4515_s0  ;;  %s4517_s0 = smov 40  }
 0xf6d   : > { %v2227_v25 = vpop.xlane.xlu2 %2226 }
 0xf6e   : > { %v2228_v26 = vsub.f32 %v2224_v4, %v2227_v25 }
 0xf6f   : > { %v2167_v27 = vpop.xlane.xlu0 %2166 }
 0xf70   : > { %v2229_v28 = vmul.f32 1.442695, %v2228_v26  ;;  %v2168_v29 = vsub.f32 %v2164_v6, %v2167_v27 }
 0xf72   : > { %3604 = vpow2.f32 %v2229_v28  ;;  %v2169_v30 = vmul.f32 1.442695, %v2168_v29 }
 0xf74   : > { %3606 = vpow2.f32 %v2169_v30 }
 0xf78   : > { %v3605_v31 = vpop.eup %3604 }
 0xf79   : > { %v2231_v24 = vsel %vm1287_vm4, %v3605_v31, 0.0 }
 0xf7a   : > { %v3607_v32 = vpop.eup %3606  ;;  %2232 = vadd.xlane.f32.xlu0 %v2231_v24 }
 0xf7b   : > { %v2171_v33 = vsel %vm1287_vm4, %v3607_v32, 0.0 }
 0xf7c   : > { %2172 = vadd.xlane.f32.xlu2 %v2171_v33 }
 0xf7d   : > { %v2341_v34 = vpop.xlane.xlu1 %2340 }
 0xf7e   : > { %v2342_v38 = vsub.f32 %v2338_v13, %v2341_v34 }
 0xf7f   : > { %v2284_v35 = vpop.xlane.xlu2 %2283 }
 0xf80   : > { %v2285_v36 = vsub.f32 %v2281_v17, %v2284_v35  ;;  %v2343_v41 = vmul.f32 1.442695, %v2342_v38 }
 0xf82   : > { %v2286_v39 = vmul.f32 1.442695, %v2285_v36  ;;  %v2181_v18 = vpop.permute.xlu0 %2180 }
 0xf83   : > { %v2186_v40 = vsel %vm1328_vm5, %v2181_v18, 0 }
 0xf84   : > { %3608 = vpow2.f32 %v2286_v39  ;;  %2195 = vmatpush.bf16.msrb.mxu1 %v2186_v40 }
 0xf85   : > { %3610 = vpow2.f32 %v2343_v41 }
 0xf8a   : > { %v3609_v42 = vpop.eup %3608 }
 0xf8b   : > { %v2288_v45 = vsel %vm1287_vm4, %v3609_v42, 0.0  ;;  %v3611_v46 = vpop.eup %3610 }
 0xf8c   : > { %2289 = vadd.xlane.f32.xlu2 %v2288_v45  ;;  %v2345_v47 = vsel %vm1287_vm4, %v3611_v46, 0.0  ;;  %v3435_v45 = vld [vmem:[%s4487_s22 + $0x18] sm:$0xff] }
 0xf8e   : > { %2294 = vrot.lane.b32.xlu0 %v2179_v21, %s4516_s27 }
 0xf94   : > { %2346 = vadd.xlane.f32.xlu2 %v2345_v47 }
 0xf95   : > { %v2238_v49 = vpop.permute.xlu1 %2237 }
 0xf96   : > { %v2243_v51 = vsel %vm1328_vm5, %v2238_v49, 0 }
 0xf97   : > { %2252 = vmatpush.bf16.msrb.mxu3 %v2243_v51 }
 0xfac   : > { %2351 = vrot.lane.b32.xlu2 %v2179_v21, %s4517_s0 }
 0xfb4   : > { %2494 = vrot.lane.b32.xlu2 %v4039_v48, %s4513_s4 }
 0xfbc   : > { %2506 = vrot.lane.b32.xlu2 %v4098_v43, %s4513_s4 }
 0xfc4   : > { %2566 = vrot.lane.b32.xlu2 %v4098_v43, %s4510_s7 }
 0xfcc   : > { %2623 = vrot.lane.b32.xlu2 %v4098_v43, %s4514_s29 }
 0xfed   : > { %v2233_v52 = vpop.xlane.xlu0 %2232 }
 0xfee   : > { %3612 = vrcp.f32 %v2233_v52 }
 0xfef   : > { %v2173_v1 = vpop.xlane.xlu2 %2172 }
 0xff0   : > { %3614 = vrcp.f32 %v2173_v1 }
 0xff4   : > { %v3613_v53 = vpop.eup %3612 }
 0xff5   : > { %v2235_v54 = vmul.f32 %v3613_v53, %v3605_v31 }
 0xff6   : > { %v3615_v55 = vpop.eup %3614 }
 0xff7   : > { %v2236_v56 = vpack.c.bf16 %v2235_v54, %v2235_v54  ;;  %v2175_v48 = vmul.f32 %v3615_v55, %v3607_v32  ;;  %v3550_v32 = vld [vmem:[%s4486_s23 + $0x1] ss:$0 sm:$0xff] }
 0xff9   : > { %v2176_v57 = vpack.c.bf16 %v2175_v48, %v2175_v48  ;;  %3298 = vmatmul.msk.bf16.vlgmr.msrb.gmra.mxu3 %vm1287_vm4, %v2236_v56  ;;  %v3552_v48 = vld [vmem:[%s4490_s16 + $0x1] ss:$0 sm:$0xff] }
 0xffb   : > { %3296 = vmatmul.msk.bf16.vlgmr.msrb.gmra.mxu1 %vm1287_vm4, %v2176_v57 }
 0xfff   : > { %v2290_v58 = vpop.xlane.xlu2 %2289 }
0x1000   : > { %3616 = vrcp.f32 %v2290_v58  ;;  %v2295_v59 = vpop.permute.xlu0 %2294 }
0x1001   : > { %v2300_v14 = vsel %vm1328_vm5, %v2295_v59, 0 }
0x1002   : > { %2309 = vmatpush.bf16.msra.mxu1 %v2300_v14 }
0x1006   : > { %v3617_v62 = vpop.eup %3616  ;;  %2486 = vmatpush.bf16.msrb.mxu1 %v3435_v45 }
0x1007   : > { %v2292_v50 = vmul.f32 %v3617_v62, %v3609_v42  ;;  %v2347_v2 = vpop.xlane.xlu2 %2346 }
0x1008   : > { %3618 = vrcp.f32 %v2347_v2 }
0x1009   : > { %v2293_v60 = vpack.c.bf16 %v2292_v50, %v2292_v50 }
0x100b   : > { %3300 = vmatmul.msk.bf16.vlgmr.msra.gmra.mxu1 %vm1287_vm4, %v2293_v60 }
0x100e   : > { %v3619_v3 = vpop.eup %3618 }
0x100f   : > { %v2349_v4 = vmul.f32 %v3619_v3, %v3611_v46  ;;  %v2352_v5 = vpop.permute.xlu2 %2351  ;;  %v3434_v46 = vld [vmem:[%s4487_s22 + $0x10] sm:$0xff] }
0x1010   : > { %v2357_v6 = vsel %vm1328_vm5, %v2352_v5, 0  ;;  %2487 = vmatpush.bf16.msrb.mxu1 %v3434_v46 }
0x1011   : > { %v2350_v7 = vpack.c.bf16 %v2349_v4, %v2349_v4  ;;  %2366 = vmatpush.bf16.msra.mxu3 %v2357_v6 }
0x1014   : > { %3302 = vmatmul.msk.bf16.vlgmr.msra.gmra.mxu3 %vm1287_vm4, %v2350_v7 }
0x1017   : > { %v4240_v8 = vpop.permute.xlu2 %2494 }
0x101f   : > { %v2507_v9 = vpop.permute.xlu2 %2506 }
0x1020   : > { %v2512_v10 = vsel %vm1287_vm4, %v2507_v9, 0 }
0x1021   : > { %2521 = vmatpush.bf16.xpose.msrb.mxu2 %v2512_v10 }
0x1027   : > { %v2567_v11 = vpop.permute.xlu2 %2566 }
0x1028   : > { %v2572_v12 = vsel %vm1287_vm4, %v2567_v11, 0 }
0x1029   : > { %2581 = vmatpush.bf16.xpose.msra.mxu0 %v2572_v12 }
0x102f   : > { %v2624_v13 = vpop.permute.xlu2 %2623 }
0x1030   : > { %v2629_v15 = vsel %vm1287_vm4, %v2624_v13, 0 }
0x1031   : > { %2638 = vmatpush.bf16.xpose.msra.mxu2 %v2629_v15 }
0x1078   : > { %v2197_v17 = vpop.f32.mrf.mxu1 }
0x107c   : > { %v2254_v19 = vpop.f32.mrf.mxu3 }
0x107d   : > { %2373 = vrot.lane.b32.xlu1 %v2254_v19, %s4493_s3 }
0x1080   : > { %v2199_v16 = vpop.f32.mrf.mxu1 }
0x1084   : > { %v2256_v20 = vpop.f32.mrf.mxu3 }
0x1088   : > { %v2311_v21 = vpop.f32.mrf.mxu1 }
0x1089   : > { %2377 = vrot.lane.b32.xlu0 %v2311_v21, %s4494_s6 }
0x1090   : > { %v2313_v22 = vpop.f32.mrf.mxu1 }
0x1097   : > { %v2368_v23 = vpop.f32.mrf.mxu3 }
0x1098   : > { %2381 = vrot.lane.b32.xlu1 %v2368_v23, %s4496_s13 }
0x109f   : > { %v2370_v25 = vpop.f32.mrf.mxu3 }
0x10ef   : > { %v2374_v26 = vpop.permute.xlu1 %2373 }
0x10f0   : > { %v2384_v28 = vsel %vm1287_vm4, %v2197_v17, %v2374_v26 }
0x10fb   : > { %v2378_v27 = vpop.permute.xlu0 %2377 }
0x10fc   : > { %v2385_v29 = vsel %vm1529_vm6, %v2384_v28, %v2378_v27 }
0x110a   : > { %v2382_v30 = vpop.permute.xlu1 %2381 }
0x110b   : > { %v2386_v31 = vsel %vm1531_vm7, %v2385_v29, %v2382_v30 }
0x110c   : > { %v2387_v24 = vpack.c.bf16 %v2386_v31, %v2386_v31 }
0x110e   : > { %3311 = vmatmul.msk.bf16.vlgmr.msrb.gmra.mxu0 %vm1106_vm2, %v2387_v24 }
0x118b   : > { %v2415_v33 = vpop.f32.mrf.mxu0 }
0x118c   : > { %v2416_v34 = vadd.f32 %v3550_v32, %v2415_v33 }
0x118e   : > { %v2419_v35 = vadd.f32 %v2416_v34, %v4189_v44 }
0x1190   : > { %v2424_v36 = vsel %vm1106_vm2, %v2419_v35, 0.0 }
0x1191   : > { %2425 = vadd.xlane.f32.xlu0 %v2424_v36 }
0x1193   : > { %v2417_v38 = vpop.f32.mrf.mxu0 }
0x1204   : > { %v2426_v39 = vpop.xlane.xlu0 %2425 }
0x1205   : > { %v2427_v18 = vmul.f32 %v2426_v39, %v4093_v37 }
0x1207   : > { %v2428_v40 = vsub.f32 %v2419_v35, %v2427_v18 }
0x1209   : > { %v2429_v41 = vmul.f32 %v2428_v40, %v2428_v40 }
0x120b   : > { %v2430_v42 = vsel %vm1106_vm2, %v2429_v41, 0.0 }
0x120c   : > { %2431 = vadd.xlane.f32.xlu1 %v2430_v42 }
0x1225   : > { %2680 = vrot.lane.b32.xlu1 %v4098_v43, %s4509_s11  ;;  %v3551_v43 = vld [vmem:[%s4489_s17 + $0x1] ss:$0 sm:$0xff] }
0x127f   : > { %v2432_v44 = vpop.xlane.xlu1 %2431 }
0x1280   : > { %v2433_v47 = vmul.f32 %v2432_v44, %v4093_v37 }
0x1282   : > { %v2434_v49 = vadd.f32 1e-05, %v2433_v47 }
0x1284   : > { %3620 = vrsqrt.f32 %v2434_v49  ;;  %vm2441_vm9 = vweird.f32 %v2434_v49 }
0x128a   : > { %v3621_v51 = vpop.eup %3620 }
0x128b   : > { %v2436_v52 = vmul.f32 %v3621_v51, %v2434_v49  ;;  %vm2442_vm8 = vweird.f32 %v3621_v51 }
0x128c   : > { %vm2443_vm10 = vmor %vm2441_vm9, %vm2442_vm8 }
0x128d   : > { %v2437_v1 = vmul.f32 %v3621_v51, %v2436_v52 }
0x128f   : > { %v2438_v53 = vmul.f32 0.5, %v2437_v1 }
0x1291   : > { %v2439_v54 = vsub.f32 1.5, %v2438_v53 }
0x1293   : > { %v2440_v55 = vmul.f32 %v3621_v51, %v2439_v54 }
0x1295   : > { %v2444_v56 = vsel %vm2443_vm10, %v3621_v51, %v2440_v55 }
0x1296   : > { %v2445_v57 = vmul.f32 %v2444_v56, %v2428_v40 }
0x1297   : > { %v2681_v58 = vpop.permute.xlu1 %2680 }
0x1298   : > { %v2449_v59 = vmul.f32 %v3551_v43, %v2445_v57  ;;  %v2686_v14 = vsel %vm1287_vm4, %v2681_v58, 0 }
0x1299   : > { %2695 = vmatpush.bf16.xpose.msrb.mxu0 %v2686_v14 }
0x129a   : > { %v4265_v61 = vadd.f32 %v3552_v48, %v2449_v59 }
0x129c   : > { %v2459_v62 = vpack.c.bf16 %v4265_v61, %v4265_v61 }
0x129e   : > { %3327 = vmatmul.msk.bf16.vlgmr.msrb.gmra.mxu1 %vm1106_vm2, %v2459_v62 }
0x131b   : > { %v2489_v50 = vpop.f32.mrf.mxu1 }
0x131c   : > { %v2490_v2 = vadd.f32 %v3553_v0, %v2489_v50 }
0x131e   : > { %v2497_v60 = vadd.f32 %v4240_v8, %v2490_v2 }
0x1320   : > { %v2505_v3 = vpack.c.bf16 %v2497_v60, %v2497_v60 }
0x1322   : > { %3333 = vmatmul.msk.bf16.vlgmr.msrb.gmra.mxu2 %vm1287_vm4, %v2505_v3  ;;  %v2562_v4 = vunpack.c.l.b16 %v2505_v3 }
0x1323   : > { %v2491_v5 = vpop.f32.mrf.mxu1 }
0x1324   : > { %v2563_v6 = vpack.c.b16 %v2562_v4, %v2562_v4 }
0x1326   : > { %2621 = vrot.lane.b32.xlu0 %v2563_v6, %s4511_s25  ;;  %2564 = vrot.lane.b32.xlu2 %v2563_v6, %s4488_s9  ;;  %s4519_s25 = sld [smem:[#allocation39_spill]] }
0x132e   : > { %2678 = vrot.lane.b32.xlu2 %v2563_v6, %s4512_s15 }
0x1380   : > { %v2565_v7 = vpop.permute.xlu2 %2564 }
0x1381   : > { %3335 = vmatmul.msk.bf16.vlgmr.msra.gmra.mxu0 %vm1287_vm4, %v2565_v7 }
0x1388   : > { %v2679_v9 = vpop.permute.xlu2 %2678 }
0x1391   : > { %3339 = vmatmul.msk.bf16.vlgmr.msrb.gmra.mxu0 %vm1287_vm4, %v2679_v9 }
0x1398   : > { %v2622_v10 = vpop.permute.xlu0 %2621 }
0x1399   : > { %3337 = vmatmul.msk.bf16.vlgmr.msra.gmra.mxu2 %vm1287_vm4, %v2622_v10 }
0x13a5   : > { %v2523_v8 = vpop.f32.mrf.mxu2 }
0x13a6   : > { %v2527_v11 = vmul.f32 0.35355338, %v2523_v8 }
0x13a8   : > { %v2528_v12 = vsel %vm1287_vm4, %v2527_v11, -inf }
0x13a9   : > { %2529 = vmax.xlane.f32.xlu2 %v2528_v12 }
0x13ad   : > { %v2525_v13 = vpop.f32.mrf.mxu2 }
0x13fe   : > { %v2583_v15 = vpop.f32.mrf.mxu0 }
0x13ff   : > { %v2587_v17 = vmul.f32 0.35355338, %v2583_v15 }
0x1401   : > { %v2588_v19 = vsel %vm1287_vm4, %v2587_v17, -inf }
0x1402   : > { %2589 = vmax.xlane.f32.xlu0 %v2588_v19  ;;  %v3437_v19 = vld [vmem:[%s4492_s2 + $0x18] sm:$0xff] }
0x1403   : > { %2775 = vmatpush.bf16.msrb.mxu2 %v3437_v19 }
0x1406   : > { %v2585_v16 = vpop.f32.mrf.mxu0 }
0x1407   : > { %v3436_v16 = vld [vmem:[%s4492_s2 + $0x10] sm:$0xff] }
0x1408   : > { %2776 = vmatpush.bf16.msrb.mxu2 %v3436_v16 }
0x140e   : > { %v2697_v20 = vpop.f32.mrf.mxu0 }
0x140f   : > { %v2701_v21 = vmul.f32 0.35355338, %v2697_v20 }
0x1411   : > { %v2702_v22 = vsel %vm1287_vm4, %v2701_v21, -inf }
0x1412   : > { %2703 = vmax.xlane.f32.xlu2 %v2702_v22 }
0x1416   : > { %2600 = vrot.lane.b32.xlu0 %v4137_v63, %s4510_s7  ;;  %v2699_v23 = vpop.f32.mrf.mxu0 }
0x141c   : > { %v2640_v25 = vpop.f32.mrf.mxu2  ;;  %v2530_v29 = vpop.xlane.xlu2 %2529 }
0x141d   : > { %v2644_v26 = vmul.f32 0.35355338, %v2640_v25  ;;  %v2531_v30 = vsub.f32 %v2527_v11, %v2530_v29 }
0x141f   : > { %v2645_v27 = vsel %vm1287_vm4, %v2644_v26, -inf  ;;  %v2532_v31 = vmul.f32 1.442695, %v2531_v30 }
0x1420   : > { %2646 = vmax.xlane.f32.xlu1 %v2645_v27 }
0x1421   : > { %3622 = vpow2.f32 %v2532_v31 }
0x1424   : > { %v2642_v28 = vpop.f32.mrf.mxu2 }
0x1425   : > { %v3554_v28 = vld [vmem:[%s4495_s12 + $0x1] ss:$0 sm:$0xff] }
0x1427   : > { %v3623_v24 = vpop.eup %3622 }
0x1428   : > { %v2534_v32 = vsel %vm1287_vm4, %v3623_v24, 0.0 }
0x1439   : > { %2540 = vrot.lane.b32.xlu1 %v4137_v63, %s4513_s4  ;;  %s3404_s4 = sshll.u32 %s4519_s25, 3 }
0x1440   : > { %2535 = vadd.xlane.f32.xlu0 %v2534_v32 }
0x1454   : > { %2714 = vrot.lane.b32.xlu0 %v4137_v63, %s4509_s11 }
0x1475   : > { %v2590_v33 = vpop.xlane.xlu0 %2589 }
0x1476   : > { %v2591_v34 = vsub.f32 %v2587_v17, %v2590_v33 }
0x1478   : > { %v2592_v35 = vmul.f32 1.442695, %v2591_v34 }
0x147a   : > { %3624 = vpow2.f32 %v2592_v35 }
0x1480   : > { %v3625_v36 = vpop.eup %3624 }
0x1481   : > { %v2594_v38 = vsel %vm1287_vm4, %v3625_v36, 0.0 }
0x1482   : > { %2595 = vadd.xlane.f32.xlu2 %v2594_v38 }
0x1485   : > { %v2704_v40 = vpop.xlane.xlu2 %2703 }
0x1486   : > { %v2705_v45 = vsub.f32 %v2701_v21, %v2704_v40  ;;  %v3443_v40 = vld [vmem:[%s4498_s21 + $0x38] sm:$0xff] }
0x1487   : > { %2903 = vmatpush.bf16.msra.mxu0 %v3443_v40 }
0x1488   : > { %v2601_v39 = vpop.permute.xlu0 %2600  ;;  %v2706_v44 = vmul.f32 1.442695, %v2705_v45 }
0x1489   : > { %v2606_v18 = vsel %vm1328_vm5, %v2601_v39, 0  ;;  %v3439_v39 = vld [vmem:[%s4497_s20 + $0x18] sm:$0xff] }
0x148a   : > { %2615 = vmatpush.bf16.msra.mxu1 %v2606_v18  ;;  %v3438_v18 = vld [vmem:[%s4497_s20 + $0x10] sm:$0xff] }
0x1493   : > { %v2647_v41 = vpop.xlane.xlu1 %2646 }
0x1494   : > { %v2648_v42 = vsub.f32 %v2644_v26, %v2647_v41 }
0x1496   : > { %v2649_v46 = vmul.f32 1.442695, %v2648_v42  ;;  %v3442_v42 = vld [vmem:[%s4498_s21 + $0x30] sm:$0xff] }
0x1497   : > { %2904 = vmatpush.bf16.msra.mxu0 %v3442_v42 }
0x1498   : > { %3626 = vpow2.f32 %v2649_v46 }
0x1499   : > { %3628 = vpow2.f32 %v2706_v44 }
0x149e   : > { %v3627_v47 = vpop.eup %3626 }
0x149f   : > { %v2651_v49 = vsel %vm1287_vm4, %v3627_v47, 0.0  ;;  %v3629_v51 = vpop.eup %3628 }
0x14a0   : > { %2652 = vadd.xlane.f32.xlu2 %v2651_v49  ;;  %v2708_v52 = vsel %vm1287_vm4, %v3629_v51, 0.0 }
0x14a8   : > { %2709 = vadd.xlane.f32.xlu2 %v2708_v52 }
0x14ab   : > { %v2541_v1 = vpop.permute.xlu1 %2540 }
0x14ac   : > { %v2546_v53 = vsel %vm1328_vm5, %v2541_v1, 0  ;;  %v3555_v1 = vld [vmem:[%s4500_s30 + $0x1] ss:$0 sm:$0xff] }
0x14ad   : > { %2555 = vmatpush.bf16.msrb.mxu3 %v2546_v53 }
0x14b3   : > { %v2536_v54 = vpop.xlane.xlu0 %2535 }
0x14b4   : > { %3630 = vrcp.f32 %v2536_v54  ;;  %v3556_v54 = vld [vmem:[%s4501_s26 + $0x1] ss:$0 sm:$0xff] }
0x14ba   : > { %v3631_v55 = vpop.eup %3630 }
0x14bb   : > { %v2538_v43 = vmul.f32 %v3631_v55, %v3623_v24 }
0x14bd   : > { %v2539_v56 = vpack.c.bf16 %v2538_v43, %v2538_v43 }
0x14bf   : > { %3334 = vmatmul.msk.bf16.vlgmr.msrb.gmra.mxu3 %vm1287_vm4, %v2539_v56 }
0x14c0   : > { %2657 = vrot.lane.b32.xlu2 %v4137_v63, %s4514_s29  ;;  %s4520_s29 = sld [smem:[#allocation35_spill]] }
0x14c6   : > { %v2715_v48 = vpop.permute.xlu0 %2714  ;;  %s3028_s11 = scalar_lea.hbm %s4520_s29, %s3404_s4  ;;  %s3664_s25 = scalar_lea.hbm %s4520_s29, 16 }
0x14c7   : > { %v2720_v57 = vsel %vm1328_vm5, %v2715_v48, 0  ;;  %s3032_s0 = sshll.u32 %s3028_s11, 4  ;;  %s3033_s0 = int_to_ptr.hbm [resolvable:$true] %s3032_s0 }
0x14c8   : > { %2729 = vmatpush.bf16.msrb.mxu1 %v2720_v57  ;;  %v3441_v57 = vld [vmem:[%s4498_s21 + $0x28] sm:$0xff] }
0x14c9   : > { %2905 = vmatpush.bf16.msra.mxu0 %v3441_v57 }
0x14f5   : > { %v2596_v58 = vpop.xlane.xlu2 %2595 }
0x14f6   : > { %3632 = vrcp.f32 %v2596_v58  ;;  %v3440_v58 = vld [vmem:[%s4498_s21 + $0x20] sm:$0xff] }
0x14f7   : > { %2906 = vmatpush.bf16.msra.mxu0 %v3440_v58 }
0x14fc   : > { %v3633_v59 = vpop.eup %3632 }
0x14fd   : > { %v2598_v14 = vmul.f32 %v3633_v59, %v3625_v36  ;;  %v3557_v59 = vld [vmem:[%s4503_s18 + $0x1] ss:$0 sm:$0xff] }
0x14ff   : > { %v2599_v62 = vpack.c.bf16 %v2598_v14, %v2598_v14 }
0x1501   : > { %3336 = vmatmul.msk.bf16.vlgmr.msra.gmra.mxu1 %vm1287_vm4, %v2599_v62 }
0x1513   : > { %v2653_v0 = vpop.xlane.xlu2 %2652 }
0x1514   : > { %3634 = vrcp.f32 %v2653_v0 }
0x151a   : > { %v3635_v2 = vpop.eup %3634 }
0x151b   : > { %v2710_v50 = vpop.xlane.xlu2 %2709  ;;  %v2655_v3 = vmul.f32 %v3635_v2, %v3627_v47 }
0x151c   : > { %3636 = vrcp.f32 %v2710_v50 }
0x151d   : > { %v2656_v7 = vpack.c.bf16 %v2655_v3, %v2655_v3 }
0x1522   : > { %v3637_v60 = vpop.eup %3636 }
0x1523   : > { %v2712_v4 = vmul.f32 %v3637_v60, %v3629_v51  ;;  %v2658_v63 = vpop.permute.xlu2 %2657  ;;  %v3558_v60 = vld [vmem:[%s4504_s1 + $0x1] ss:$0 sm:$0xff]  ;;  %s3658_s1 = sshra.s32 %s3033_s0, 4  ;;  %s3659_s1 = int_to_ptr.hbm [resolvable:$true] %s3658_s1 }
0x1524   : > { %v2663_v5 = vsel %vm1328_vm5, %v2658_v63, 0  ;;  %s3660_s2 = scalar_lea.hbm %s3659_s1, 8  ;;  %p3665_p0 = scmp.lt.s32.totalorder %s3659_s1, %s4520_s29 }
0x1525   : > { %v2713_v6 = vpack.c.bf16 %v2712_v4, %v2712_v4  ;;  %2672 = vmatpush.bf16.msra.mxu3 %v2663_v5  ;;  %p3661_p11 = scmp.ne.s32.totalorder %s3659_s1, %s3660_s2  ;;  %p3666_p1 = scmp.lt.s32.totalorder %s3664_s25, %s3660_s2 }
0x1527   : > { %3340 = vmatmul.msk.bf16.vlgmr.msrb.gmra.mxu1 %vm1287_vm4, %v2713_v6  ;;  %p3662_p12 = pnand %p3661_p11, %p3970_p5  ;;  %p3667_p2 = por %p3666_p1, %p3665_p0 }
0x1528   : > { %3338 = vmatmul.msk.bf16.vlgmr.msra.gmra.mxu3 %vm1287_vm4, %v2656_v7 }
0x1529   : > { %2849 = vmatpush.bf16.msrb.mxu3 %v3439_v39  ;;  %p3663_p13 = pneg %p3662_p12 }
0x152b   : > { %p3668_p3 = pnand %p3667_p2, %p3663_p13 }
0x152d   : > { %2850 = vmatpush.bf16.msrb.mxu3 %v3438_v18 }
0x1542   : > { %v2557_v9 = vpop.f32.mrf.mxu3 }
0x154a   : > { %v2559_v10 = vpop.f32.mrf.mxu3 }
0x157e   : > { %v2617_v8 = vpop.f32.mrf.mxu1 }
0x157f   : > { %2736 = vrot.lane.b32.xlu1 %v2617_v8, %s4493_s3  ;;  %s4521_s3 = sld [smem:[#allocation34_spill]] }
0x1586   : > { %v2619_v11 = vpop.f32.mrf.mxu1 }
0x15a4   : > { %v2731_v12 = vpop.f32.mrf.mxu1 }
0x15a5   : > { %2744 = vrot.lane.b32.xlu1 %v2731_v12, %s4496_s13  ;;  %s4518_s13 = sld [smem:[#allocation33_spill]] }
0x15ab   : > { %v2674_v13 = vpop.f32.mrf.mxu3 }
0x15ac   : > { %v2733_v15 = vpop.f32.mrf.mxu1  ;;  %2740 = vrot.lane.b32.xlu0 %v2674_v13, %s4494_s6  ;;  %s1029_s6 = sand.u32 1, %s3698_s10  }
0x15ad   : > { %s3153_s15 = sshll.u32 %s1029_s6, 3 }
0x15ae   : > { %s1031_s7 = scalar_lea.vmem [#allocation2], %s3153_s15 }
0x15af   : > { %s3030_s27 = sshll.u32 %s1031_s7, 4  ;;  %s3031_s27 = int_to_ptr.vmem [resolvable:$true] %s3030_s27 }
0x15b3   : > { %v2676_v17 = vpop.f32.mrf.mxu3 }
0x15f1   : > { %v2737_v20 = vpop.permute.xlu1 %2736 }
0x15f2   : > { %v2747_v21 = vsel %vm1287_vm4, %v2557_v9, %v2737_v20 }
0x1617   : > { %v2745_v23 = vpop.permute.xlu1 %2744 }
0x161e   : > { %v2741_v22 = vpop.permute.xlu0 %2740 }
0x161f   : > { %v2748_v25 = vsel %vm1529_vm6, %v2747_v21, %v2741_v22 }
0x1620   : > { %v2749_v26 = vsel %vm1531_vm7, %v2748_v25, %v2745_v23  ;;  %v3559_v23 = vld [vmem:[%s4506_s28 + $0x1] ss:$0 sm:$0xff] }
0x1621   : > { %v2750_v27 = vpack.c.bf16 %v2749_v26, %v2749_v26 }
0x1623   : > { %3349 = vmatmul.msk.bf16.vlgmr.msrb.gmra.mxu2 %vm1106_vm2, %v2750_v27  ;;  %v3560_v27 = vld [vmem:[%s4508_s14 + $0x1] ss:$0 sm:$0xff] }
0x16a6   : > { %v2778_v29 = vpop.f32.mrf.mxu2 }
0x16a7   : > { %v2779_v30 = vadd.f32 %v3554_v28, %v2778_v29 }
0x16a9   : > { %v2782_v31 = vadd.f32 %v2779_v30, %v4265_v61 }
0x16ab   : > { %v2787_v24 = vsel %vm1106_vm2, %v2782_v31, 0.0 }
0x16ac   : > { %2788 = vadd.xlane.f32.xlu0 %v2787_v24 }
0x16ae   : > { %v2780_v32 = vpop.f32.mrf.mxu2 }
0x171f   : > { %v2789_v33 = vpop.xlane.xlu0 %2788 }
0x1720   : > { %v2790_v34 = vmul.f32 %v2789_v33, %v4093_v37 }
0x1722   : > { %v2791_v35 = vsub.f32 %v2782_v31, %v2790_v34 }
0x1724   : > { %v2792_v36 = vmul.f32 %v2791_v35, %v2791_v35 }
0x1726   : > { %v2793_v38 = vsel %vm1106_vm2, %v2792_v36, 0.0  ;;  %v3444_v36 = vld [vmem:[%s3920_s19] sm:$0xff] }
0x1727   : > { %2794 = vadd.xlane.f32.xlu1 %v2793_v38 }
0x179a   : > { %v2795_v61 = vpop.xlane.xlu1 %2794 }
0x179b   : > { %v2796_v41 = vmul.f32 %v2795_v61, %v4093_v37 }
0x179d   : > { %v2797_v45 = vadd.f32 1e-05, %v2796_v41 }
0x179f   : > { %3638 = vrsqrt.f32 %v2797_v45  ;;  %vm2804_vm5 = vweird.f32 %v2797_v45 }
0x17a5   : > { %v3639_v46 = vpop.eup %3638 }
0x17a6   : > { %v2799_v44 = vmul.f32 %v3639_v46, %v2797_v45  ;;  %vm2805_vm4 = vweird.f32 %v3639_v46 }
0x17a7   : > { %vm2806_vm6 = vmor %vm2804_vm5, %vm2805_vm4 }
0x17a8   : > { %v2800_v47 = vmul.f32 %v3639_v46, %v2799_v44  ;;  %v3561_v44 = vld [vmem:[%s4518_s13] ss:$0 sm:$0xff]  ;;  %s3018_s13 = scalar_lea.sflag [#allocation3], %s1029_s6 }
0x17aa   : > { %v2801_v49 = vmul.f32 0.5, %v2800_v47 }
0x17ac   : > { %v2802_v51 = vsub.f32 1.5, %v2801_v49  ;;  %v3562_v49 = vld [vmem:[%s3915_s24] ss:$0 sm:$0xff] }
0x17ae   : > { %v2803_v52 = vmul.f32 %v3639_v46, %v2802_v51 }
0x17b0   : > { %v2807_v53 = vsel %vm2806_vm6, %v3639_v46, %v2803_v52 }
0x17b1   : > { %v2808_v55 = vmul.f32 %v2807_v53, %v2791_v35  ;;  %v3445_v35 = vld [vmem:[%s3920_s19 + $0x8] sm:$0xff]  ;;  %v3563_v53 = vld [vmem:[%s4521_s3] ss:$0 sm:$0xff] }
0x17b2   : > { %3009 = vmatpush.bf16.msra.mxu1 %v3445_v35 }
0x17b3   : > { %v2812_v43 = vmul.f32 %v3555_v1, %v2808_v55 }
0x17b5   : > { %v2816_v56 = vadd.f32 %v3556_v54, %v2812_v43 }
0x17b6   : > { %3010 = vmatpush.bf16.msra.mxu1 %v3444_v36 }
0x17b7   : > { %v2822_v48 = vpack.c.bf16 %v2816_v56, %v2816_v56 }
0x17b9   : > { %3365 = vmatmul.msk.bf16.vlgmr.msrb.gmra.mxu3 %vm1106_vm2, %v2822_v48 }
0x183c   : > { %v2852_v14 = vpop.f32.mrf.mxu3 }
0x183d   : > { %v2853_v62 = vadd.f32 %v3557_v59, %v2852_v14 }
0x183f   : > { %v2856_v0 = vmax.f32 %v2853_v62, 0.0 }
0x1841   : > { %v2866_v50 = vpack.c.bf16 %v2856_v0, %v2856_v0 }
0x1843   : > { %3391 = vmatmul.msk.bf16.vlgmr.msra.gmra.mxu0 %vm2037_vm15, %v2866_v50 }
0x1844   : > { %v2854_v2 = vpop.f32.mrf.mxu3 }
0x18c0   : > { %v2908_v3 = vpop.f32.mrf.mxu0 }
0x18c1   : > { %v2909_v4 = vadd.f32 %v3558_v60, %v2908_v3 }
0x18c3   : > { %v2912_v63 = vadd.f32 %v2909_v4, %v2816_v56 }
0x18c5   : > { %v2917_v5 = vsel %vm1106_vm2, %v2912_v63, 0.0 }
0x18c6   : > { %2918 = vadd.xlane.f32.xlu2 %v2917_v5 }
0x18c8   : > { %v2910_v6 = vpop.f32.mrf.mxu0 }
0x1939   : > { %v2919_v7 = vpop.xlane.xlu2 %2918 }
0x193a   : > { %v2920_v9 = vmul.f32 %v2919_v7, %v4093_v37 }
0x193c   : > { %v2921_v10 = vsub.f32 %v2912_v63, %v2920_v9 }
0x193e   : > { %v2922_v8 = vmul.f32 %v2921_v10, %v2921_v10 }
0x1940   : > { %v2923_v11 = vsel %vm1106_vm2, %v2922_v8, 0.0 }
0x1941   : > { %2924 = vadd.xlane.f32.xlu0 %v2923_v11 }
0x19b4   : > { %v2925_v12 = vpop.xlane.xlu0 %2924 }
0x19b5   : > { %v2926_v13 = vmul.f32 %v2925_v12, %v4093_v37 }
0x19b7   : > { %v2927_v15 = vadd.f32 1e-05, %v2926_v13 }
0x19b9   : > { %3640 = vrsqrt.f32 %v2927_v15  ;;  %vm2934_vm11 = vweird.f32 %v2927_v15 }
0x19bf   : > { %v3641_v17 = vpop.eup %3640 }
0x19c0   : > { %v2929_v19 = vmul.f32 %v3641_v17, %v2927_v15  ;;  %vm2935_vm7 = vweird.f32 %v3641_v17 }
0x19c1   : > { %vm2936_vm12 = vmor %vm2934_vm11, %vm2935_vm7 }
0x19c2   : > { %v2930_v16 = vmul.f32 %v3641_v17, %v2929_v19 }
0x19c4   : > { %v2931_v20 = vmul.f32 0.5, %v2930_v16 }
0x19c6   : > { %v2932_v21 = vsub.f32 1.5, %v2931_v20 }
0x19c8   : > { %v2933_v22 = vmul.f32 %v3641_v17, %v2932_v21 }
0x19ca   : > { %v2937_v25 = vsel %vm2936_vm12, %v3641_v17, %v2933_v22 }
0x19cb   : > { %v2938_v26 = vmul.f32 %v2937_v25, %v2921_v10 }
0x19cd   : > { %v2942_v28 = vmul.f32 %v3559_v23, %v2938_v26 }
0x19cf   : > { %v2946_v29 = vadd.f32 %v3560_v27, %v2942_v28 }
0x19d1   : > { %v2949_v30 = vsel %vm1106_vm2, %v2946_v29, 0.0 }
0x19d2   : > { %2950 = vadd.xlane.f32.xlu1 %v2949_v30 }
0x1a45   : > { %v2951_v31 = vpop.xlane.xlu1 %2950 }
0x1a46   : > { %v2952_v24 = vmul.f32 %v2951_v31, %v4093_v37 }
0x1a48   : > { %v2953_v32 = vsub.f32 %v2946_v29, %v2952_v24 }
0x1a4a   : > { %v2954_v33 = vmul.f32 %v2953_v32, %v2953_v32 }
0x1a4c   : > { %v2955_v34 = vsel %vm1106_vm2, %v2954_v33, 0.0 }
0x1a4d   : > { %2956 = vadd.xlane.f32.xlu2 %v2955_v34 }
0x1ac0   : > { %v2957_v38 = vpop.xlane.xlu2 %2956 }
0x1ac1   : > { %v2958_v39 = vmul.f32 %v2957_v38, %v4093_v37 }
0x1ac3   : > { %v2959_v18 = vadd.f32 1e-05, %v2958_v39 }
0x1ac5   : > { %3642 = vrsqrt.f32 %v2959_v18  ;;  %vm2966_vm14 = vweird.f32 %v2959_v18 }
0x1acb   : > { %v3643_v40 = vpop.eup %3642 }
0x1acc   : > { %v2961_v61 = vmul.f32 %v3643_v40, %v2959_v18  ;;  %vm2967_vm13 = vweird.f32 %v3643_v40 }
0x1acd   : > { %vm2968_vm15 = vmor %vm2966_vm14, %vm2967_vm13 }
0x1ace   : > { %v2962_v41 = vmul.f32 %v3643_v40, %v2961_v61 }
0x1ad0   : > { %v2963_v42 = vmul.f32 0.5, %v2962_v41 }
0x1ad2   : > { %v2964_v45 = vsub.f32 1.5, %v2963_v42 }
0x1ad4   : > { %v2965_v46 = vmul.f32 %v3643_v40, %v2964_v45 }
0x1ad6   : > { %v2969_v47 = vsel %vm2968_vm15, %v3643_v40, %v2965_v46 }
0x1ad7   : > { %v2970_v51 = vmul.f32 %v2969_v47, %v2953_v32 }
0x1ad9   : > { %v2974_v37 = vmul.f32 %v3561_v44, %v2970_v51 }
0x1adb   : > { %v2978_v52 = vadd.f32 %v3562_v49, %v2974_v37 }
0x1add   : > { %v2983_v1 = vpack.c.bf16 %v2978_v52, %v2978_v52 }
0x1adf   : > { %3402 = vmatmul.msk.bf16.vlgmr.msra.gmra.mxu1 %vm1106_vm2, %v2983_v1 }
0x1b5c   : > { %v3012_v54 = vpop.f32.mrf.mxu1 }
0x1b5d   : > { %v3013_v55 = vadd.f32 %v3563_v53, %v3012_v54 }
0x1b5f   : > { %3016 = vst [vmem:[%s1031_s7] sm:$0xff] %v3013_v55 }
0x1b60   : > { %3671 = shalt.err (!%p3668_p3)
}
0x1b61   : > { %3446 = dma.vmem_to_hbm [thread:$0]  (%p3970_p5), %s3031_s27, 128, %s3033_s0, %s3018_s13  }
0x1b64   : > { %v3014_v43 = vpop.f32.mrf.mxu1 }
0x1b65 PF: > { %s4523_s3 = sld [smem:[#allocation38_spill]] }
0x1b66   : > { %s4524_s6 = sld [smem:[#allocation36_spill]] }
0x1b6b   : > { %p3452_p4 = scmp.ge.s32.totalorder %s4523_s3, 2 }
0x1b6c   : > { %s3044_s15 = sand.u32 1, %s4524_s6  }
0x1b6d   : > { %p3449_p7 = pnand %p3452_p4, %p3974_p6  ;;  %s3045_s11 = scalar_lea.sflag [#allocation3], %s3044_s15 }
0x1b6f   : > { %p3450_p8 = pneg %p3449_p7 }
0x1b71   : > { %3689 = dma.done.wait (%p3450_p8), %s3045_s11, 128  }
0x1b72   : > { %3691 = vsyncadd (%p3450_p8), %s3045_s11, 4294967168  ;;  %s4526_s15 = sld [smem:[#allocation40_spill]]  ;;  %s4529_s7 = smov %s3698_s10 }
0x1b73   : > { %s4527_s1 = sld [smem:[#allocation37_spill]] }
0x1b74   : > { %s4528_s11 = sld [smem:[#allocation41_spill]] }
0x1b78   : > { %p77_p9 = scmp.ge.s32.totalorder %s4526_s15, 4  }
0x1b79   : > { %s4530_s10 = smov %s4527_s1 }
0x1b7a   :  { %79 = sbr.rel (!%p77_p9) target bundleno = 76 (0x4c), region = 244 }
0x1b7f   :  { %3051 = vsyncpa [#allocation3], 1 }
0x1b80   :  { %3053 = vsyncpa [#allocation3 + $0x1], 1 }

</bundles_post_ra>
